<compile_context>
chip_gen: v7x
topology: tpu7x:2x2x1
jax: 0.10.0
libtpu: 0.0.40
codegen_flags: <defaults>
</compile_context>

<pallas_src>
import math

import jax
import jax.numpy as jnp
import numpy as np
from jax import lax
from jax.experimental import pallas as pl
from jax.experimental.pallas import tpu as pltpu


def luna_block_forward(x_ncdhw, w1, b1, w2, b2, *, d_tile=None,
                       compute_dtype=jnp.bfloat16):
    """x_ncdhw: (N, Cin, D, H, W); w*: (3,3,3,cin,cout); b*: (cout,). Returns NCDHW."""
    N, Cin, D, H, W = x_ncdhw.shape
    Cmid = w1.shape[-1]
    assert D % 2 == 0 and H % 2 == 0 and W % 2 == 0

    if d_tile is None:
        # Prefer d_tile == D (no overlapping-slab duplication in HBM); for large D
        # fall back to the largest even divisor <= 16.
        d_tile = D if D <= 16 else max(c for c in range(2, 17, 2) if D % c == 0)
    d_tile = min(d_tile, D)
    assert D % d_tile == 0 and d_tile % 2 == 0

    Dt, nDt = d_tile, D // d_tile
    Dslab, D1 = Dt + 4, Dt + 2          # input slab depth / conv1-activation depth (+halo)
    Hp, Wp = H + 2, W + 2
    Do, Ho, Wo = D // 2, H // 2, W // 2
    WpC, WC, WoC = Wp * Cin, W * Cmid, Wo * Cmid
    cdt = compute_dtype
    # The banded (Toeplitz-in-W) weights keep all of W in lanes; this only pays off
    # while WC / WoC stay around <= 256 lanes.
    # TODO(synk): tile W (per-Wt(+2)-window banded weights) for large W*Cmid.

    # ---- input prep: channels-last, pad (D by 2, H by 1, W by 1), fold (W,C) into
    #      lanes; cut overlapping depth slabs only when nDt > 1 ----
    x_ndhwc = jnp.transpose(x_ncdhw, (0, 2, 3, 4, 1))                 # (N, D, H, W, Cin)
    xp = jnp.pad(x_ndhwc, ((0, 0), (2, 2), (1, 1), (1, 1), (0, 0)))
    xp = xp.reshape(N, D + 4, Hp, WpC).astype(cdt)
    if nDt == 1:
        slabs = xp[:, None]                                           # no duplication
    else:
        slabs = jnp.stack([xp[:, t * Dt:t * Dt + Dslab] for t in range(nDt)], axis=1)
    # slabs: (N, nDt, Dslab, Hp, WpC)

    # ---- banded weights with kh folded into the contraction (row) dim.
    #      rows fold (kh, input-w, cin); cols fold (output-w, cout).
    #      conv2's even/odd variants fold the W max-pool and its W zero-padding. ----
    kw_i = np.arange(3)[:, None, None]
    s1 = (np.arange(Wp)[None, :, None]
          == np.arange(W)[None, None, :] + kw_i).astype(np.float32)            # (3,Wp,W)
    s2e = (np.arange(W)[None, :, None]
           == 2 * np.arange(Wo)[None, None, :] + kw_i - 1).astype(np.float32)  # (3,W,Wo)
    s2o = (np.arange(W)[None, :, None]
           == 2 * np.arange(Wo)[None, None, :] + kw_i).astype(np.float32)      # (3,W,Wo)
    w1b = jnp.einsum("kiw,abkco->abicwo", s1, w1).reshape(3, 3 * WpC, WC).astype(cdt)
    w2e = jnp.einsum("kiw,abkco->abicwo", s2e, w2).reshape(3, 3 * WC, WoC)
    w2o = jnp.einsum("kiw,abkco->abicwo", s2o, w2).reshape(3, 3 * WC, WoC)
    w2eo = jnp.concatenate([w2e, w2o], axis=-1).astype(cdt)            # (3, 3*WC, 2*WoC)

    b1t = jnp.tile(b1, W).reshape(1, WC).astype(jnp.float32)
    b2t = jnp.tile(b2, Wo).reshape(1, WoC).astype(jnp.float32)

    def kernel(x_ref, w1_ref, w2_ref, b1_ref, b2_ref, o_ref):
        t = pl.program_id(1)
        xb = x_ref[0, 0]                                 # (Dslab, Hp, WpC) bf16, no cast

        # ---- conv1: 3 matmuls (kh folded into K = 3*WpC) ----
        acc1 = jnp.zeros((D1 * H, WC), jnp.float32)
        for kd in range(3):
            lhs = jnp.concatenate(
                [xb[kd:kd + D1, kh:kh + H, :].reshape(D1 * H, WpC) for kh in range(3)],
                axis=-1)                                 # (D1*H, 3*WpC) bf16
            acc1 = acc1 + jnp.dot(lhs, w1_ref[kd],
                                  preferred_element_type=jnp.float32)
        h = jnp.maximum(acc1.reshape(D1, H, WC) + b1_ref[...], 0.0)

        # conv1-activation depth rows outside the real volume must be exactly zero
        # (they are conv2's depth zero-padding) -- only hits the first/last tile.
        g = lax.broadcasted_iota(jnp.int32, (D1, WC), 0) + (t * Dt - 1)
        valid = ((g >= 0) & (g < D)).reshape(D1, 1, WC)
        h = jnp.where(valid, h, 0.0).astype(cdt)         # single bf16 cast

        # H halo in-register (bf16); W halo is inside the banded weights;
        # D halo comes from the slab.
        zrow = jnp.zeros((D1, 1, WC), cdt)
        hpad = jnp.concatenate([zrow, h, zrow], axis=1)  # (D1, Hp, WC) bf16

        # ---- conv2 (+ W-pool): 3 matmuls into one accumulator, cols = [even | odd]
        acc2 = jnp.zeros((Dt * H, 2 * WoC), jnp.float32)
        for kd in range(3):
            lhs = jnp.concatenate(
                [hpad[kd:kd + Dt, kh:kh + H, :].reshape(Dt * H, WC) for kh in range(3)],
                axis=-1)                                 # (Dt*H, 3*WC) bf16
            acc2 = acc2 + jnp.dot(lhs, w2_ref[kd],
                                  preferred_element_type=jnp.float32)

        y = jnp.max(acc2.reshape(Dt, H, 2, WoC), axis=2)       # W pool (lane split max)
        y = jnp.max(y.reshape(Dt // 2, 2, H, WoC), axis=1)     # D pool
        y = jnp.max(y.reshape(Dt // 2, Ho, 2, WoC), axis=2)    # H pool

        # bias + ReLU commute with max-pool (same bias per pooled window, ReLU monotone)
        out = jnp.maximum(y + b2_ref[...], 0.0)
        o_ref[0, 0] = out.reshape(Dt // 2, Ho * WoC).astype(o_ref.dtype)  # lane-dense

    out = pl.pallas_call(
        kernel,
        out_shape=jax.ShapeDtypeStruct((N, nDt, Dt // 2, Ho * WoC), jnp.float32),
        grid_spec=pltpu.PrefetchScalarGridSpec(
            num_scalar_prefetch=0,
            grid=(N, nDt),
            in_specs=[
                pl.BlockSpec((1, 1, Dslab, Hp, WpC), lambda n, t: (n, t, 0, 0, 0)),
                pl.BlockSpec((3, 3 * WpC, WC), lambda n, t: (0, 0, 0)),
                pl.BlockSpec((3, 3 * WC, 2 * WoC), lambda n, t: (0, 0, 0)),
                pl.BlockSpec((1, WC), lambda n, t: (0, 0)),
                pl.BlockSpec((1, WoC), lambda n, t: (0, 0)),
            ],
            out_specs=pl.BlockSpec((1, 1, Dt // 2, Ho * WoC),
                                   lambda n, t: (n, t, 0, 0)),
        ),
        compiler_params=pltpu.CompilerParams(
            dimension_semantics=("parallel", "parallel"),
            vmem_limit_bytes=48 * 1024 * 1024),   # leaves headroom on v7x (64 MiB/TC)
    )(slabs, w1b, w2eo, b1t, b2t)

    out = out.reshape(N, Do, Ho, Wo, Cmid)                         # split lane folds
    return jnp.transpose(out, (0, 4, 1, 2, 3))                     # back to NCDHW


# ---------------- pure-JAX reference (PyTorch semantics) ----------------
def _conv3d_ref(x, w, b):
    # x: NCDHW, w: (kd,kh,kw,cin,cout), b: (cout,)
    w_oidhw = jnp.transpose(w, (4, 3, 0, 1, 2))
    y = lax.conv_general_dilated(x, w_oidhw, window_strides=(1, 1, 1),
                                 padding=((1, 1), (1, 1), (1, 1)),
                                 dimension_numbers=("NCDHW", "OIDHW", "NCDHW"),
                                 precision=lax.Precision.HIGHEST)
    return y + b.reshape(1, -1, 1, 1, 1)


def luna_block_ref(x, w1, b1, w2, b2, quantize_like_kernel=False):
    # quantize_like_kernel=True mirrors the kernel's bf16 rounding of matmul operands
    # (f32 accumulation) so the structural correctness check can be tight.
    if quantize_like_kernel:
        q = lambda a: a.astype(jnp.bfloat16).astype(jnp.float32)
    else:
        q = lambda a: a
    h = jnp.maximum(_conv3d_ref(q(x), q(w1), b1), 0.0)
    y = jnp.maximum(_conv3d_ref(q(h), q(w2), b2), 0.0)
    return lax.reduce_window(y, -jnp.inf, lax.max,
                             (1, 1, 2, 2, 2), (1, 1, 2, 2, 2), "VALID")


if __name__ == "__main__":
    N, Cin, Cmid = 2, 4, 8
    D = H = W = 8

    key = jax.random.PRNGKey(0)
    kx, kw1, kb1, kw2, kb2 = jax.random.split(key, 5)

    x = jax.random.normal(kx, (N, Cin, D, H, W), jnp.float32)

    fan1 = Cin * 27
    fan2 = Cmid * 27
    bnd1 = 1.0 / math.sqrt(fan1)
    bnd2 = 1.0 / math.sqrt(fan2)
    w1 = jax.random.uniform(kw1, (3, 3, 3, Cin, Cmid), jnp.float32, -bnd1, bnd1)
    b1 = jax.random.uniform(kb1, (Cmid,), jnp.float32, -bnd1, bnd1)
    w2 = jax.random.uniform(kw2, (3, 3, 3, Cmid, Cmid), jnp.float32, -bnd2, bnd2)
    b2 = jax.random.uniform(kb2, (Cmid,), jnp.float32, -bnd2, bnd2)

    out = jax.block_until_ready(luna_block_forward(x, w1, b1, w2, b2))
    assert out.shape == (N, Cmid, D // 2, H // 2, W // 2), out.shape

    # tight structural check against a reference with identical bf16 operand rounding
    ref_q = jax.block_until_ready(luna_block_ref(x, w1, b1, w2, b2,
                                                 quantize_like_kernel=True))
    np.testing.assert_allclose(np.asarray(out), np.asarray(ref_q),
                               rtol=2e-3, atol=2e-3)

    # loose check against the true f32 module semantics (bf16 MXU operands)
    ref = jax.block_until_ready(luna_block_ref(x, w1, b1, w2, b2))
    np.testing.assert_allclose(np.asarray(out), np.asarray(ref),
                               rtol=3e-2, atol=3e-2)

    print("KERNEL_OK")
</pallas_src>

<mosaic_0001>
module attributes {stable_mosaic.version = 11 : i64} {
  func.func @kernel(%arg0: i32, %arg1: i32, %arg2: memref<1x1x12x10x40xbf16, #tpu.memory_space<vmem>>, %arg3: memref<3x120x64xbf16, #tpu.memory_space<vmem>>, %arg4: memref<3x192x64xbf16, #tpu.memory_space<vmem>>, %arg5: memref<1x64xf32, #tpu.memory_space<vmem>>, %arg6: memref<1x32xf32, #tpu.memory_space<vmem>>, %arg7: memref<1x1x4x128xf32, #tpu.memory_space<vmem>>) attributes {dimension_semantics = [#tpu.dimension_semantics<parallel>, #tpu.dimension_semantics<parallel>], iteration_bounds = array<i64: 2, 1>, scalar_prefetch = 0 : i64, scratch_operands = 0 : i64, tpu.core_type = #tpu.core_type<tc>, window_params = [{transform_indices = @transform_0, window_bounds = array<i64: 1, 1, 12, 10, 40>}, {pipeline_mode = #tpu.pipeline_mode<synchronous>, transform_indices = @transform_1, window_bounds = array<i64: 3, 120, 64>}, {pipeline_mode = #tpu.pipeline_mode<synchronous>, transform_indices = @transform_2, window_bounds = array<i64: 3, 192, 64>}, {pipeline_mode = #tpu.pipeline_mode<synchronous>, transform_indices = @transform_3, window_bounds = array<i64: 1, 64>}, {pipeline_mode = #tpu.pipeline_mode<synchronous>, transform_indices = @transform_4, window_bounds = array<i64: 1, 32>}, {transform_indices = @transform_5, window_bounds = array<i64: 1, 1, 4, 128>}]} {
    %c0 = arith.constant 0 : index
    %c0_0 = arith.constant 0 : index
    %c0_1 = arith.constant 0 : index
    %c0_2 = arith.constant 0 : index
    %c0_3 = arith.constant 0 : index
    %0 = vector.load %arg2[%c0, %c0_0, %c0_1, %c0_2, %c0_3] : memref<1x1x12x10x40xbf16, #tpu.memory_space<vmem>>, vector<1x1x12x10x40xbf16>
    %1 = vector.shape_cast %0 : vector<1x1x12x10x40xbf16> to vector<12x10x40xbf16>
    %cst = arith.constant 0.000000e+00 : f32
    %2 = vector.broadcast %cst : f32 to vector<80x64xf32>
    %3 = vector.extract_strided_slice %1 {offsets = [0, 0, 0], sizes = [10, 8, 40], strides = [1, 1, 1]} : vector<12x10x40xbf16> to vector<10x8x40xbf16>
    %4 = vector.shape_cast %3 : vector<10x8x40xbf16> to vector<80x40xbf16>
    %5 = vector.extract_strided_slice %1 {offsets = [0, 1, 0], sizes = [10, 8, 40], strides = [1, 1, 1]} : vector<12x10x40xbf16> to vector<10x8x40xbf16>
    %6 = vector.shape_cast %5 : vector<10x8x40xbf16> to vector<80x40xbf16>
    %7 = vector.extract_strided_slice %1 {offsets = [0, 2, 0], sizes = [10, 8, 40], strides = [1, 1, 1]} : vector<12x10x40xbf16> to vector<10x8x40xbf16>
    %8 = vector.shape_cast %7 : vector<10x8x40xbf16> to vector<80x40xbf16>
    %9 = tpu.concatenate %4, %6, %8 in 1 : vector<80x40xbf16>, vector<80x40xbf16>, vector<80x40xbf16> -> vector<80x120xbf16>
    %c0_4 = arith.constant 0 : index
    %c0_5 = arith.constant 0 : index
    %c0_6 = arith.constant 0 : index
    %10 = vector.load %arg3[%c0_4, %c0_5, %c0_6] : memref<3x120x64xbf16, #tpu.memory_space<vmem>>, vector<1x120x64xbf16>
    %11 = vector.shape_cast %10 : vector<1x120x64xbf16> to vector<120x64xbf16>
    %cst_7 = arith.constant dense<0.000000e+00> : vector<80x64xf32>
    %12 = tpu.matmul %9, %11, %cst_7 {dimension_numbers = #tpu.dot_dimension_numbers<[1], [0], [0], [1], [0, 0, 1, 1], [], []>} : vector<80x120xbf16>, vector<120x64xbf16>, vector<80x64xf32> -> vector<80x64xf32>
    %13 = arith.addf %2, %12 : vector<80x64xf32>
    %14 = vector.extract_strided_slice %1 {offsets = [1, 0, 0], sizes = [10, 8, 40], strides = [1, 1, 1]} : vector<12x10x40xbf16> to vector<10x8x40xbf16>
    %15 = vector.shape_cast %14 : vector<10x8x40xbf16> to vector<80x40xbf16>
    %16 = vector.extract_strided_slice %1 {offsets = [1, 1, 0], sizes = [10, 8, 40], strides = [1, 1, 1]} : vector<12x10x40xbf16> to vector<10x8x40xbf16>
    %17 = vector.shape_cast %16 : vector<10x8x40xbf16> to vector<80x40xbf16>
    %18 = vector.extract_strided_slice %1 {offsets = [1, 2, 0], sizes = [10, 8, 40], strides = [1, 1, 1]} : vector<12x10x40xbf16> to vector<10x8x40xbf16>
    %19 = vector.shape_cast %18 : vector<10x8x40xbf16> to vector<80x40xbf16>
    %20 = tpu.concatenate %15, %17, %19 in 1 : vector<80x40xbf16>, vector<80x40xbf16>, vector<80x40xbf16> -> vector<80x120xbf16>
    %c1 = arith.constant 1 : index
    %c0_8 = arith.constant 0 : index
    %c0_9 = arith.constant 0 : index
    %21 = vector.load %arg3[%c1, %c0_8, %c0_9] : memref<3x120x64xbf16, #tpu.memory_space<vmem>>, vector<1x120x64xbf16>
    %22 = vector.shape_cast %21 : vector<1x120x64xbf16> to vector<120x64xbf16>
    %cst_10 = arith.constant dense<0.000000e+00> : vector<80x64xf32>
    %23 = tpu.matmul %20, %22, %cst_10 {dimension_numbers = #tpu.dot_dimension_numbers<[1], [0], [0], [1], [0, 0, 1, 1], [], []>} : vector<80x120xbf16>, vector<120x64xbf16>, vector<80x64xf32> -> vector<80x64xf32>
    %24 = arith.addf %13, %23 : vector<80x64xf32>
    %25 = vector.extract_strided_slice %1 {offsets = [2, 0, 0], sizes = [10, 8, 40], strides = [1, 1, 1]} : vector<12x10x40xbf16> to vector<10x8x40xbf16>
    %26 = vector.shape_cast %25 : vector<10x8x40xbf16> to vector<80x40xbf16>
    %27 = vector.extract_strided_slice %1 {offsets = [2, 1, 0], sizes = [10, 8, 40], strides = [1, 1, 1]} : vector<12x10x40xbf16> to vector<10x8x40xbf16>
    %28 = vector.shape_cast %27 : vector<10x8x40xbf16> to vector<80x40xbf16>
    %29 = vector.extract_strided_slice %1 {offsets = [2, 2, 0], sizes = [10, 8, 40], strides = [1, 1, 1]} : vector<12x10x40xbf16> to vector<10x8x40xbf16>
    %30 = vector.shape_cast %29 : vector<10x8x40xbf16> to vector<80x40xbf16>
    %31 = tpu.concatenate %26, %28, %30 in 1 : vector<80x40xbf16>, vector<80x40xbf16>, vector<80x40xbf16> -> vector<80x120xbf16>
    %c2 = arith.constant 2 : index
    %c0_11 = arith.constant 0 : index
    %c0_12 = arith.constant 0 : index
    %32 = vector.load %arg3[%c2, %c0_11, %c0_12] : memref<3x120x64xbf16, #tpu.memory_space<vmem>>, vector<1x120x64xbf16>
    %33 = vector.shape_cast %32 : vector<1x120x64xbf16> to vector<120x64xbf16>
    %cst_13 = arith.constant dense<0.000000e+00> : vector<80x64xf32>
    %34 = tpu.matmul %31, %33, %cst_13 {dimension_numbers = #tpu.dot_dimension_numbers<[1], [0], [0], [1], [0, 0, 1, 1], [], []>} : vector<80x120xbf16>, vector<120x64xbf16>, vector<80x64xf32> -> vector<80x64xf32>
    %35 = arith.addf %24, %34 : vector<80x64xf32>
    %36 = vector.shape_cast %35 : vector<80x64xf32> to vector<10x8x64xf32>
    %c0_14 = arith.constant 0 : index
    %c0_15 = arith.constant 0 : index
    %37 = vector.load %arg5[%c0_14, %c0_15] : memref<1x64xf32, #tpu.memory_space<vmem>>, vector<1x64xf32>
    %38 = vector.shape_cast %37 : vector<1x64xf32> to vector<1x1x64xf32>
    %39 = vector.broadcast %38 : vector<1x1x64xf32> to vector<10x8x64xf32>
    %40 = arith.addf %36, %39 : vector<10x8x64xf32>
    %cst_16 = arith.constant 0.000000e+00 : f32
    %41 = vector.broadcast %cst_16 : f32 to vector<10x8x64xf32>
    %42 = arith.maximumf %40, %41 : vector<10x8x64xf32>
    %43 = tpu.iota {dimensions = array<i32: 0>} : vector<10x64xi32>
    %c8_i32 = arith.constant 8 : i32
    %44 = arith.muli %arg1, %c8_i32 : i32
    %c1_i32 = arith.constant 1 : i32
    %45 = arith.subi %44, %c1_i32 : i32
    %46 = vector.broadcast %45 : i32 to vector<10x64xi32>
    %47 = arith.addi %43, %46 : vector<10x64xi32>
    %c0_i32 = arith.constant 0 : i32
    %48 = vector.broadcast %c0_i32 : i32 to vector<10x64xi32>
    %49 = arith.cmpi sge, %47, %48 : vector<10x64xi32>
    %c8_i32_17 = arith.constant 8 : i32
    %50 = vector.broadcast %c8_i32_17 : i32 to vector<10x64xi32>
    %51 = arith.cmpi slt, %47, %50 : vector<10x64xi32>
    %52 = arith.andi %49, %51 : vector<10x64xi1>
    %53 = vector.shape_cast %52 : vector<10x64xi1> to vector<10x1x64xi1>
    %cst_18 = arith.constant 0.000000e+00 : f32
    %54 = vector.shape_cast %53 : vector<10x1x64xi1> to vector<10x1x64xi1>
    %55 = vector.broadcast %54 : vector<10x1x64xi1> to vector<10x8x64xi1>
    %56 = vector.broadcast %cst_18 : f32 to vector<10x8x64xf32>
    %57 = arith.select %55, %42, %56 : vector<10x8x64xi1>, vector<10x8x64xf32>
    %58 = arith.truncf %57 : vector<10x8x64xf32> to vector<10x8x64xbf16>
    %cst_19 = arith.constant 0.000000e+00 : bf16
    %59 = vector.broadcast %cst_19 : bf16 to vector<10x1x64xbf16>
    %60 = tpu.concatenate %59, %58, %59 in 1 : vector<10x1x64xbf16>, vector<10x8x64xbf16>, vector<10x1x64xbf16> -> vector<10x10x64xbf16>
    %cst_20 = arith.constant 0.000000e+00 : f32
    %61 = vector.broadcast %cst_20 : f32 to vector<64x64xf32>
    %62 = vector.extract_strided_slice %60 {offsets = [0, 0, 0], sizes = [8, 8, 64], strides = [1, 1, 1]} : vector<10x10x64xbf16> to vector<8x8x64xbf16>
    %63 = vector.shape_cast %62 : vector<8x8x64xbf16> to vector<64x64xbf16>
    %64 = vector.extract_strided_slice %60 {offsets = [0, 1, 0], sizes = [8, 8, 64], strides = [1, 1, 1]} : vector<10x10x64xbf16> to vector<8x8x64xbf16>
    %65 = vector.shape_cast %64 : vector<8x8x64xbf16> to vector<64x64xbf16>
    %66 = vector.extract_strided_slice %60 {offsets = [0, 2, 0], sizes = [8, 8, 64], strides = [1, 1, 1]} : vector<10x10x64xbf16> to vector<8x8x64xbf16>
    %67 = vector.shape_cast %66 : vector<8x8x64xbf16> to vector<64x64xbf16>
    %68 = tpu.concatenate %63, %65, %67 in 1 : vector<64x64xbf16>, vector<64x64xbf16>, vector<64x64xbf16> -> vector<64x192xbf16>
    %c0_21 = arith.constant 0 : index
    %c0_22 = arith.constant 0 : index
    %c0_23 = arith.constant 0 : index
    %69 = vector.load %arg4[%c0_21, %c0_22, %c0_23] : memref<3x192x64xbf16, #tpu.memory_space<vmem>>, vector<1x192x64xbf16>
    %70 = vector.shape_cast %69 : vector<1x192x64xbf16> to vector<192x64xbf16>
    %cst_24 = arith.constant dense<0.000000e+00> : vector<64x64xf32>
    %71 = tpu.matmul %68, %70, %cst_24 {dimension_numbers = #tpu.dot_dimension_numbers<[1], [0], [0], [1], [0, 0, 1, 1], [], []>} : vector<64x192xbf16>, vector<192x64xbf16>, vector<64x64xf32> -> vector<64x64xf32>
    %72 = arith.addf %61, %71 : vector<64x64xf32>
    %73 = vector.extract_strided_slice %60 {offsets = [1, 0, 0], sizes = [8, 8, 64], strides = [1, 1, 1]} : vector<10x10x64xbf16> to vector<8x8x64xbf16>
    %74 = vector.shape_cast %73 : vector<8x8x64xbf16> to vector<64x64xbf16>
    %75 = vector.extract_strided_slice %60 {offsets = [1, 1, 0], sizes = [8, 8, 64], strides = [1, 1, 1]} : vector<10x10x64xbf16> to vector<8x8x64xbf16>
    %76 = vector.shape_cast %75 : vector<8x8x64xbf16> to vector<64x64xbf16>
    %77 = vector.extract_strided_slice %60 {offsets = [1, 2, 0], sizes = [8, 8, 64], strides = [1, 1, 1]} : vector<10x10x64xbf16> to vector<8x8x64xbf16>
    %78 = vector.shape_cast %77 : vector<8x8x64xbf16> to vector<64x64xbf16>
    %79 = tpu.concatenate %74, %76, %78 in 1 : vector<64x64xbf16>, vector<64x64xbf16>, vector<64x64xbf16> -> vector<64x192xbf16>
    %c1_25 = arith.constant 1 : index
    %c0_26 = arith.constant 0 : index
    %c0_27 = arith.constant 0 : index
    %80 = vector.load %arg4[%c1_25, %c0_26, %c0_27] : memref<3x192x64xbf16, #tpu.memory_space<vmem>>, vector<1x192x64xbf16>
    %81 = vector.shape_cast %80 : vector<1x192x64xbf16> to vector<192x64xbf16>
    %cst_28 = arith.constant dense<0.000000e+00> : vector<64x64xf32>
    %82 = tpu.matmul %79, %81, %cst_28 {dimension_numbers = #tpu.dot_dimension_numbers<[1], [0], [0], [1], [0, 0, 1, 1], [], []>} : vector<64x192xbf16>, vector<192x64xbf16>, vector<64x64xf32> -> vector<64x64xf32>
    %83 = arith.addf %72, %82 : vector<64x64xf32>
    %84 = vector.extract_strided_slice %60 {offsets = [2, 0, 0], sizes = [8, 8, 64], strides = [1, 1, 1]} : vector<10x10x64xbf16> to vector<8x8x64xbf16>
    %85 = vector.shape_cast %84 : vector<8x8x64xbf16> to vector<64x64xbf16>
    %86 = vector.extract_strided_slice %60 {offsets = [2, 1, 0], sizes = [8, 8, 64], strides = [1, 1, 1]} : vector<10x10x64xbf16> to vector<8x8x64xbf16>
    %87 = vector.shape_cast %86 : vector<8x8x64xbf16> to vector<64x64xbf16>
    %88 = vector.extract_strided_slice %60 {offsets = [2, 2, 0], sizes = [8, 8, 64], strides = [1, 1, 1]} : vector<10x10x64xbf16> to vector<8x8x64xbf16>
    %89 = vector.shape_cast %88 : vector<8x8x64xbf16> to vector<64x64xbf16>
    %90 = tpu.concatenate %85, %87, %89 in 1 : vector<64x64xbf16>, vector<64x64xbf16>, vector<64x64xbf16> -> vector<64x192xbf16>
    %c2_29 = arith.constant 2 : index
    %c0_30 = arith.constant 0 : index
    %c0_31 = arith.constant 0 : index
    %91 = vector.load %arg4[%c2_29, %c0_30, %c0_31] : memref<3x192x64xbf16, #tpu.memory_space<vmem>>, vector<1x192x64xbf16>
    %92 = vector.shape_cast %91 : vector<1x192x64xbf16> to vector<192x64xbf16>
    %cst_32 = arith.constant dense<0.000000e+00> : vector<64x64xf32>
    %93 = tpu.matmul %90, %92, %cst_32 {dimension_numbers = #tpu.dot_dimension_numbers<[1], [0], [0], [1], [0, 0, 1, 1], [], []>} : vector<64x192xbf16>, vector<192x64xbf16>, vector<64x64xf32> -> vector<64x64xf32>
    %94 = arith.addf %83, %93 : vector<64x64xf32>
    %95 = vector.shape_cast %94 : vector<64x64xf32> to vector<8x8x2x32xf32>
    %cst_33 = arith.constant dense<0xFF800000> : vector<8x8x32xf32>
    %96 = vector.multi_reduction <maximumf>, %95, %cst_33 [2] : vector<8x8x2x32xf32> to vector<8x8x32xf32>
    %97 = vector.shape_cast %96 : vector<8x8x32xf32> to vector<4x2x8x32xf32>
    %cst_34 = arith.constant dense<0xFF800000> : vector<4x8x32xf32>
    %98 = vector.multi_reduction <maximumf>, %97, %cst_34 [1] : vector<4x2x8x32xf32> to vector<4x8x32xf32>
    %99 = vector.shape_cast %98 : vector<4x8x32xf32> to vector<4x4x2x32xf32>
    %cst_35 = arith.constant dense<0xFF800000> : vector<4x4x32xf32>
    %100 = vector.multi_reduction <maximumf>, %99, %cst_35 [2] : vector<4x4x2x32xf32> to vector<4x4x32xf32>
    %c0_36 = arith.constant 0 : index
    %c0_37 = arith.constant 0 : index
    %101 = vector.load %arg6[%c0_36, %c0_37] : memref<1x32xf32, #tpu.memory_space<vmem>>, vector<1x32xf32>
    %102 = vector.shape_cast %101 : vector<1x32xf32> to vector<1x1x32xf32>
    %103 = vector.broadcast %102 : vector<1x1x32xf32> to vector<4x4x32xf32>
    %104 = arith.addf %100, %103 : vector<4x4x32xf32>
    %cst_38 = arith.constant 0.000000e+00 : f32
    %105 = vector.broadcast %cst_38 : f32 to vector<4x4x32xf32>
    %106 = arith.maximumf %104, %105 : vector<4x4x32xf32>
    %107 = vector.shape_cast %106 : vector<4x4x32xf32> to vector<4x128xf32>
    %c0_39 = arith.constant 0 : index
    %c0_40 = arith.constant 0 : index
    %c0_41 = arith.constant 0 : index
    %c0_42 = arith.constant 0 : index
    %108 = vector.load %arg7[%c0_39, %c0_40, %c0_41, %c0_42] : memref<1x1x4x128xf32, #tpu.memory_space<vmem>>, vector<1x1x4x128xf32>
    %109 = vector.shape_cast %108 : vector<1x1x4x128xf32> to vector<4x128xf32>
    %110 = vector.shape_cast %107 : vector<4x128xf32> to vector<1x1x4x128xf32>
    tpu.vector_store %arg7[%c0_39, %c0_40, %c0_41, %c0_42], %110 {strides = array<i32>} : memref<1x1x4x128xf32, #tpu.memory_space<vmem>>, vector<1x1x4x128xf32>,
    return
  }
  func.func @transform_0(%arg0: i32, %arg1: i32) -> (i32, i32, i32, i32, i32) {
    %c0_i32 = arith.constant 0 : i32
    %c0_i32_0 = arith.constant 0 : i32
    %c0_i32_1 = arith.constant 0 : i32
    %c0_i32_2 = arith.constant 0 : i32
    return %arg0, %arg1, %c0_i32, %c0_i32_0, %c0_i32_1 : i32, i32, i32, i32, i32
  }
  func.func @transform_1(%arg0: i32, %arg1: i32) -> (i32, i32, i32) {
    %c0_i32 = arith.constant 0 : i32
    %c0_i32_0 = arith.constant 0 : i32
    %c0_i32_1 = arith.constant 0 : i32
    %c0_i32_2 = arith.constant 0 : i32
    return %c0_i32, %c0_i32_0, %c0_i32_1 : i32, i32, i32
  }
  func.func @transform_2(%arg0: i32, %arg1: i32) -> (i32, i32, i32) {
    %c0_i32 = arith.constant 0 : i32
    %c0_i32_0 = arith.constant 0 : i32
    %c0_i32_1 = arith.constant 0 : i32
    %c0_i32_2 = arith.constant 0 : i32
    return %c0_i32, %c0_i32_0, %c0_i32_1 : i32, i32, i32
  }
  func.func @transform_3(%arg0: i32, %arg1: i32) -> (i32, i32) {
    %c0_i32 = arith.constant 0 : i32
    %c0_i32_0 = arith.constant 0 : i32
    %c0_i32_1 = arith.constant 0 : i32
    return %c0_i32, %c0_i32_0 : i32, i32
  }
  func.func @transform_4(%arg0: i32, %arg1: i32) -> (i32, i32) {
    %c0_i32 = arith.constant 0 : i32
    %c0_i32_0 = arith.constant 0 : i32
    %c0_i32_1 = arith.constant 0 : i32
    return %c0_i32, %c0_i32_0 : i32, i32
  }
  func.func @transform_5(%arg0: i32, %arg1: i32) -> (i32, i32, i32, i32) {
    %c0_i32 = arith.constant 0 : i32
    %c0_i32_0 = arith.constant 0 : i32
    %c0_i32_1 = arith.constant 0 : i32
    return %arg0, %arg1, %c0_i32, %c0_i32_0 : i32, i32, i32, i32
  }
}

</mosaic_0001>

<bundles_post_ra>
// kernel: tpu_custom_call.1
= control target key start
LH: loop header
LB: loop body
LE: loop exit
PB: predicated region body
PF: predicated region fallthrough
CT: control target
= control target key end

     0   :  { %10 = vsyncpa [#allocation3], 0  ;;  %s6228_s0 = inlined_call_operand.vmem [shape: bf16[2,1,12,10,40], index: 0, kind: input, shape index: {}]   ;;  %s6229_s1 = inlined_call_operand.vmem [shape: bf16[3,120,64], index: 1, kind: input, shape index: {}]   ;;  %s6230_s2 = inlined_call_operand.vmem [shape: bf16[3,192,64], index: 2, kind: input, shape index: {}]   ;;  %s6231_s3 = inlined_call_operand.vmem [shape: f32[1,64], index: 3, kind: input, shape index: {}]   ;;  %s6232_s4 = inlined_call_operand.vmem [shape: f32[1,32], index: 4, kind: input, shape index: {}]   ;;  %s6233_s5 = inlined_call_operand.hbm [shape: f32[2,1,4,128], index: 5, kind: output, shape index: {}]  }
   0x1   :  { %12 = vsyncpa [#allocation3 + $0x1], 0  ;;  %s4320_s18 = smov 0   ;;  %s4322_s19 = smov 0  }
   0x2   :  { %s4324_s20 = smov 0   ;;  %s4326_s21 = smov 0  }
   0x3   :  { %s4328_s22 = smov 0   ;;  %s4330_s23 = smov 0  }
   0x4 LB: > { %s3610_s24 = sadd.s32 4294967295, %s4277_s23   ;;  %s3611_s25 = sadd.s32 4294967294, %s4277_s23   ;;  %s4277_s23 = sphi %s4330_s23, %s18_s23   ;;  %s4273_s22 = sphi %s4328_s22, %s6289_s22   ;;  %s4269_s21 = sphi %s4326_s21, %s6288_s21   ;;  %s4265_s20 = sphi %s4324_s20, %s6287_s20   ;;  %s4261_s19 = sphi %s4322_s19, %s6286_s19   ;;  %s4257_s18 = sphi %s4320_s18, %s6285_s18  }
   0x5   : > { %s30_s26 = sadd.s32 1, %s4273_s22  ;;  %s151_s27 = sadd.s32 1, %s4265_s20 }
   0x6   : > { %p32_p0 = scmp.ge.s32.totalorder %s30_s26, 2  ;;  %p161_p1 = scmp.ne.s32.totalorder %s4265_s20, %s4261_s19 }
   0x7   : > { %p162_p2 = scmp.eq.s32.totalorder %s3610_s24, 1  ;;  %p167_p3 = scmp.ne.s32.totalorder %s4261_s19, %s4257_s18 }
   0x8   : > { %s6291_s26 = smov (%p32_p0, %s30_s26), 0  ;;  %p168_p5 = scmp.eq.s32.totalorder %s3611_s25, 1 }
   0x9   : > { %p4360_p4 = por %p162_p2, %p161_p1  ;;  %s146_s29 = ssub.s32 %s4273_s22, %s6291_s26 }
   0xa   : > { %p3614_p6 = scmp.ge.s32.totalorder %s4277_s23, 1  ;;  %p149_p7 = scmp.eq.s32.totalorder %s146_s29, 0 }
   0xb   : > { %p4367_p8 = por %p168_p5, %p167_p3  ;;  %p210_p9 = scmp.lt.s32.totalorder %s4277_s23, 3 }
   0xc   : > { %s4373_s6 = scalar_select %p149_p7, %s4265_s20, %s151_s27  }
   0xd   : > { %p211_p10 = pnand %p3614_p6, %p210_p9 }
   0xf   : > { %214 = sbr.rel (%p211_p10) target bundleno = 1299 (0x513), region = 40 }
  0x16   : > { %p242_p11 = scmp.lt.s32.totalorder %s4269_s21, 1  ;;  %v6234_v0 = vmov 0.0   ;;  %v4127_v1 = vld [vmem:[%s6229_s1 + $0x3c] sm:$0xff]   ;;  %v4128_v2 = vld [vmem:[%s6229_s1 + $0x44] sm:$0xff]   ;;  %vm276_vm0 = vsmask.f32 3328 }
  0x17   : > { %3929 = vmatprep.subr.bf16.mxu0 %v6234_v0  ;;  %3965 = vmatprep.subr.bf16.mxu1 %v6234_v0  ;;  %v4129_v3 = vld [vmem:[%s6229_s1 + $0x4c] sm:$0xff]   ;;  %vm277_vm1 = vsmask.f32 7440  ;;  %vm439_vm2 = vcmask 1042432   ;;  %vm440_vm3 = vcmask 1046532   ;;  %v4130_v21 = vld [vmem:[%s6229_s1 + $0x54] sm:$0xff]  }
  0x18   : > { %s243_s7 = scalar_select %p242_p11, %s4269_s21, 1  ;;  %3930 = vmatpush3.bf16.msra.mxu0 %v4127_v1  ;;  %vm4433_vm4 = vmor %vm276_vm0, %vm277_vm1  ;;  %v4132_v42 = vld [vmem:[%s6229_s1] sm:$0xff]   ;;  %v4134_v53 = vld [vmem:[%s6229_s1 + $0x8] sm:$0xff]   ;;  %vm744_vm6 = vcmask 1043456   ;;  %vm4282_vm7 = vmmov 0   ;;  %vm547_vm8 = vcmask 326656  }
  0x19   : > { %3931 = vmatprep.subr.bf16.mxu0 %v6234_v0  ;;  %v4131_v48 = vld [vmem:[%s6229_s1 + $0x5c] sm:$0xff]   ;;  %3966 = vmatpush3.bf16.msra.mxu1 %v4132_v42  ;;  %s4280_s11 = smov 40   ;;  %vm4491_vm5 = vmor %vm439_vm2, %vm440_vm3  ;;  %s4281_s29 = smov 80   ;;  %vm563_vm9 = vcmask 654336   ;;  %vm733_vm10 = vcmask 982016   ;;  %vm1349_vm13 = vcmask 1040384  }
  0x1a   : > { %s4061_s10 = smul.u32 96, %s243_s7  ;;  %3967 = vmatprep.subr.bf16.mxu1 %v6234_v0  ;;  %3945 = vmatprep.mubr.msk.bf16.mxu0 %vm4282_vm7, %v6234_v0  ;;  %vm1350_vm14 = vsmask.f32 256  ;;  %vm1362_vm0 = vcmask 1044480   ;;  %vm1363_vm1 = vsmask.f32 4352 }
  0x1b   : > { %3981 = vmatprep.mubr.msk.bf16.mxu1 %vm4282_vm7, %v6234_v0  ;;  %s4286_s27 = smov 96   ;;  %s239_s12 = sand.u32 1, %s4261_s19  }
  0x1c   : > { %s4389_s15 = scalar_lea.vmem %s6228_s0, %s4061_s10  ;;  %3932 = vmatpush3.bf16.msra.mxu0 %v4128_v2  ;;  %v4183_v2 = vld [vmem:[%s6230_s2 + $0xc8] sm:$0xff]   ;;  %s4288_s10 = smov 32  }
  0x1d   : > { %v4395_v4 = vld [vmem:[%s4389_s15 + $0x8] sm:$0xf]  ;;  %v4398_v5 = vld [vmem:[%s4389_s15 + $0xc] sm:$0x1]  ;;  %v4401_v6 = vld [vmem:[%s4389_s15 + $0x10] sm:$0xf]  ;;  %3933 = vmatprep.subr.bf16.mxu0 %v6234_v0  ;;  %3968 = vmatpush3.bf16.msra.mxu1 %v4134_v53 }
  0x1e   : > { %v4404_v7 = vld [vmem:[%s4389_s15 + $0x14] sm:$0x1]  ;;  %v294_v8 = vshrl.u32 %v4395_v4, 16  ;;  %v297_v9 = vshll.u32 %v4395_v4, 16  ;;  %v303_v10 = vshll.u32 %v4398_v5, 16  ;;  %v308_v11 = vshrl.u32 %v4401_v6, 16  ;;  %3969 = vmatprep.subr.bf16.mxu1 %v6234_v0 }
  0x1f   : > { %v311_v12 = vshll.u32 %v4401_v6, 16  ;;  %v317_v13 = vshll.u32 %v4404_v7, 16  ;;  %v4413_v14 = vld [vmem:[%s4389_s15] sm:$0xf]  ;;  %v3643_v15 = vcombine.low %v4395_v4, %v4401_v6  ;;  %v4419_v19 = vld [vmem:[%s4389_s15 + $0x18] sm:$0xf] }
  0x20   : > { %v296_v16 = vrot.slane %v294_v8, 4  ;;  %v299_v17 = vrot.slane %v297_v9, 5  ;;  %v310_v18 = vrot.slane %v308_v11, 4  ;;  %v305_v23 = vrot.slane %v303_v10, 5  ;;  %v4425_v24 = vld [vmem:[%s4389_s15 + $0x1c] sm:$0x1]  ;;  %3934 = vmatpush3.bf16.msra.mxu0 %v4129_v3 }
  0x21   : > { %v313_v20 = vrot.slane %v311_v12, 5  ;;  %v4428_v25 = vld [vmem:[%s4389_s15 + $0x20] sm:$0xf]  ;;  %v322_v26 = vshrl.u32 %v4419_v19, 16  ;;  %v319_v29 = vrot.slane %v317_v13, 5  ;;  %v280_v30 = vshrl.u32 %v4413_v14, 16  ;;  %3935 = vmatprep.subr.bf16.mxu0 %v6234_v0 }
  0x22   : > { %v300_v22 = vor.u32 %v299_v17, %v296_v16  ;;  %v4439_v31 = vld [vmem:[%s4389_s15 + $0x24] sm:$0x1]  ;;  %v3644_v32 = vcombine.low %v4419_v19, %v4428_v25  ;;  %v283_v35 = vshll.u32 %v4413_v14, 16  ;;  %v325_v37 = vshll.u32 %v4419_v19, 16  ;;  %v4450_v39 = vld [vmem:[%s4389_s15 + $0x28] sm:$0xf] }
  0x23   : > { %v314_v28 = vor.u32 %v313_v20, %v310_v18  ;;  %v4445_v34 = vld [vmem:[%s4389_s15 + $0x4] sm:$0x1]  ;;  %v324_v36 = vrot.slane %v322_v26, 4  ;;  %v331_v40 = vshll.u32 %v4425_v24, 16  ;;  %v336_v41 = vshrl.u32 %v4428_v25, 16  ;;  %s3615_s13 = sshll.u32 %s239_s12, 2 }
  0x24   : > { %v301_v33 = vrot.slane %v300_v22, 4  ;;  %v4462_v44 = vld [vmem:[%s4389_s15 + $0x2c] sm:$0x1]  ;;  %v327_v45 = vrot.slane %v325_v37, 5  ;;  %v339_v46 = vshll.u32 %v4428_v25, 16  ;;  %v345_v47 = vshll.u32 %v4439_v31, 16  ;;  %3936 = vmatpush3.bf16.msra.mxu0 %v4130_v21 }
  0x25   : > { %v315_v38 = vrot.slane %v314_v28, 4  ;;  %v4473_v50 = vrot.slane %v280_v30, 4  ;;  %v289_v51 = vshll.u32 %v4445_v34, 16  ;;  %v338_v52 = vrot.slane %v336_v41, 4  ;;  %3937 = vmatprep.subr.bf16.mxu0 %v6234_v0  ;;  %v4133_v8 = vld [vmem:[%s6229_s1 + $0x64] sm:$0xff]   ;;  %s3887_s14 = sshll.u32 %s4269_s21, 6 }
  0x26   : > { %v4459_v43 = vsel %vm4433_vm4, %v301_v33, %v305_v23  ;;  %v328_v55 = vor.u32 %v327_v45, %v324_v36  ;;  %v333_v56 = vrot.slane %v331_v40, 5  ;;  %v341_v57 = vrot.slane %v339_v46, 5  ;;  %v4503_v13 = vld [vmem:[%s4389_s15 + $0x30] sm:$0xf]  ;;  %v265_v21 = vld [vmem:[%s4389_s15 + $0x34] sm:$0x1] }
  0x27   : > { %v4471_v49 = vsel %vm4433_vm4, %v315_v38, %v319_v29  ;;  %v4483_v58 = vrot.slane %v283_v35, 5  ;;  %v350_v59 = vshrl.u32 %v4450_v39, 16  ;;  %v353_v60 = vshll.u32 %v4450_v39, 16  ;;  %v4140_v29 = vld [vmem:[%s6229_s1 + $0x18] sm:$0xff]   ;;  %s241_s16 = scalar_lea.vmem [#allocation2], %s3615_s13  ;;  %s3519_s21 = scalar_lea.sflag [#allocation3], %s239_s12 }
  0x28   : > { %v3648_v54 = vcombine.low %v4459_v43, %v4471_v49  ;;  %v359_v61 = vshll.u32 %v4462_v44, 16  ;;  %v329_v62 = vrot.slane %v328_v55, 4  ;;  %v342_v63 = vor.u32 %v341_v57, %v338_v52  ;;  %3938 = vmatpush3.bf16.msra.mxu0 %v4131_v48  ;;  %v4544_v42 = vld [vmem:[%s4389_s15 + $0x38] sm:$0xf]  ;;  %v4547_v45 = vld [vmem:[%s4389_s15 + $0x3c] sm:$0x1] }
  0x29   : > { %v347_v1 = vrot.slane %v345_v47, 5  ;;  %v3618_v3 = vrot.slane %v4395_v4, 9  ;;  %v4499_v9 = vrot.slane %v289_v51, 5  ;;  %v352_v10 = vrot.slane %v350_v59, 4  ;;  %3939 = vmatprep.subr.bf16.mxu0 %v6234_v0  ;;  %v4557_v51 = vld [vmem:[%s4389_s15 + $0x40] sm:$0xf] }
  0x2a   : > { %621 = vrot.lane.b32.xlu0 %v3648_v54, %s4280_s11  ;;  %v355_v11 = vrot.slane %v353_v60, 5  ;;  %v448_v12 = vrot.slane %v4398_v5, 5  ;;  %v4508_v16 = vsel %vm4433_vm4, %v329_v62, %v333_v56  ;;  %v343_v17 = vrot.slane %v342_v63, 4  ;;  %v4136_v5 = vld [vmem:[%s6229_s1 + $0x10] sm:$0xff]   ;;  %v4560_v52 = vld [vmem:[%s4389_s15 + $0x44] sm:$0x1] }
  0x2b   : > { %v3619_v18 = vrot.slane %v4401_v6, 9  ;;  %v452_v20 = vrot.slane %v4404_v7, 5  ;;  %v361_v23 = vrot.slane %v359_v61, 5  ;;  %v3620_v28 = vrot.slane %v4419_v19, 9  ;;  %v4135_v7 = vld [vmem:[%s6229_s1 + $0x6c] sm:$0xff]   ;;  %3970 = vmatpush3.bf16.msra.mxu1 %v4136_v5  ;;  %s3533_s17 = sshll.u32 %s241_s16, 4  ;;  %s6183_s17 = int_to_ptr.vmem [resolvable:$true] %s3533_s17 }
  0x2c   : > { %v356_v22 = vor.u32 %v355_v11, %v352_v10  ;;  %v4519_v26 = vsel %vm4491_vm5, %v3618_v3, %v448_v12  ;;  %v4530_v30 = vsel %vm4433_vm4, %v343_v17, %v347_v1  ;;  %v456_v35 = vrot.slane %v4425_v24, 5  ;;  %3940 = vmatpush3.bf16.msra.mxu0 %v4133_v8  ;;  %3971 = vmatprep.subr.bf16.mxu1 %v6234_v0  ;;  %s4199_s25 = scalar_lea.vmem %s6183_s17, 64 }
  0x2d   : > { %v4534_v33 = vsel %vm4491_vm5, %v3619_v18, %v452_v20  ;;  %v3621_v36 = vrot.slane %v4428_v25, 9  ;;  %v3649_v38 = vcombine.low %v4508_v16, %v4530_v30  ;;  %v460_v41 = vrot.slane %v4439_v31, 5  ;;  %3941 = vmatprep.subr.bf16.mxu0 %v6234_v0  ;;  %p4200_p12 = scmp.ne.s32.totalorder %s6183_s17, %s4199_s25 }
  0x2e   : > { %v357_v37 = vrot.slane %v356_v22, 4  ;;  %v3653_v40 = vcombine.low %v4519_v26, %v4534_v33  ;;  %v4552_v24 = vsel %vm4491_vm5, %v3620_v28, %v456_v35  ;;  %v364_v46 = vshrl.u32 %v4503_v13, 16  ;;  %v4145_v35 = vld [vmem:[%s6229_s1 + $0x28] sm:$0xff]  }
  0x2f   : > { %v367_v47 = vshll.u32 %v4503_v13, 16  ;;  %v373_v48 = vshll.u32 %v265_v21, 16  ;;  %v286_v31 = vor.u32 %v4483_v58, %v4473_v50  ;;  %623 = vrot.lane.b32.xlu1 %v3649_v38, %s4280_s11  ;;  %v4569_v53 = vsel %vm4491_vm5, %v3621_v36, %v460_v41  ;;  %3972 = vmatpush3.bf16.msra.mxu1 %v4140_v29  ;;  %v4607_v29 = vld [vmem:[%s4389_s15 + $0x50] sm:$0xf]  ;;  %p4201_p13 = pnand %p4200_p12, %p4360_p4 }
  0x30   : > { %637 = vrot.lane.b32.xlu0 %v3653_v40, %s4281_s29  ;;  %v3622_v54 = vrot.slane %v4450_v39, 9  ;;  %v464_v55 = vrot.slane %v4462_v44, 5  ;;  %v4575_v56 = vsel %vm4433_vm4, %v357_v37, %v361_v23  ;;  %v3654_v57 = vcombine.low %v4552_v24, %v4569_v53  ;;  %3942 = vmatpush3.bf16.msra.mxu0 %v4135_v7  ;;  %v4142_v44 = vld [vmem:[%s6229_s1 + $0x20] sm:$0xff]   ;;  %v271_v7 = vld [vmem:[%s4389_s15 + $0x4c] sm:$0x1] }
  0x31   : > { %v366_v59 = vrot.slane %v364_v46, 4  ;;  %v369_v60 = vrot.slane %v367_v47, 5  ;;  %v375_v61 = vrot.slane %v373_v48, 5  ;;  %v3623_v63 = vrot.slane %v4503_v13, 9  ;;  %3943 = vmatprep.subr.bf16.mxu0 %v6234_v0  ;;  %3973 = vmatprep.subr.bf16.mxu1 %v6234_v0  ;;  %p4202_p0 = pneg %p4201_p13 }
  0x32   : > { %v4581_v62 = vsel %vm4491_vm5, %v3622_v54, %v464_v55  ;;  %v468_v1 = vrot.slane %v265_v21, 5  ;;  %v378_v8 = vshrl.u32 %v4544_v42, 16  ;;  %v381_v10 = vshll.u32 %v4544_v42, 16  ;;  %v4601_v21 = vld [vmem:[%s4389_s15 + $0x48] sm:$0xf] }
  0x33   : > { %v370_v3 = vor.u32 %v369_v60, %v366_v59  ;;  %v387_v11 = vshll.u32 %v4547_v45, 16  ;;  %639 = vrot.lane.b32.xlu1 %v3654_v57, %s4281_s29  ;;  %v392_v17 = vshrl.u32 %v4557_v51, 16  ;;  %v395_v18 = vshll.u32 %v4557_v51, 16  ;;  %3974 = vmatpush3.bf16.msra.mxu1 %v4142_v44  ;;  %v273_v60 = vld [vmem:[%s4389_s15 + $0x54] sm:$0x1] }
  0x34   : > { %v4595_v12 = vsel %vm4491_vm5, %v3623_v63, %v468_v1  ;;  %v401_v20 = vshll.u32 %v4560_v52, 16  ;;  %v380_v23 = vrot.slane %v378_v8, 4  ;;  %v383_v28 = vrot.slane %v381_v10, 5  ;;  %3975 = vmatprep.subr.bf16.mxu1 %v6234_v0  ;;  %v4147_v10 = vld [vmem:[%s6229_s1 + $0x30] sm:$0xff]  }
  0x35   : > { %v371_v5 = vrot.slane %v370_v3, 4  ;;  %v3655_v22 = vcombine.low %v4581_v62, %v4595_v12  ;;  %v389_v36 = vrot.slane %v387_v11, 5  ;;  %v394_v37 = vrot.slane %v392_v17, 4 }
  0x36   : > { %v397_v38 = vrot.slane %v395_v18, 5  ;;  %v403_v40 = vrot.slane %v401_v20, 5  ;;  %v384_v46 = vor.u32 %v383_v28, %v380_v23  ;;  %v3624_v47 = vrot.slane %v4544_v42, 9 }
  0x37   : > { %v4614_v41 = vsel %vm4433_vm4, %v371_v5, %v375_v61  ;;  %v472_v48 = vrot.slane %v4547_v45, 5  ;;  %641 = vrot.lane.b32.xlu1 %v3655_v22, %s4281_s29  ;;  %v3625_v57 = vrot.slane %v4557_v51, 9  ;;  %v476_v59 = vrot.slane %v4560_v52, 5  ;;  %3976 = vmatpush3.bf16.msra.mxu1 %v4145_v35 }
  0x38   : > { %v3650_v54 = vcombine.low %v4575_v56, %v4614_v41  ;;  %v398_v55 = vor.u32 %v397_v38, %v394_v37  ;;  %v385_v61 = vrot.slane %v384_v46, 4  ;;  %v406_v45 = vshrl.u32 %v4601_v21, 16  ;;  %3977 = vmatprep.subr.bf16.mxu1 %v6234_v0 }
  0x39   : > { %v4627_v63 = vsel %vm4491_vm5, %v3624_v47, %v472_v48  ;;  %v409_v1 = vshll.u32 %v4601_v21, 16  ;;  %v4634_v3 = vsel %vm4491_vm5, %v3625_v57, %v476_v59  ;;  %v415_v8 = vshll.u32 %v271_v7, 16 }
  0x3a   : > { %625 = vrot.lane.b32.xlu0 %v3650_v54, %s4280_s11  ;;  %v399_v44 = vrot.slane %v398_v55, 4  ;;  %v590_v52 = vshrl.u32 %v4607_v29, 16  ;;  %v4642_v11 = vsel %vm4433_vm4, %v385_v61, %v389_v36  ;;  %v3656_v17 = vcombine.low %v4627_v63, %v4634_v3 }
  0x3b   : > { %v408_v18 = vrot.slane %v406_v45, 4  ;;  %v411_v20 = vrot.slane %v409_v1, 5  ;;  %v417_v22 = vrot.slane %v415_v8, 5  ;;  %v593_v28 = vshll.u32 %v4607_v29, 16  ;;  %3978 = vmatpush3.bf16.msra.mxu1 %v4147_v10  ;;  %v4681_v8 = vld [vmem:[%s4389_s15 + $0x58] sm:$0xf] }
  0x3c   : > { %v4649_v5 = vsel %vm4433_vm4, %v399_v44, %v403_v40  ;;  %v592_v23 = vrot.slane %v590_v52, 4  ;;  %643 = vrot.lane.b32.xlu1 %v3656_v17, %s4281_s29  ;;  %v599_v37 = vshll.u32 %v273_v60, 16  ;;  %v3626_v38 = vrot.slane %v4601_v21, 9  ;;  %3979 = vmatprep.subr.bf16.mxu1 %v6234_v0  ;;  %v4150_v17 = vld [vmem:[%s6229_s1 + $0x38] ss:$0 sps:$4 sm:$0xff]  }
  0x3d   : > { %v3651_v35 = vcombine.low %v4642_v11, %v4649_v5  ;;  %v412_v36 = vor.u32 %v411_v20, %v408_v18  ;;  %v595_v46 = vrot.slane %v593_v28, 5  ;;  %v480_v47 = vrot.slane %v271_v7, 5 }
  0x3e   : > { %v3642_v48 = vrot.slane %v4607_v29, 9  ;;  %v607_v54 = vrot.slane %v273_v60, 5  ;;  %v287_v40 = vrot.slane %v286_v31, 4  ;;  %v3617_v57 = vrot.slane %v4413_v14, 9 }
  0x3f   : > { %627 = vrot.lane.b32.xlu0 %v3651_v35, %s4280_s11  ;;  %v413_v55 = vrot.slane %v412_v36, 4  ;;  %v444_v59 = vrot.slane %v4445_v34, 5  ;;  %v596_v61 = vor.u32 %v595_v46, %v592_v23  ;;  %v601_v7 = vrot.slane %v599_v37, 5  ;;  %v4139_v34 = vld [vmem:[%s6229_s1 + $0x74] ss:$0 sps:$4 sm:$0xff]  }
  0x40   : > { %v481_v60 = vsel %vm4491_vm5, %v3626_v38, %v480_v47  ;;  %v4668_v45 = vsel %vm4491_vm5, %v3642_v48, %v607_v54  ;;  %v292_v52 = vsel %vm4433_vm4, %v287_v40, %v4499_v9  ;;  %v953_v20 = vshrl.u32 %v4681_v8, 16  ;;  %v275_v38 = vld [vmem:[%s4389_s15 + $0x5c] sm:$0x1]  ;;  %s6181_s15 = scalar_lea.hbm %s6233_s5, %s3887_s14 }
  0x41   : > { %v3657_v50 = vcombine.low %v481_v60, %v4668_v45  ;;  %v445_v58 = vsel %vm4491_vm5, %v3617_v57, %v444_v59  ;;  %v418_v31 = vsel %vm4433_vm4, %v413_v55, %v417_v22  ;;  %v597_v1 = vrot.slane %v596_v61, 4 }
  0x42   : > { %v3637_v44 = vcombine.low %v445_v58, %v4519_v26  ;;  %v746_v22 = vsel %vm744_vm6, %v4139_v34, 0  ;;  %v3632_v26 = vcombine.low %v292_v52, %v4459_v43  ;;  %v3638_v9 = vcombine.low %v4534_v33, %v4552_v24  ;;  %v4148_v52 = vld [vmem:[%s6229_s1 + $0x88] sm:$0xff]  }
  0x43   : > { %645 = vrot.lane.b32.xlu1 %v3657_v50, %s4281_s29  ;;  %v602_v10 = vsel %vm4433_vm4, %v597_v1, %v601_v7  ;;  %v956_v23 = vshll.u32 %v4681_v8, 16  ;;  %3944 = vmatpush3.bf16.msra.mxu0 %v746_v22  ;;  %v3645_v28 = vcombine.low %v4450_v39, %v4503_v13  ;;  %v3646_v43 = vcombine.low %v4544_v42, %v4557_v51  ;;  %v4144_v1 = vld [vmem:[%s6229_s1 + $0x80] sm:$0xff]  }
  0x44   : > { %v3652_v18 = vcombine.low %v418_v31, %v602_v10  ;;  %v3647_v35 = vcombine.low %v4601_v21, %v4607_v29  ;;  %v877_v36 = vsel %vm744_vm6, %v4150_v17, 0  ;;  %4001 = vmatprep.subr.bf16.mxu0 %v6234_v0  ;;  %v3627_v33 = vcombine.low %v4413_v14, %v4395_v4 }
  0x45   : > { %3980 = vmatpush3.bf16.msra.mxu1 %v877_v36  ;;  %v3628_v24 = vcombine.low %v4401_v6, %v4419_v19  ;;  %v3629_v37 = vcombine.low %v4428_v25, %v4450_v39  ;;  %v3633_v46 = vcombine.low %v4471_v49, %v4508_v16  ;;  %v3639_v47 = vcombine.low %v4569_v53, %v4581_v62 }
  0x46   : > { %629 = vrot.lane.b32.xlu0 %v3652_v18, %s4280_s11  ;;  %v955_v48 = vrot.slane %v953_v20, 4  ;;  %v958_v54 = vrot.slane %v956_v23, 5  ;;  %v3634_v40 = vcombine.low %v4530_v30, %v4575_v56  ;;  %v3640_v55 = vcombine.low %v4595_v12, %v4627_v63 }
  0x47   : > { %537 = vrot.lane.b32.xlu1 %v3637_v44, %s4281_s29  ;;  %v962_v16 = vshll.u32 %v275_v38, 16  ;;  %v3699_v57 = vrot.slane %v4681_v8, 9  ;;  %v970_v59 = vrot.slane %v275_v38, 5  ;;  %v3630_v53 = vcombine.low %v4503_v13, %v4544_v42 }
  0x48   : > { %v959_v49 = vor.u32 %v958_v54, %v955_v48  ;;  %v3635_v30 = vcombine.low %v4614_v41, %v4642_v11  ;;  %v3641_v56 = vcombine.low %v4634_v3, %v481_v60  ;;  %v3636_v63 = vcombine.low %v4649_v5, %v418_v31  ;;  %v4156_v48 = vld [vmem:[%s6229_s1 + $0xa8] sm:$0xff]   ;;  %v4158_v54 = vld [vmem:[%s6229_s1 + $0xb0] ss:$0 sps:$4 sm:$0xff]  }
  0x49   : > { %v964_v61 = vrot.slane %v962_v16, 5  ;;  %v971_v12 = vsel %vm4491_vm5, %v3699_v57, %v970_v59  ;;  %v3631_v11 = vcombine.low %v4557_v51, %v4601_v21  ;;  %v3700_v5 = vcombine.low %v4607_v29, %v4681_v8  ;;  %v4162_v51 = vld [vmem:[%s6230_s2] sm:$0xff]   ;;  %v4163_v21 = vld [vmem:[%s6230_s2 + $0x8] sm:$0xff]  }
  0x4a   : > { %512 = vrot.lane.b32.xlu0 %v3632_v26, %s4280_s11  ;;  %v960_v62 = vrot.slane %v959_v49, 4  ;;  %v3702_v7 = vcombine.low %v4668_v45, %v971_v12  ;;  %v4141_v45 = vld [vmem:[%s6229_s1 + $0x78] sm:$0xff]   ;;  %v1051_v16 = vsel %vm744_vm6, %v4158_v54, 0  ;;  %v4283_v29 = vmov 0   ;;  %v4168_v8 = vld [vmem:[%s6230_s2 + $0x60] sm:$0xff]  }
  0x4b   : > { %539 = vrot.lane.b32.xlu1 %v3638_v9, %s4281_s29  ;;  %v4153_v9 = vld [vmem:[%s6229_s1 + $0x98] sm:$0xff]   ;;  %1955 = vmatprep.subr.bf16.mxu1 %v4283_v29 }
  0x4c   : > { %v965_v41 = vsel %vm4433_vm4, %v960_v62, %v964_v61 }
  0x4d   : > { %v3701_v3 = vcombine.low %v602_v10, %v965_v41 }
  0x4e   : > { %514 = vrot.lane.b32.xlu0 %v3633_v46, %s4280_s11 }
  0x4f   : > { %541 = vrot.lane.b32.xlu1 %v3639_v47, %s4281_s29 }
  0x52   : > { %516 = vrot.lane.b32.xlu0 %v3634_v40, %s4280_s11 }
  0x53   : > { %543 = vrot.lane.b32.xlu1 %v3640_v55, %s4281_s29 }
  0x56   : > { %518 = vrot.lane.b32.xlu0 %v3635_v30, %s4280_s11 }
  0x57   : > { %545 = vrot.lane.b32.xlu1 %v3641_v56, %s4281_s29 }
  0x5a   : > { %520 = vrot.lane.b32.xlu0 %v3636_v63, %s4280_s11 }
  0x5b   : > { %980 = vrot.lane.b32.xlu1 %v3702_v7, %s4281_s29 }
  0x5e   : > { %976 = vrot.lane.b32.xlu0 %v3701_v3, %s4280_s11  ;;  %s4284_s11 = smov 64  }
  0x9c   : > { %v622_v60 = vpop.permute.xlu0 %621 }
  0x9d   : > { %v649_v50 = vsel %vm547_vm8, %v3643_v15, %v622_v60 }
  0xa1   : > { %v624_v58 = vpop.permute.xlu1 %623 }
  0xa2   : > { %v638_v34 = vpop.permute.xlu0 %637  ;;  %v652_v15 = vsel %vm547_vm8, %v3644_v32, %v624_v58  ;;  %v4152_v32 = vld [vmem:[%s6229_s1 + $0x90] sm:$0xff]  }
  0xa3   : > { %v663_v31 = vsel %vm563_vm9, %v649_v50, %v638_v34  ;;  %v4165_v50 = vld [vmem:[%s6230_s2 + $0x18] sm:$0xff]  }
  0xa4   : > { %3946 = vmatmul.mubr.msk.bf16.vlgmr.msra.gmra.mrb[0].mxu0 %vm733_vm10, %v663_v31  ;;  %v4174_v34 = vld [vmem:[%s6230_s2 + $0x78] sm:$0xff]   ;;  %v4166_v31 = vld [vmem:[%s6230_s2 + $0x20] sm:$0xff]  }
  0xa5   : > { %4002 = vmatpush3.bf16.msra.mxu0 %v4141_v45  ;;  %3949 = vmatprep.mubr.msk.bf16.mxu0 %vm4282_vm7, %v6234_v0  ;;  %v640_v44 = vpop.permute.xlu1 %639 }
  0xa6   : > { %4003 = vmatprep.subr.bf16.mxu0 %v6234_v0  ;;  %v665_v17 = vsel %vm563_vm9, %v652_v15, %v640_v44  ;;  %v4176_v44 = vld [vmem:[%s6230_s2 + $0x80] sm:$0xff]  }
  0xa9   : > { %4004 = vmatpush3.bf16.msra.mxu0 %v4144_v1  ;;  %v642_v10 = vpop.permute.xlu1 %641 }
  0xaa   : > { %4005 = vmatprep.subr.bf16.mxu0 %v6234_v0 }
  0xac   : > { %3950 = vmatmul.mubr.msk.bf16.gmra.mrb[4].mxu0 %vm733_vm10, %v665_v17  ;;  %v626_v18 = vpop.permute.xlu0 %625 }
  0xad   : > { %4006 = vmatpush3.bf16.msra.mxu0 %v4148_v52  ;;  %3953 = vmatprep.mubr.msk.bf16.mxu0 %vm4282_vm7, %v6234_v0  ;;  %v655_v20 = vsel %vm547_vm8, %v3645_v28, %v626_v18  ;;  %v4155_v28 = vld [vmem:[%s6229_s1 + $0xa0] sm:$0xff]   ;;  %v4178_v18 = vld [vmem:[%s6230_s2 + $0x88] sm:$0xff]  }
  0xae   : > { %4007 = vmatprep.subr.bf16.mxu0 %v6234_v0  ;;  %v644_v22 = vpop.permute.xlu1 %643  ;;  %v667_v26 = vsel %vm563_vm9, %v655_v20, %v642_v10  ;;  %v4167_v10 = vld [vmem:[%s6230_s2 + $0x28] sm:$0xff]  }
  0xb1   : > { %4008 = vmatpush3.bf16.msra.mxu0 %v4152_v32  ;;  %v628_v23 = vpop.permute.xlu0 %627  ;;  %v4169_v32 = vld [vmem:[%s6230_s2 + $0x30] sm:$0xff]  }
  0xb2   : > { %4009 = vmatprep.subr.bf16.mxu0 %v6234_v0  ;;  %v658_v36 = vsel %vm547_vm8, %v3646_v43, %v628_v23  ;;  %v4171_v23 = vld [vmem:[%s6230_s2 + $0x38] sm:$0xff]  }
  0xb3   : > { %v669_v46 = vsel %vm563_vm9, %v658_v36, %v644_v22  ;;  %v4180_v22 = vld [vmem:[%s6230_s2 + $0x90] sm:$0xff]   ;;  %v1163_v36 = vlaneseq }
  0xb4   : > { %3954 = vmatmul.mubr.msk.bf16.gmra.mrb[8].mxu0 %vm733_vm10, %v667_v26 }
  0xb5   : > { %4010 = vmatpush3.bf16.msra.mxu0 %v4153_v9  ;;  %3957 = vmatprep.mubr.msk.bf16.mxu0 %vm4282_vm7, %v6234_v0  ;;  %v646_v38 = vpop.permute.xlu1 %645  ;;  %v4954_v54 = vshrl.u32 %v1163_v36, 7 }
  0xb6   : > { %4011 = vmatprep.subr.bf16.mxu0 %v6234_v0 }
  0xb8   : > { %v630_v47 = vpop.permute.xlu0 %629 }
  0xb9   : > { %4012 = vmatpush3.bf16.msra.mxu0 %v4155_v28  ;;  %v538_v40 = vpop.permute.xlu1 %537  ;;  %v661_v55 = vsel %vm547_vm8, %v3647_v35, %v630_v47 }
  0xba   : > { %4013 = vmatprep.subr.bf16.mxu0 %v6234_v0  ;;  %v671_v30 = vsel %vm563_vm9, %v661_v55, %v646_v38  ;;  %v4173_v38 = vld [vmem:[%s6230_s2 + $0x40] sm:$0xff]  }
  0xbc   : > { %3958 = vmatmul.mubr.msk.bf16.gmra.mrb[12].mxu0 %vm733_vm10, %v669_v46  ;;  %v513_v43 = vpop.permute.xlu0 %512 }
  0xbd   : > { %4014 = vmatpush3.bf16.msra.mxu0 %v4156_v48  ;;  %3961 = vmatprep.mubr.msk.bf16.mxu0 %vm4282_vm7, %v6234_v0  ;;  %v550_v49 = vsel %vm547_vm8, %v3627_v33, %v513_v43  ;;  %v540_v59 = vpop.permute.xlu1 %539 }
  0xbe   : > { %4015 = vmatprep.subr.bf16.mxu0 %v6234_v0  ;;  %v565_v57 = vsel %vm563_vm9, %v550_v49, %v538_v40  ;;  %v4175_v40 = vld [vmem:[%s6230_s2 + $0x48] sm:$0xff]  }
  0xbf   : > { %3982 = vmatmul.mubr.msk.bf16.vlgmr.msra.gmra.mrb[0].mxu1 %vm733_vm10, %v565_v57 }
  0xc0   : > { %v515_v56 = vpop.permute.xlu0 %514  ;;  %3985 = vmatprep.mubr.msk.bf16.mxu1 %vm4282_vm7, %v6234_v0  ;;  %1956 = vmatpush1.bf16.msra.mxu1 %v4162_v51  ;;  %v1189_v51 = vsub.s32 2, %v4954_v54 }
  0xc1   : > { %4016 = vmatpush3.bf16.msra.mxu0 %v1051_v16  ;;  %v553_v4 = vsel %vm547_vm8, %v3628_v24, %v515_v56  ;;  %v542_v14 = vpop.permute.xlu1 %541  ;;  %1957 = vmatprep.subr.bf16.mxu1 %v4283_v29 }
  0xc2   : > { %v567_v35 = vsel %vm563_vm9, %v553_v4, %v540_v59  ;;  %1806 = vmatprep.subr.bf16.mxu0 %v4283_v29  ;;  %v1169_v59 = vadd.s32 4294967295, %v4954_v54 }
  0xc4   : > { %3962 = vmatmul.mubr.msk.bf16.gmra.mrb[16].mxu0 %vm733_vm10, %v671_v30  ;;  %v517_v33 = vpop.permute.xlu0 %516  ;;  %1958 = vmatpush1.bf16.msra.mxu1 %v4163_v21  ;;  %v4177_v30 = vld [vmem:[%s6230_s2 + $0x50] sm:$0xff]   ;;  %vm1171_vm11 = vcmp.ge.s32.totalorder %v1169_v59, 0 }
  0xc5   : > { %4017 = vmatprep.mubr.msk.bf16.mxu0 %vm4282_vm7, %v6234_v0  ;;  %v544_v62 = vpop.permute.xlu1 %543  ;;  %v556_v6 = vsel %vm547_vm8, %v3629_v37, %v517_v33  ;;  %1959 = vmatprep.subr.bf16.mxu1 %v4283_v29 }
  0xc6   : > { %v569_v24 = vsel %vm563_vm9, %v556_v6, %v542_v14 }
  0xc7   : > { %3986 = vmatmul.mubr.msk.bf16.gmra.mrb[4].mxu1 %vm733_vm10, %v567_v35 }
  0xc8   : > { %3989 = vmatprep.mubr.msk.bf16.mxu1 %vm4282_vm7, %v6234_v0  ;;  %v519_v61 = vpop.permute.xlu0 %518 }
  0xc9   : > { %v546_v19 = vpop.permute.xlu1 %545  ;;  %v559_v25 = vsel %vm547_vm8, %v3630_v53, %v519_v61  ;;  %v4170_v53 = vld [vmem:[%s6230_s2 + $0x68] sm:$0xff]  }
  0xca   : > { %v571_v41 = vsel %vm563_vm9, %v559_v25, %v544_v62  ;;  %v4179_v62 = vld [vmem:[%s6230_s2 + $0x58] sm:$0xff]   ;;  %v1185_v25 = vsub.s32 1, %v4954_v54 }
  0xcc   : > { %4018 = vmatmul.mubr.msk.bf16.vlgmr.msra.gmra.mrb[20].mxu0 %vm733_vm10, %v567_v35  ;;  %v521_v12 = vpop.permute.xlu0 %520 }
  0xcd   : > { %4021 = vmatprep.mubr.msk.bf16.mxu0 %vm4282_vm7, %v6234_v0  ;;  %v981_v63 = vpop.permute.xlu1 %980  ;;  %v562_v13 = vsel %vm547_vm8, %v3631_v11, %v521_v12  ;;  %1807 = vmatpush1.bf16.msra.mxu0 %v4168_v8  ;;  %v4164_v11 = vld [vmem:[%s6230_s2 + $0x10] sm:$0xff]  }
  0xce   : > { %v573_v42 = vsel %vm563_vm9, %v562_v13, %v546_v19  ;;  %1808 = vmatprep.subr.bf16.mxu0 %v4283_v29  ;;  %1960 = vmatpush1.bf16.msra.mxu1 %v4164_v11  ;;  %v1181_v19 = vsub.s32 0, %v4954_v54  ;;  %v4982_v13 = vld [vmem:[%s6231_s3] ss:$0 sm:$0xff] }
  0xcf   : > { %3990 = vmatmul.mubr.msk.bf16.gmra.mrb[8].mxu1 %vm733_vm10, %v569_v24  ;;  %1961 = vmatprep.subr.bf16.mxu1 %v4283_v29 }
  0xd0   : > { %3993 = vmatprep.mubr.msk.bf16.mxu1 %vm4282_vm7, %v6234_v0  ;;  %v977_v7 = vpop.permute.xlu0 %976 }
  0xd1   : > { %v984_v39 = vsel %vm547_vm8, %v3700_v5, %v977_v7  ;;  %1809 = vmatpush1.bf16.msra.mxu0 %v4170_v53  ;;  %v4172_v5 = vld [vmem:[%s6230_s2 + $0x70] sm:$0xff]   ;;  %v1193_v53 = vsub.s32 3, %v4954_v54  ;;  %vm5017_vm8 = vmand %vm1349_vm13, %vm1350_vm14 }
  0xd2   : > { %v986_v37 = vsel %vm563_vm9, %v984_v39, %v981_v63  ;;  %1810 = vmatprep.subr.bf16.mxu0 %v4283_v29  ;;  %1962 = vmatpush1.bf16.msra.mxu1 %v4165_v50  ;;  %v4975_v63 = vsel %vm1171_vm11, 1, %v4283_v29  ;;  %vm5029_vm9 = vmand %vm1362_vm0, %vm1363_vm1  ;;  %vm3437_vm0 = vcmask 1041409   ;;  %vm3440_vm1 = vcmask 1042434  }
  0xd3   : > { %1963 = vmatprep.subr.bf16.mxu1 %v4283_v29 }
  0xd4   : > { %4022 = vmatmul.mubr.msk.bf16.gmra.mrb[24].mxu0 %vm733_vm10, %v569_v24 }
  0xd5   : > { %4025 = vmatprep.mubr.msk.bf16.mxu0 %vm4282_vm7, %v6234_v0  ;;  %1811 = vmatpush1.bf16.msra.mxu0 %v4172_v5  ;;  %v1165_v5 = vadd.s32 8, %v4954_v54 }
  0xd6   : > { %1812 = vmatprep.subr.bf16.mxu0 %v4283_v29  ;;  %1964 = vmatpush1.bf16.msra.mxu1 %v4166_v31  ;;  %v1197_v31 = vsub.s32 4, %v4954_v54 }
  0xd7   : > { %3994 = vmatmul.mubr.msk.bf16.gmra.mrb[12].mxu1 %vm733_vm10, %v571_v41  ;;  %1965 = vmatprep.subr.bf16.mxu1 %v4283_v29 }
  0xd8   : > { %3997 = vmatprep.mubr.msk.bf16.mxu1 %vm4282_vm7, %v6234_v0 }
  0xd9   : > { %1813 = vmatpush1.bf16.msra.mxu0 %v4174_v34  ;;  %v1190_v34 = vrot.slane %v4975_v63, %v1189_v51 }
  0xda   : > { %1814 = vmatprep.subr.bf16.mxu0 %v4283_v29  ;;  %1966 = vmatpush1.bf16.msra.mxu1 %v4167_v10  ;;  %v1194_v10 = vrot.slane %v4975_v63, %v1193_v53 }
  0xdb   : > { %1967 = vmatprep.subr.bf16.mxu1 %v4283_v29  ;;  %vm1221_vm2 = vcmp.ne.s32.totalorder %v1190_v34, 0 }
  0xdc   : > { %4026 = vmatmul.mubr.msk.bf16.gmra.mrb[28].mxu0 %vm733_vm10, %v571_v41  ;;  %vm1222_vm3 = vcmp.ne.s32.totalorder %v1194_v10, 0 }
  0xdd   : > { %4029 = vmatprep.mubr.msk.bf16.mxu0 %vm4282_vm7, %v6234_v0  ;;  %1815 = vmatpush1.bf16.msra.mxu0 %v4176_v44 }
  0xde   : > { %1816 = vmatprep.subr.bf16.mxu0 %v4283_v29  ;;  %1968 = vmatpush1.bf16.msra.mxu1 %v4169_v32 }
  0xdf   : > { %3998 = vmatmul.mubr.msk.bf16.gmra.mrb[16].mxu1 %vm733_vm10, %v573_v42  ;;  %1969 = vmatprep.subr.bf16.mxu1 %v4283_v29 }
  0xe1   : > { %1817 = vmatpush1.bf16.msra.mxu0 %v4178_v18  ;;  %v1170_v18 = vadd.s32 4294967295, %v1165_v5 }
  0xe2   : > { %1818 = vmatprep.subr.bf16.mxu0 %v4283_v29  ;;  %1970 = vmatpush1.bf16.msra.mxu1 %v4171_v23 }
  0xe3   : > { %1971 = vmatprep.subr.bf16.mxu1 %v4283_v29  ;;  %vm1174_vm6 = vcmp.lt.s32.totalorder %v1170_v18, 8 }
  0xe4   : > { %4030 = vmatmul.mubr.msk.bf16.gmra.mrb[32].mxu0 %vm733_vm10, %v573_v42  ;;  %v1182_v42 = vrot.slane %v4975_v63, %v1181_v19 }
  0xe5   : > { %4033 = vmatprep.mubr.msk.bf16.mxu0 %vm4282_vm7, %v6234_v0  ;;  %1819 = vmatpush1.bf16.msra.mxu0 %v4180_v22 }
  0xe6   : > { %1820 = vmatprep.subr.bf16.mxu0 %v4283_v29  ;;  %1972 = vmatpush1.bf16.msra.mxu1 %v4173_v38  ;;  %vm1219_vm12 = vcmp.ne.s32.totalorder %v1182_v42, 0  ;;  %v5006_v38 = vrot.slane %v4975_v63, %v1197_v31 }
  0xe7   : > { %1973 = vmatprep.subr.bf16.mxu1 %v4283_v29 }
  0xe8   : > { %vm1223_vm7 = vcmp.ne.s32.totalorder %v5006_v38, 0 }
  0xea   : > { %1974 = vmatpush1.bf16.msra.mxu1 %v4175_v40 }
  0xeb   : > { %1975 = vmatprep.subr.bf16.mxu1 %v4283_v29 }
  0xec   : > { %4034 = vmatmul.mubr.msk.bf16.gmra.mrb[36].mxu0 %vm733_vm10, %v986_v37 }
  0xee   : > { %1976 = vmatpush1.bf16.msra.mxu1 %v4177_v30 }
  0xef   : > { %1977 = vmatprep.subr.bf16.mxu1 %v4283_v29 }
  0xf2   : > { %1978 = vmatpush1.bf16.msra.mxu1 %v4179_v62 }
  0xf3   : > { %2154 = vmatprep.subr.bf16.mxu1 %v4283_v29 }
 0x177   : > { %v782_v3 = vpop.f32.mrb[0].mxu0 }
 0x178   : > { %v3947_v60 = vpop.f32.mrb[1].mxu0 }
 0x179   : > { %v785_v45 = vpop.f32.mrb[2].mxu0 }
 0x17a   : > { %v3948_v58 = vpop.f32.mrb[3].mxu0 }
 0x17f   : > { %v790_v1 = vpop.f32.mrb[4].mxu0 }
 0x180   : > { %v3951_v15 = vpop.f32.mrb[5].mxu0 }
 0x181   : > { %v793_v52 = vpop.f32.mrb[6].mxu0 }
 0x182   : > { %v3952_v17 = vpop.f32.mrb[7].mxu0 }
 0x187   : > { %v4933_v20 = vpop.f32.mrb[8].mxu0 }
 0x188   : > { %v3955_v26 = vpop.f32.mrb[9].mxu0 }
 0x189   : > { %v4939_v9 = vpop.f32.mrb[10].mxu0 }
 0x18a   : > { %v3956_v28 = vpop.f32.mrb[11].mxu0 }
 0x18f   : > { %v4950_v46 = vpop.f32.mrb[12].mxu0 }
 0x190   : > { %v3959_v47 = vpop.f32.mrb[13].mxu0 }
 0x191   : > { %v4952_v48 = vpop.f32.mrb[14].mxu0 }
 0x192   : > { %v3960_v43 = vpop.f32.mrb[15].mxu0  ;;  %v913_v55 = vpop.f32.mrb[0].mxu1 }
 0x193   : > { %v914_v49 = vadd.f32 %v913_v55, %v782_v3  ;;  %v3983_v16 = vpop.f32.mrb[1].mxu1  ;;  %v1186_v3 = vrot.slane %v4975_v63, %v1185_v25 }
 0x194   : > { %v916_v57 = vpop.f32.mrb[2].mxu1  ;;  %v1205_v16 = vsub.s32 6, %v4954_v54 }
 0x195   : > { %v917_v56 = vadd.f32 %v916_v57, %v785_v45  ;;  %v3984_v4 = vpop.f32.mrb[3].mxu1  ;;  %vm1220_vm15 = vcmp.ne.s32.totalorder %v1186_v3, 0 }
 0x196   : > { %v1209_v4 = vsub.s32 7, %v4954_v54 }
 0x197   : > { %v4965_v14 = vpop.f32.mrb[16].mxu0 }
 0x198   : > { %v3963_v35 = vpop.f32.mrb[17].mxu0 }
 0x199   : > { %v4967_v33 = vpop.f32.mrb[18].mxu0 }
 0x19a   : > { %v3964_v61 = vpop.f32.mrb[19].mxu0  ;;  %v921_v6 = vpop.f32.mrb[4].mxu1 }
 0x19b   : > { %v922_v24 = vadd.f32 %v921_v6, %v790_v1  ;;  %v3987_v12 = vpop.f32.mrb[5].mxu1 }
 0x19c   : > { %v924_v7 = vpop.f32.mrb[6].mxu1 }
 0x19d   : > { %v925_v39 = vadd.f32 %v924_v7, %v793_v52  ;;  %v3988_v37 = vpop.f32.mrb[7].mxu1 }
 0x19f   : > { %v1087_v41 = vpop.f32.mrb[20].mxu0 }
 0x1a0   : > { %v1126_v21 = vadd.f32 %v1087_v41, %v914_v49  ;;  %v4019_v8 = vpop.f32.mrb[21].mxu0  ;;  %v1178_v41 = vsel %vm1174_vm6, 1, %v4283_v29 }
 0x1a1   : > { %v1090_v11 = vpop.f32.mrb[22].mxu0 }
 0x1a2   : > { %v1143_v60 = vadd.f32 %v4982_v13, %v1126_v21  ;;  %v1127_v45 = vadd.f32 %v1090_v11, %v917_v56  ;;  %v4020_v50 = vpop.f32.mrb[23].mxu0  ;;  %v929_v58 = vpop.f32.mrb[8].mxu1 }
 0x1a3   : > { %v4997_v1 = vadd.f32 %v929_v58, %v4933_v20  ;;  %v3991_v44 = vpop.f32.mrb[9].mxu1  ;;  %v1201_v20 = vsub.s32 5, %v4954_v54 }
 0x1a4   : > { %v1153_v15 = vmax.f32 %v1143_v60, 0.0  ;;  %v1144_v52 = vadd.f32 %v4982_v13, %v1127_v45  ;;  %v932_v17 = vpop.f32.mrb[10].mxu1  ;;  %v5042_v45 = vrot.slane %v4975_v63, %v1209_v4 }
 0x1a5   : > { %v5002_v32 = vadd.f32 %v932_v17, %v4939_v9  ;;  %v3992_v22 = vpop.f32.mrb[11].mxu1  ;;  %v5011_v56 = vrot.slane %v4975_v63, %v1201_v20  ;;  %v5058_v17 = vrot.slane %v1178_v41, %v1185_v25 }
 0x1a6   : > { %v1249_v26 = vsel %vm1219_vm12, %v1153_v15, 0.0  ;;  %v1154_v23 = vmax.f32 %v1144_v52, 0.0  ;;  %v5048_v15 = vrot.slane %v1178_v41, %v1181_v19  ;;  %vm1595_vm12 = vcmask 523264  }
 0x1a7   : > { %v1259_v28 = vpack.c.bf16 %v1249_v26, %v1249_v26  ;;  %v1095_v36 = vpop.f32.mrb[24].mxu0  ;;  %vm1224_vm10 = vcmp.ne.s32.totalorder %v5011_v56, 0  ;;  %vm1226_vm13 = vcmp.ne.s32.totalorder %v5042_v45, 0 }
 0x1a8   : > { %v1250_v47 = vsel %vm1220_vm15, %v1154_v23, 0.0  ;;  %v1128_v40 = vadd.f32 %v1095_v36, %v922_v24  ;;  %v4023_v43 = vpop.f32.mrb[25].mxu0  ;;  %vm1227_vm14 = vcmp.ne.s32.totalorder %v5048_v15, 0  ;;  %vm1228_vm15 = vcmp.ne.s32.totalorder %v5058_v17, 0  ;;  %v4188_v17 = vld [vmem:[%s6230_s2 + $0xb0] sm:$0xff]  }
 0x1a9   : > { %v1270_v55 = vshrl.u32 %v1259_v28, 16  ;;  %v1260_v9 = vpack.c.bf16 %v1250_v47, %v1250_v47  ;;  %v1098_v49 = vpop.f32.mrb[26].mxu0  ;;  %v1273_v62 = vshll.u32 %v1259_v28, 16 }
 0x1aa   : > { %v1145_v57 = vadd.f32 %v4982_v13, %v1128_v40  ;;  %v1129_v59 = vadd.f32 %v1098_v49, %v925_v39  ;;  %v4024_v30 = vpop.f32.mrb[27].mxu0  ;;  %v937_v61 = vpop.f32.mrb[12].mxu1 }
 0x1ab   : > { %v1272_v35 = vrot.slane %v1270_v55, 7  ;;  %v1277_v6 = vshrl.u32 %v1260_v9, 16  ;;  %v5022_v12 = vadd.f32 %v937_v61, %v4950_v46  ;;  %v3995_v7 = vpop.f32.mrb[13].mxu1  ;;  %v1280_v8 = vshll.u32 %v1260_v9, 16 }
 0x1ac   : > { %v1155_v39 = vmax.f32 %v1145_v57, 0.0  ;;  %v1146_v37 = vadd.f32 %v4982_v13, %v1129_v59  ;;  %v940_v53 = vpop.f32.mrb[14].mxu1  ;;  %v5034_v46 = vrot.slane %v4975_v63, %v1205_v16 }
 0x1ad   : > { %v1275_v42 = vor.u32 %v1273_v62, %v1272_v35  ;;  %v1279_v21 = vrot.slane %v1277_v6, 7  ;;  %v5037_v11 = vadd.f32 %v940_v53, %v4952_v48  ;;  %v3996_v3 = vpop.f32.mrb[15].mxu1 }
 0x1ae   : > { %v1251_v5 = vsel %vm1221_vm2, %v1155_v39, 0.0  ;;  %v1156_v60 = vmax.f32 %v1146_v37, 0.0  ;;  %vm1225_vm11 = vcmp.ne.s32.totalorder %v5034_v46, 0  ;;  %vm3443_vm2 = vcmask 1043459  }
 0x1af   : > { %v1352_v50 = vsel %vm5017_vm8, 0, %v1275_v42  ;;  %v1282_v58 = vor.u32 %v1280_v8, %v1279_v21  ;;  %v1261_v31 = vpack.c.bf16 %v1251_v5, %v1251_v5  ;;  %v1103_v44 = vpop.f32.mrb[28].mxu0 }
 0x1b0   : > { %v5052_v48 = vsel %vm5029_vm9, %v1352_v50, 0  ;;  %v1252_v34 = vsel %vm1222_vm3, %v1156_v60, 0.0  ;;  %v1130_v52 = vadd.f32 %v1103_v44, %v4997_v1  ;;  %v4027_v63 = vpop.f32.mrb[29].mxu0  ;;  %vm3515_vm3 = vcmask 785408  }
 0x1b1   : > { %v5062_v18 = vcombine.low %v5052_v48, %v5052_v48  ;;  %v5066_v19 = vcombine.high %v5052_v48, %v5052_v48  ;;  %v1353_v22 = vsel %vm5017_vm8, 0, %v1282_v58  ;;  %v1284_v10 = vshrl.u32 %v1261_v31, 16  ;;  %v1106_v26 = vpop.f32.mrb[30].mxu0 }
 0x1b2   : > { %v5072_v1 = vsel %vm5029_vm9, %v1353_v22, 0  ;;  %v1287_v23 = vshll.u32 %v1261_v31, 16  ;;  %v1262_v25 = vpack.c.bf16 %v1252_v34, %v1252_v34  ;;  %v1147_v20 = vadd.f32 %v4982_v13, %v1130_v52  ;;  %v4028_v28 = vpop.f32.mrb[31].mxu0  ;;  %v945_v40 = vpop.f32.mrb[16].mxu1 }
 0x1b3   : > { %v5077_v36 = vcombine.low %v5072_v1, %v5072_v1  ;;  %v1286_v47 = vrot.slane %v1284_v10, 7  ;;  %v1131_v43 = vadd.f32 %v1106_v26, %v5002_v32  ;;  %v5083_v55 = vcombine.high %v5072_v1, %v5072_v1  ;;  %v3999_v49 = vpop.f32.mrb[17].mxu1 }
 0x1b4   : > { %v946_v9 = vadd.f32 %v945_v40, %v4965_v14  ;;  %v1291_v16 = vshrl.u32 %v1262_v25, 16  ;;  %v1294_v57 = vshll.u32 %v1262_v25, 16  ;;  %v1157_v59 = vmax.f32 %v1147_v20, 0.0  ;;  %v948_v4 = vpop.f32.mrb[18].mxu1 }
 0x1b5   : > { %v1289_v30 = vor.u32 %v1287_v23, %v1286_v47  ;;  %v1148_v35 = vadd.f32 %v4982_v13, %v1131_v43  ;;  %v3748_v62 = vrot.slane %v5062_v18, 9  ;;  %v1529_v32 = vrot.slane %v5066_v19, 5  ;;  %v4000_v39 = vpop.f32.mrb[19].mxu1 }
 0x1b6   : > { %v1293_v61 = vrot.slane %v1291_v16, 7  ;;  %v5090_v6 = vadd.f32 %v948_v4, %v4967_v33  ;;  %v1253_v14 = vsel %vm1223_vm7, %v1157_v59, 0.0  ;;  %v3749_v7 = vrot.slane %v5077_v36, 9 }
 0x1b7   : > { %v1354_v37 = vsel %vm5017_vm8, 0, %v1289_v30  ;;  %v1263_v41 = vpack.c.bf16 %v1253_v14, %v1253_v14  ;;  %v1158_v42 = vmax.f32 %v1148_v35, 0.0  ;;  %v1111_v21 = vpop.f32.mrb[32].mxu0  ;;  %v1530_v8 = vsel %vm4491_vm5, %v3748_v62, %v1529_v32 }
 0x1b8   : > { %v5102_v33 = vsel %vm5029_vm9, %v1354_v37, 0  ;;  %v1296_v38 = vor.u32 %v1294_v57, %v1293_v61  ;;  %v1132_v53 = vadd.f32 %v1111_v21, %v5022_v12  ;;  %v4031_v3 = vpop.f32.mrb[33].mxu0  ;;  %v1533_v5 = vrot.slane %v5083_v55, 5 }
 0x1b9   : > { %v5108_v60 = vcombine.low %v5102_v33, %v5102_v33  ;;  %v1298_v50 = vshrl.u32 %v1263_v41, 16  ;;  %v1301_v58 = vshll.u32 %v1263_v41, 16  ;;  %v1254_v31 = vsel %vm1224_vm10, %v1158_v42, 0.0  ;;  %v1114_v44 = vpop.f32.mrb[34].mxu0 }
 0x1ba   : > { %v1355_v34 = vsel %vm5017_vm8, 0, %v1296_v38  ;;  %v1264_v52 = vpack.c.bf16 %v1254_v31, %v1254_v31  ;;  %v1149_v63 = vadd.f32 %v4982_v13, %v1132_v53  ;;  %v1133_v12 = vadd.f32 %v1114_v44, %v5037_v11  ;;  %v4032_v22 = vpop.f32.mrb[35].mxu0 }
 0x1bb   : > { %v5118_v10 = vsel %vm5029_vm9, %v1355_v34, 0  ;;  %v1300_v26 = vrot.slane %v1298_v50, 7  ;;  %v5122_v23 = vsel %vm4491_vm5, %v3749_v7, %v1533_v5  ;;  %v1416_v56 = vshrl.u32 %v5062_v18, 16 }
 0x1bc   : > { %v5128_v25 = vcombine.low %v5118_v10, %v5118_v10  ;;  %v1305_v20 = vshrl.u32 %v1264_v52, 16  ;;  %v1308_v11 = vshll.u32 %v1264_v52, 16  ;;  %v1159_v28 = vmax.f32 %v1149_v63, 0.0 }
 0x1bd   : > { %v1303_v47 = vor.u32 %v1301_v58, %v1300_v26  ;;  %v1150_v40 = vadd.f32 %v4982_v13, %v1133_v12  ;;  %v3764_v43 = vcombine.low %v1530_v8, %v5122_v23  ;;  %v1418_v49 = vrot.slane %v1416_v56, 4  ;;  %v4182_v56 = vld [vmem:[%s6230_s2 + $0x98] sm:$0xff]  }
 0x1be   : > { %v1307_v16 = vrot.slane %v1305_v20, 7  ;;  %v1255_v57 = vsel %vm1225_vm11, %v1159_v28, 0.0  ;;  %v1419_v59 = vshll.u32 %v5062_v18, 16  ;;  %v1425_v30 = vshll.u32 %v5066_v19, 16  ;;  %1821 = vmatpush1.bf16.msra.mxu0 %v4182_v56 }
 0x1bf   : > { %v1356_v4 = vsel %vm5017_vm8, 0, %v1303_v47  ;;  %v1265_v35 = vpack.c.bf16 %v1255_v57, %v1255_v57  ;;  %v1160_v62 = vmax.f32 %v1150_v40, 0.0  ;;  %3835 = vmatprep.mubr.msk.bf16.mxu1 %vm1595_vm12, %v3764_v43  ;;  %v1119_v32 = vpop.f32.mrb[36].mxu0  ;;  %v1430_v61 = vshrl.u32 %v5077_v36, 16  ;;  %1822 = vmatprep.subr.bf16.mxu0 %v4283_v29 }
 0x1c0   : > { %v5142_v14 = vsel %vm5029_vm9, %v1356_v4, 0  ;;  %v1310_v46 = vor.u32 %v1308_v11, %v1307_v16  ;;  %v1134_v7 = vadd.f32 %v1119_v32, %v946_v9  ;;  %v1421_v39 = vrot.slane %v1419_v59, 5  ;;  %v4035_v18 = vpop.f32.mrb[37].mxu0 }
 0x1c1   : > { %v5146_v19 = vcombine.low %v5142_v14, %v5142_v14  ;;  %v1312_v37 = vshrl.u32 %v1265_v35, 16  ;;  %v1315_v41 = vshll.u32 %v1265_v35, 16  ;;  %v1256_v42 = vsel %vm1226_vm13, %v1160_v62, 0.0  ;;  %v1122_v21 = vpop.f32.mrb[38].mxu0  ;;  %v4184_v62 = vld [vmem:[%s6230_s2 + $0xa0] sm:$0xff]  }
 0x1c2   : > { %v1357_v8 = vsel %vm5017_vm8, 0, %v1310_v46  ;;  %v1266_v38 = vpack.c.bf16 %v1256_v42, %v1256_v42  ;;  %v1151_v53 = vadd.f32 %v4982_v13, %v1134_v7  ;;  %v1422_v3 = vor.u32 %v1421_v39, %v1418_v49  ;;  %v4036_v9 = vpop.f32.mrb[39].mxu0  ;;  %1823 = vmatpush1.bf16.msra.mxu0 %v4184_v62 }
 0x1c3   : > { %v5155_v5 = vsel %vm5029_vm9, %v1357_v8, 0  ;;  %v1314_v50 = vrot.slane %v1312_v37, 7  ;;  %v1427_v58 = vrot.slane %v1425_v30, 5  ;;  %v1432_v31 = vrot.slane %v1430_v61, 4  ;;  %1824 = vmatprep.subr.bf16.mxu0 %v4283_v29 }
 0x1c4   : > { %v5159_v45 = vcombine.low %v5155_v5, %v5155_v5  ;;  %v1319_v44 = vshrl.u32 %v1266_v38, 16  ;;  %v1322_v34 = vshll.u32 %v1266_v38, 16  ;;  %v1161_v52 = vmax.f32 %v1151_v53, 0.0 }
 0x1c5   : > { %v1317_v63 = vor.u32 %v1315_v41, %v1314_v50  ;;  %v1423_v12 = vrot.slane %v1422_v3, 4  ;;  %v1433_v22 = vshll.u32 %v5077_v36, 16  ;;  %v1439_v26 = vshll.u32 %v5083_v55, 16 }
 0x1c6   : > { %v1321_v20 = vrot.slane %v1319_v44, 7  ;;  %v1257_v11 = vsel %vm1227_vm14, %v1161_v52, 0.0  ;;  %v3737_v28 = vcombine.high %v5102_v33, %v5102_v33  ;;  %v3750_v47 = vrot.slane %v5108_v60, 9 }
 0x1c7   : > { %v1358_v36 = vsel %vm5017_vm8, 0, %v1317_v63  ;;  %v1267_v40 = vpack.c.bf16 %v1257_v11, %v1257_v11  ;;  %v1428_v55 = vsel %vm4433_vm4, %v1423_v12, %v1427_v58  ;;  %v1435_v43 = vrot.slane %v1433_v22, 5 }
 0x1c8   : > { %v5178_v49 = vsel %vm5029_vm9, %v1358_v36, 0  ;;  %v1324_v15 = vor.u32 %v1322_v34, %v1321_v20  ;;  %v1441_v16 = vrot.slane %v1439_v26, 5  ;;  %v1537_v57 = vrot.slane %v3737_v28, 5 }
 0x1c9   : > { %v5183_v59 = vcombine.low %v5178_v49, %v5178_v49  ;;  %v1326_v30 = vshrl.u32 %v1267_v40, 16  ;;  %v1329_v4 = vshll.u32 %v1267_v40, 16  ;;  %v1436_v35 = vor.u32 %v1435_v43, %v1432_v31 }
 0x1ca   : > { %v1359_v32 = vsel %vm5017_vm8, 0, %v1324_v15  ;;  %v5192_v61 = vsel %vm4491_vm5, %v3750_v47, %v1537_v57  ;;  %v1135_v46 = vadd.f32 %v1122_v21, %v5090_v6  ;;  %v5197_v7 = vcombine.high %v5118_v10, %v5118_v10 }
 0x1cb   : > { %v5201_v39 = vsel %vm5029_vm9, %v1359_v32, 0  ;;  %v1328_v18 = vrot.slane %v1326_v30, 7  ;;  %v1437_v37 = vrot.slane %v1436_v35, 4  ;;  %v3779_v41 = vcombine.low %v5122_v23, %v5192_v61 }
 0x1cc   : > { %v5207_v42 = vcombine.low %v5201_v39, %v5201_v39  ;;  %v1152_v6 = vadd.f32 %v4982_v13, %v1135_v46  ;;  %v1444_v21 = vshrl.u32 %v5108_v60, 16  ;;  %v1447_v8 = vshll.u32 %v5108_v60, 16  ;;  %v4186_v60 = vld [vmem:[%s6230_s2 + $0xa8] sm:$0xff]  }
 0x1cd   : > { %v1331_v38 = vor.u32 %v1329_v4, %v1328_v18  ;;  %v5215_v53 = vsel %vm4433_vm4, %v1437_v37, %v1441_v16  ;;  %3819 = vmatprep.mubr.msk.bf16.mxu0 %vm1595_vm12, %v3779_v41  ;;  %v1453_v23 = vshll.u32 %v3737_v28, 16  ;;  %v1458_v3 = vshrl.u32 %v5128_v25, 16  ;;  %1825 = vmatpush1.bf16.msra.mxu0 %v4186_v60 }
 0x1ce   : > { %v3760_v9 = vcombine.low %v1428_v55, %v5215_v53  ;;  %v1162_v50 = vmax.f32 %v1152_v6, 0.0  ;;  %v1446_v13 = vrot.slane %v1444_v21, 4  ;;  %v1449_v58 = vrot.slane %v1447_v8, 5  ;;  %1826 = vmatprep.subr.bf16.mxu0 %v4283_v29 }
 0x1cf   : > { %v1360_v31 = vsel %vm5017_vm8, 0, %v1331_v38  ;;  %v1455_v44 = vrot.slane %v1453_v23, 5  ;;  %v1460_v34 = vrot.slane %v1458_v3, 4  ;;  %v1461_v52 = vshll.u32 %v5128_v25, 16  ;;  %v4190_v38 = vld [vmem:[%s6230_s2 + $0xb8] sm:$0xff]  }
 0x1d0   : > { %v5228_v63 = vsel %vm5029_vm9, %v1360_v31, 0  ;;  %1575 = vrot.lane.b32.xlu0 %v3760_v9, %s4284_s11  ;;  %v1258_v12 = vsel %vm1228_vm15, %v1162_v50, 0.0  ;;  %v1450_v22 = vor.u32 %v1449_v58, %v1446_v13  ;;  %v1467_v26 = vshll.u32 %v5197_v7, 16 }
 0x1d1   : > { %v5236_v56 = vcombine.low %v5228_v63, %v5228_v63  ;;  %v1268_v20 = vpack.c.bf16 %v1258_v12, %v1258_v12  ;;  %v1463_v11 = vrot.slane %v1461_v52, 5  ;;  %v5240_v28 = vcombine.high %v5142_v14, %v5142_v14  ;;  %1827 = vmatpush1.bf16.msra.mxu0 %v4188_v17 }
 0x1d2   : > { %v1451_v47 = vrot.slane %v1450_v22, 4  ;;  %v1469_v36 = vrot.slane %v1467_v26, 5  ;;  %v5248_v40 = vcombine.high %v5155_v5, %v5155_v5  ;;  %v1472_v55 = vshrl.u32 %v5146_v19, 16  ;;  %1828 = vmatprep.subr.bf16.mxu0 %v4283_v29 }
 0x1d3   : > { %v1333_v43 = vshrl.u32 %v1268_v20, 16  ;;  %v1336_v15 = vshll.u32 %v1268_v20, 16  ;;  %v1464_v16 = vor.u32 %v1463_v11, %v1460_v34  ;;  %v1475_v57 = vshll.u32 %v5146_v19, 16 }
 0x1d4   : > { %v5254_v30 = vsel %vm4433_vm4, %v1451_v47, %v1455_v44  ;;  %v1474_v4 = vrot.slane %v1472_v55, 4  ;;  %v1481_v35 = vshll.u32 %v5240_v28, 16  ;;  %v1486_v62 = vshrl.u32 %v5159_v45, 16 }
 0x1d5   : > { %v1335_v32 = vrot.slane %v1333_v43, 7  ;;  %v1465_v46 = vrot.slane %v1464_v16, 4  ;;  %v1477_v18 = vrot.slane %v1475_v57, 5  ;;  %v1489_v37 = vshll.u32 %v5159_v45, 16  ;;  %1829 = vmatpush1.bf16.msra.mxu0 %v4190_v38 }
 0x1d6   : > { %v1483_v41 = vrot.slane %v1481_v35, 5  ;;  %v1488_v6 = vrot.slane %v1486_v62, 4  ;;  %v1495_v21 = vshll.u32 %v5248_v40, 16  ;;  %v3775_v8 = vcombine.low %v5215_v53, %v5254_v30 }
 0x1d7   : > { %v1338_v23 = vor.u32 %v1336_v15, %v1335_v32  ;;  %v5268_v3 = vsel %vm4433_vm4, %v1465_v46, %v1469_v36  ;;  %v1478_v9 = vor.u32 %v1477_v18, %v1474_v4  ;;  %v1491_v50 = vrot.slane %v1489_v37, 5 }
 0x1d8   : > { %v3761_v13 = vcombine.low %v5254_v30, %v5268_v3  ;;  %v1497_v58 = vrot.slane %v1495_v21, 5  ;;  %v5274_v60 = vcombine.high %v5178_v49, %v5178_v49  ;;  %v1500_v53 = vshrl.u32 %v5183_v59, 16 }
 0x1d9   : > { %v1361_v31 = vsel %vm5017_vm8, 0, %v1338_v23  ;;  %v1479_v44 = vrot.slane %v1478_v9, 4  ;;  %v1492_v34 = vor.u32 %v1491_v50, %v1488_v6  ;;  %v1503_v52 = vshll.u32 %v5183_v59, 16 }
 0x1da   : > { %v5282_v12 = vsel %vm5029_vm9, %v1361_v31, 0  ;;  %1577 = vrot.lane.b32.xlu1 %v3761_v13, %s4284_s11  ;;  %v1502_v22 = vrot.slane %v1500_v53, 4  ;;  %v1509_v26 = vshll.u32 %v5274_v60, 16  ;;  %v5288_v20 = vcombine.high %v5201_v39, %v5201_v39 }
 0x1db   : > { %v5292_v24 = vcombine.low %v5282_v12, %v5282_v12  ;;  %v5296_v11 = vsel %vm4433_vm4, %v1479_v44, %v1483_v41  ;;  %v1493_v51 = vrot.slane %v1492_v34, 4  ;;  %v1505_v17 = vrot.slane %v1503_v52, 5 }
 0x1dc   : > { %v1511_v47 = vrot.slane %v1509_v26, 5  ;;  %v1514_v36 = vshrl.u32 %v5207_v42, 16  ;;  %v1517_v55 = vshll.u32 %v5207_v42, 16  ;;  %v1523_v43 = vshll.u32 %v5288_v20, 16 }
 0x1dd   : > { %v1498_v15 = vsel %vm4433_vm4, %v1493_v51, %v1497_v58  ;;  %v1506_v16 = vor.u32 %v1505_v17, %v1502_v22  ;;  %v3776_v57 = vcombine.low %v5268_v3, %v5296_v11  ;;  %v5307_v30 = vcombine.high %v5228_v63, %v5228_v63 }
 0x1de   : > { %v3762_v4 = vcombine.low %v5296_v11, %v1498_v15  ;;  %v1516_v35 = vrot.slane %v1514_v36, 4  ;;  %v1519_v62 = vrot.slane %v1517_v55, 5  ;;  %v1525_v32 = vrot.slane %v1523_v43, 5 }
 0x1df   : > { %v1507_v46 = vrot.slane %v1506_v16, 4  ;;  %v1642_v18 = vshrl.u32 %v5236_v56, 16  ;;  %v1645_v37 = vshll.u32 %v5236_v56, 16  ;;  %v1651_v41 = vshll.u32 %v5307_v30, 16 }
 0x1e0   : > { %1579 = vrot.lane.b32.xlu0 %v3762_v4, %s4284_s11  ;;  %v1520_v6 = vor.u32 %v1519_v62, %v1516_v35  ;;  %v5316_v21 = vcombine.high %v5282_v12, %v5282_v12  ;;  %v2026_v38 = vshrl.u32 %v5292_v24, 16  ;;  %v2029_v23 = vshll.u32 %v5292_v24, 16 }
 0x1e1   : > { %v1512_v3 = vsel %vm4433_vm4, %v1507_v46, %v1511_v47  ;;  %v1644_v9 = vrot.slane %v1642_v18, 4  ;;  %v1647_v50 = vrot.slane %v1645_v37, 5  ;;  %v1653_v13 = vrot.slane %v1651_v41, 5 }
 0x1e2   : > { %v3777_v58 = vcombine.low %v1498_v15, %v1512_v3  ;;  %v1521_v53 = vrot.slane %v1520_v6, 4  ;;  %v2028_v31 = vrot.slane %v2026_v38, 4  ;;  %v2031_v44 = vrot.slane %v2029_v23, 5 }
 0x1e3   : > { %v1648_v34 = vor.u32 %v1647_v50, %v1644_v9  ;;  %v2035_v52 = vshll.u32 %v5316_v21, 16  ;;  %v3756_v22 = vcombine.low %v5052_v48, %v5072_v1  ;;  %v3751_v26 = vrot.slane %v5128_v25, 9 }
 0x1e4   : > { %1668 = vrot.lane.b32.xlu0 %v3775_v8, %s4284_s11  ;;  %v1526_v11 = vsel %vm4433_vm4, %v1521_v53, %v1525_v32  ;;  %v2032_v51 = vor.u32 %v2031_v44, %v2028_v31  ;;  %v1541_v17 = vrot.slane %v5197_v7, 5  ;;  %v3757_v47 = vcombine.low %v5102_v33, %v5118_v10  ;;  %v4185_v53 = vld [vmem:[%s6230_s2 + $0xd0] sm:$0xff]  }
 0x1e5   : > { %v3763_v36 = vcombine.low %v1512_v3, %v1526_v11  ;;  %v1649_v55 = vrot.slane %v1648_v34, 4  ;;  %v2037_v43 = vrot.slane %v2035_v52, 5  ;;  %v3752_v15 = vrot.slane %v5146_v19, 9  ;;  %v4187_v34 = vld [vmem:[%s6230_s2 + $0xd8] sm:$0xff]   ;;  %v4189_v52 = vld [vmem:[%s6230_s2 + $0xe0] sm:$0xff]  }
 0x1e6   : > { %v2033_v16 = vrot.slane %v2032_v51, 4  ;;  %v5335_v48 = vsel %vm4491_vm5, %v3751_v26, %v1541_v17  ;;  %v1545_v25 = vrot.slane %v5240_v28, 5  ;;  %v3753_v8 = vrot.slane %v5159_v45, 9 }
 0x1e7   : > { %1581 = vrot.lane.b32.xlu1 %v3763_v36, %s4284_s11  ;;  %v1654_v7 = vsel %vm4433_vm4, %v1649_v55, %v1653_v13  ;;  %v5344_v4 = vcombine.low %v5192_v61, %v5335_v48  ;;  %v1549_v19 = vrot.slane %v5248_v40, 5  ;;  %v3758_v35 = vcombine.low %v5142_v14, %v5155_v5  ;;  %v4192_v36 = vld [vmem:[%s6230_s2 + $0xf0] sm:$0xff]  }
 0x1e8   : > { %1672 = vrot.lane.b32.xlu0 %v3777_v58, %s4284_s11  ;;  %v3778_v62 = vcombine.low %v1526_v11, %v1654_v7  ;;  %v2038_v45 = vsel %vm4433_vm4, %v2033_v16, %v2037_v43  ;;  %v5354_v28 = vsel %vm4491_vm5, %v3752_v15, %v1545_v25  ;;  %v3754_v32 = vrot.slane %v5183_v59, 9  ;;  %v4191_v11 = vld [vmem:[%s6230_s2 + $0xe8] sm:$0xff]   ;;  %v4193_v15 = vld [vmem:[%s6230_s2 + $0xf8] sm:$0xff]  }
 0x1e9   : > { %v3843_v46 = vcombine.low %v1654_v7, %v2038_v45  ;;  %v5359_v61 = vsel %vm4491_vm5, %v3753_v8, %v1549_v19  ;;  %v1553_v40 = vrot.slane %v5274_v60, 5  ;;  %v3755_v18 = vrot.slane %v5207_v42, 9  ;;  %v4195_v8 = vld [vmem:[%s6230_s2 + $0x108] sm:$0xff]  }
 0x1ea   : > { %v5365_v37 = vcombine.low %v5354_v28, %v5359_v61  ;;  %v1557_v27 = vrot.slane %v5288_v20, 5  ;;  %v3771_v41 = vcombine.low %v5072_v1, %v5102_v33  ;;  %v3780_v59 = vcombine.low %v5335_v48, %v5354_v28  ;;  %v4194_v48 = vld [vmem:[%s6230_s2 + $0x100] sm:$0xff]  }
 0x1eb   : > { %1670 = vrot.lane.b32.xlu1 %v3776_v57, %s4284_s11  ;;  %v5375_v6 = vsel %vm4491_vm5, %v3754_v32, %v1553_v40  ;;  %v3759_v42 = vcombine.low %v5178_v49, %v5201_v39  ;;  %v3772_v60 = vcombine.low %v5118_v10, %v5142_v14  ;;  %v3773_v20 = vcombine.low %v5155_v5, %v5178_v49 }
 0x1ec   : > { %2046 = vrot.lane.b32.xlu0 %v3843_v46, %s4284_s11  ;;  %v5386_v1 = vsel %vm4491_vm5, %v3755_v18, %v1557_v27  ;;  %v3781_v33 = vcombine.low %v5359_v61, %v5375_v6  ;;  %v3770_v57 = vrot.slane %v5236_v56, 9  ;;  %v1657_v38 = vrot.slane %v5307_v30, 5 }
 0x1ed   : > { %v5394_v23 = vcombine.low %v5375_v6, %v5386_v1  ;;  %v3774_v10 = vcombine.low %v5201_v39, %v5228_v63  ;;  %v3841_v14 = vrot.slane %v5292_v24, 9  ;;  %v2041_v3 = vrot.slane %v5316_v21, 5  ;;  %v4181_v21 = vld [vmem:[%s6230_s2 + $0xc0] sm:$0xff]  }
 0x1ee   : > { %v5402_v9 = vsel %vm4491_vm5, %v3770_v57, %v1657_v38  ;;  %v3842_v56 = vcombine.low %v5228_v63, %v5282_v12  ;;  %vm2787_vm4 = vcmask 254976  }
 0x1ef   : > { %1674 = vrot.lane.b32.xlu1 %v3778_v62, %s4284_s11  ;;  %v3782_v30 = vcombine.low %v5386_v1, %v5402_v9  ;;  %v5411_v50 = vsel %vm4491_vm5, %v3841_v14, %v2041_v3  ;;  %vm3236_vm5 = vcmask 261120  }
 0x1f0   : > { %v3844_v24 = vcombine.low %v5402_v9, %v5411_v50 }
 0x242   : > { %v1576_v13 = vpop.permute.xlu0 %1575 }
 0x243   : > { %v1598_v58 = vsel %vm1595_vm12, %v3756_v22, %v1576_v13 }
 0x244   : > { %1988 = vmatmul.mubr.bf16.vlgmr.msra.gmra.mrb[20].mxu1 %v1598_v58 }
 0x245   : > { %2155 = vmatpush1.bf16.msra.mxu1 %v4181_v21  ;;  %3836 = vmatprep.mubr.msk.bf16.mxu1 %vm1595_vm12, %v5344_v4 }
 0x246   : > { %2156 = vmatprep.subr.bf16.mxu1 %v4283_v29 }
 0x249   : > { %2157 = vmatpush1.bf16.msra.mxu1 %v4183_v2 }
 0x24a   : > { %2158 = vmatprep.subr.bf16.mxu1 %v4283_v29 }
 0x24c   : > { %v1578_v31 = vpop.permute.xlu1 %1577 }
 0x24d   : > { %v1602_v44 = vsel %vm1595_vm12, %v3757_v47, %v1578_v31  ;;  %2159 = vmatpush1.bf16.msra.mxu1 %v4185_v53 }
 0x24e   : > { %1996 = vmatmul.mubr.bf16.gmra.mrb[24].mxu1 %v1602_v44  ;;  %2160 = vmatprep.subr.bf16.mxu1 %v4283_v29 }
 0x24f   : > { %3837 = vmatprep.mubr.msk.bf16.mxu1 %vm1595_vm12, %v5365_v37 }
 0x251   : > { %2161 = vmatpush1.bf16.msra.mxu1 %v4187_v34 }
 0x252   : > { %v1580_v22 = vpop.permute.xlu0 %1579  ;;  %2162 = vmatprep.subr.bf16.mxu1 %v4283_v29 }
 0x253   : > { %v1606_v26 = vsel %vm1595_vm12, %v3758_v35, %v1580_v22  ;;  %v4197_v35 = vld [vmem:[%s6230_s2 + $0x118] sm:$0xff]  }
 0x255   : > { %2163 = vmatpush1.bf16.msra.mxu1 %v4189_v52 }
 0x256   : > { %2004 = vmatmul.mubr.bf16.gmra.mrb[28].mxu1 %v1606_v26  ;;  %v1669_v51 = vpop.permute.xlu0 %1668  ;;  %2164 = vmatprep.subr.bf16.mxu1 %v4283_v29 }
 0x257   : > { %3838 = vmatprep.mubr.msk.bf16.mxu1 %vm1595_vm12, %v5394_v23  ;;  %v1683_v17 = vsel %vm1595_vm12, %v3771_v41, %v1669_v51  ;;  %v4285_v41 = vmov 1983009808  }
 0x258   : > { %1839 = vmatmul.mubr.bf16.vlgmr.msra.gmra.mrb[40].mxu0 %v1683_v17 }
 0x259   : > { %2165 = vmatpush1.bf16.msra.mxu1 %v4191_v11  ;;  %3820 = vmatprep.mubr.msk.bf16.mxu0 %vm1595_vm12, %v3780_v59  ;;  %v1582_v47 = vpop.permute.xlu1 %1581  ;;  %v2261_v59 = vunpack.c.l.s4 %v4285_v41 }
 0x25a   : > { %2166 = vmatprep.subr.bf16.mxu1 %v4283_v29  ;;  %v1610_v55 = vsel %vm1595_vm12, %v3759_v42, %v1582_v47  ;;  %v1673_v25 = vpop.permute.xlu0 %1672 }
 0x25b   : > { %v1691_v7 = vsel %vm1595_vm12, %v3773_v20, %v1673_v25  ;;  %v2262_v42 = vunpack.c.0.s8 %v2261_v59 }
 0x25d   : > { %2167 = vmatpush1.bf16.msra.mxu1 %v4192_v36  ;;  %v1671_v43 = vpop.permute.xlu1 %1670  ;;  %v5500_v20 = vsub.s32 %v2262_v42, %v4954_v54 }
 0x25e   : > { %2012 = vmatmul.mubr.bf16.gmra.mrb[32].mxu1 %v1610_v55  ;;  %2168 = vmatprep.subr.bf16.mxu1 %v4283_v29  ;;  %v1687_v16 = vsel %vm1595_vm12, %v3772_v60, %v1671_v43 }
 0x25f   : > { %3881 = vmatprep.mubr.msk.bf16.mxu1 %vm1595_vm12, %v5344_v4  ;;  %v4196_v4 = vld [vmem:[%s6230_s2 + $0x110] sm:$0xff]  }
 0x260   : > { %1847 = vmatmul.mubr.bf16.gmra.mrb[44].mxu0 %v1687_v16 }
 0x261   : > { %2169 = vmatpush1.bf16.msra.mxu1 %v4193_v15  ;;  %3821 = vmatprep.mubr.msk.bf16.mxu0 %vm1595_vm12, %v3781_v33  ;;  %v1675_v19 = vpop.permute.xlu1 %1674 }
 0x262   : > { %2170 = vmatprep.subr.bf16.mxu1 %v4283_v29  ;;  %v1695_v5 = vsel %vm1595_vm12, %v3774_v10, %v1675_v19 }
 0x265   : > { %2171 = vmatpush1.bf16.msra.mxu1 %v4194_v48 }
 0x266   : > { %2172 = vmatprep.subr.bf16.mxu1 %v4283_v29 }
 0x268   : > { %1855 = vmatmul.mubr.bf16.gmra.mrb[48].mxu0 %v1691_v7 }
 0x269   : > { %2173 = vmatpush1.bf16.msra.mxu1 %v4195_v8  ;;  %3822 = vmatprep.mubr.msk.bf16.mxu0 %vm1595_vm12, %v3782_v30 }
 0x26a   : > { %2174 = vmatprep.subr.bf16.mxu1 %v4283_v29 }
 0x26d   : > { %2175 = vmatpush1.bf16.msra.mxu1 %v4196_v4 }
 0x26e   : > { %2176 = vmatprep.subr.bf16.mxu1 %v4283_v29  ;;  %v2047_v29 = vpop.permute.xlu0 %2046 }
 0x26f   : > { %v2052_v49 = vsel %vm1595_vm12, %v3842_v56, %v2047_v29 }
 0x270   : > { %1863 = vmatmul.mubr.bf16.gmra.mrb[52].mxu0 %v1695_v5 }
 0x271   : > { %2177 = vmatpush1.bf16.msra.mxu1 %v4197_v35 }
 0x274   : > { %2187 = vmatmul.mubr.bf16.vlgmr.msra.gmra.mrb[20].mxu1 %v1602_v44 }
 0x275   : > { %3882 = vmatprep.mubr.msk.bf16.mxu1 %vm1595_vm12, %v5365_v37 }
 0x27c   : > { %2195 = vmatmul.mubr.bf16.gmra.mrb[24].mxu1 %v1606_v26 }
 0x27d   : > { %3883 = vmatprep.mubr.msk.bf16.mxu1 %vm1595_vm12, %v5394_v23 }
 0x284   : > { %2203 = vmatmul.mubr.bf16.gmra.mrb[28].mxu1 %v1610_v55 }
 0x285   : > { %3884 = vmatprep.mubr.msk.bf16.mxu1 %vm1595_vm12, %v3844_v24 }
 0x28c   : > { %2211 = vmatmul.mubr.bf16.gmra.mrb[32].mxu1 %v2052_v49 }
 0x32b   : > { %v1840_v39 = vpop.f32.mrb[40].mxu0 }
 0x32c   : > { %v1842_v62 = vpop.f32.mrb[41].mxu0 }
 0x32d   : > { %v1843_v45 = vpop.f32.mrb[42].mxu0 }
 0x32e   : > { %v1845_v28 = vpop.f32.mrb[43].mxu0 }
 0x333   : > { %v1848_v32 = vpop.f32.mrb[44].mxu0 }
 0x334   : > { %v1850_v46 = vpop.f32.mrb[45].mxu0 }
 0x335   : > { %v1851_v61 = vpop.f32.mrb[46].mxu0 }
 0x336   : > { %v1853_v40 = vpop.f32.mrb[47].mxu0 }
 0x33b   : > { %v1856_v18 = vpop.f32.mrb[48].mxu0 }
 0x33c   : > { %v1858_v37 = vpop.f32.mrb[49].mxu0 }
 0x33d   : > { %v1859_v27 = vpop.f32.mrb[50].mxu0 }
 0x33e   : > { %v1861_v6 = vpop.f32.mrb[51].mxu0 }
 0x343   : > { %v1864_v60 = vpop.f32.mrb[52].mxu0 }
 0x344   : > { %v1866_v63 = vpop.f32.mrb[53].mxu0 }
 0x345   : > { %v1867_v12 = vpop.f32.mrb[54].mxu0 }
 0x346   : > { %v1869_v1 = vpop.f32.mrb[55].mxu0 }
 0x347   : > { %v2188_v33 = vpop.f32.mrb[20].mxu1 }
 0x348   : > { %v4037_v57 = vadd.f32 %v2188_v33, %v1840_v39  ;;  %v2190_v38 = vpop.f32.mrb[21].mxu1 }
 0x349   : > { %v2191_v23 = vpop.f32.mrb[22].mxu1 }
 0x34a   : > { %v2259_v10 = vcombine.high %v4037_v57, %v6234_v0  ;;  %v5504_v14 = vrot.slane %v4037_v57, %v5500_v20  ;;  %v4038_v3 = vadd.f32 %v2191_v23, %v1843_v45  ;;  %v2193_v9 = vpop.f32.mrb[23].mxu1  ;;  %2235 = vrot.lane.b32.xlu1 %v4037_v57, %s4286_s27 }
 0x34c   : > { %v5508_v56 = vrot.slane %v2259_v10, %v5500_v20  ;;  %v2325_v30 = vcombine.high %v4038_v3, %v6234_v0  ;;  %v5512_v50 = vrot.slane %v4038_v3, %v5500_v20  ;;  %2237 = vrot.lane.b32.xlu0 %v4038_v3, %s4286_s27 }
 0x34e   : > { %v5516_v24 = vrot.slane %v2325_v30, %v5500_v20 }
 0x34f   : > { %v2196_v21 = vpop.f32.mrb[24].mxu1 }
 0x350   : > { %v4039_v13 = vadd.f32 %v2196_v21, %v1848_v32  ;;  %v2198_v58 = vpop.f32.mrb[25].mxu1 }
 0x351   : > { %v2199_v2 = vpop.f32.mrb[26].mxu1 }
 0x352   : > { %v2391_v53 = vcombine.high %v4039_v13, %v6234_v0  ;;  %v5520_v31 = vrot.slane %v4039_v13, %v5500_v20  ;;  %v4040_v44 = vadd.f32 %v2199_v2, %v1851_v61  ;;  %v2201_v34 = vpop.f32.mrb[27].mxu1  ;;  %2239 = vrot.lane.b32.xlu1 %v4039_v13, %s4286_s27  ;;  %v4287_v61 = vmov 1934713408  }
 0x353   : > { %v2292_v40 = vunpack.c.l.s4 %v4287_v61 }
 0x354   : > { %v5524_v52 = vrot.slane %v2391_v53, %v5500_v20  ;;  %v2457_v22 = vcombine.high %v4040_v44, %v6234_v0  ;;  %v5528_v26 = vrot.slane %v4040_v44, %v5500_v20  ;;  %2241 = vrot.lane.b32.xlu0 %v4040_v44, %s4286_s27 }
 0x356   : > { %v5532_v11 = vrot.slane %v2457_v22, %v5500_v20 }
 0x357   : > { %v2204_v51 = vpop.f32.mrb[28].mxu1 }
 0x358   : > { %v4041_v17 = vadd.f32 %v2204_v51, %v1856_v18  ;;  %v2206_v47 = vpop.f32.mrb[29].mxu1  ;;  %v2293_v18 = vunpack.c.0.s8 %v2292_v40 }
 0x359   : > { %v2207_v36 = vpop.f32.mrb[30].mxu1 }
 0x35a   : > { %v2523_v55 = vcombine.high %v4041_v17, %v6234_v0  ;;  %v5536_v43 = vrot.slane %v4041_v17, %v5500_v20  ;;  %v4042_v15 = vadd.f32 %v2207_v36, %v1859_v27  ;;  %v2209_v16 = vpop.f32.mrb[31].mxu1  ;;  %2243 = vrot.lane.b32.xlu1 %v4041_v17, %s4286_s27  ;;  %v5567_v27 = vsub.s32 %v2293_v18, %v4954_v54 }
 0x35c   : > { %v5540_v48 = vrot.slane %v2523_v55, %v5500_v20  ;;  %v2589_v25 = vcombine.high %v4042_v15, %v6234_v0  ;;  %v5544_v8 = vrot.slane %v4042_v15, %v5500_v20  ;;  %2245 = vrot.lane.b32.xlu0 %v4042_v15, %s4286_s27 }
 0x35e   : > { %v5548_v7 = vrot.slane %v2589_v25, %v5500_v20 }
 0x35f   : > { %v2212_v4 = vpop.f32.mrb[32].mxu1 }
 0x360   : > { %v4043_v19 = vadd.f32 %v2212_v4, %v1864_v60  ;;  %v2214_v35 = vpop.f32.mrb[33].mxu1 }
 0x361   : > { %v2215_v5 = vpop.f32.mrb[34].mxu1 }
 0x362   : > { %v2655_v29 = vcombine.high %v4043_v19, %v6234_v0  ;;  %v5552_v49 = vrot.slane %v4043_v19, %v5500_v20  ;;  %v4044_v39 = vadd.f32 %v2215_v5, %v1867_v12  ;;  %2247 = vrot.lane.b32.xlu1 %v4043_v19, %s4286_s27  ;;  %v2217_v62 = vpop.f32.mrb[35].mxu1 }
 0x364   : > { %v5556_v45 = vrot.slane %v2655_v29, %v5500_v20  ;;  %v2721_v28 = vcombine.high %v4044_v39, %v6234_v0  ;;  %v5560_v32 = vrot.slane %v4044_v39, %v5500_v20  ;;  %2249 = vrot.lane.b32.xlu0 %v4044_v39, %s4286_s27 }
 0x366   : > { %v5564_v46 = vrot.slane %v2721_v28, %v5500_v20 }
 0x3bc   : > { %v2236_v37 = vpop.permute.xlu1 %2235 }
 0x3bd   : > { %v2274_v41 = vcombine.high %v2236_v37, %v6234_v0  ;;  %v2281_v59 = vrot.slane %v2236_v37, %v5500_v20 }
 0x3be   : > { %v2238_v6 = vpop.permute.xlu0 %2237 }
 0x3bf   : > { %v2288_v42 = vrot.slane %v2274_v41, %v5500_v20  ;;  %v2289_v60 = vcombine.low %v5504_v14, %v2281_v59  ;;  %v2290_v63 = vcombine.high %v5504_v14, %v2281_v59  ;;  %v2340_v12 = vcombine.high %v2238_v6, %v6234_v0 }
 0x3c0   : > { %v2347_v1 = vrot.slane %v2238_v6, %v5500_v20 }
 0x3c1   : > { %v2297_v33 = vrot.slane %v2289_v60, %v5567_v27  ;;  %v2304_v54 = vrot.slane %v2290_v63, %v5567_v27  ;;  %v2305_v57 = vcombine.low %v5508_v56, %v2288_v42  ;;  %v2306_v38 = vcombine.high %v5508_v56, %v2288_v42 }
 0x3c2   : > { %v5581_v23 = vrot.slane %v2340_v12, %v5500_v20  ;;  %v2355_v10 = vcombine.low %v5512_v50, %v2347_v1  ;;  %v2356_v14 = vcombine.high %v5512_v50, %v2347_v1 }
 0x3c3   : > { %v2313_v3 = vrot.slane %v2305_v57, %v5567_v27  ;;  %v2320_v9 = vrot.slane %v2306_v38, %v5567_v27  ;;  %v2321_v30 = vcombine.high %v2297_v33, %v6234_v0  ;;  %v2322_v21 = vcombine.high %v2304_v54, %v6234_v0 }
 0x3c4   : > { %v2788_v13 = vsel %vm2787_vm4, %v2297_v33, -inf  ;;  %v2802_v58 = vsel %vm2787_vm4, %v2304_v54, -inf  ;;  %v5592_v56 = vrot.slane %v2355_v10, %v5567_v27  ;;  %v5595_v2 = vrot.slane %v2356_v14, %v5567_v27 }
 0x3c5   : > { %v2323_v50 = vcombine.high %v2313_v3, %v6234_v0  ;;  %v2324_v53 = vcombine.high %v2320_v9, %v6234_v0  ;;  %v2789_v44 = vrot.slane %v2788_v13, 4  ;;  %v2795_v34 = vsel %vm2787_vm4, %v2321_v30, -inf }
 0x3c6   : > { %v2796_v22 = vrot.slane %v2795_v34, 4  ;;  %v2803_v51 = vrot.slane %v2802_v58, 4  ;;  %v2809_v17 = vsel %vm2787_vm4, %v2322_v21, -inf  ;;  %v2816_v47 = vsel %vm2787_vm4, %v2313_v3, -inf }
 0x3c7   : > { %v2790_v36 = vmax.f32 %v2788_v13, %v2789_v44  ;;  %v2810_v55 = vrot.slane %v2809_v17, 4  ;;  %v2817_v15 = vrot.slane %v2816_v47, 4  ;;  %v2823_v16 = vsel %vm2787_vm4, %v2323_v50, -inf }
 0x3c8   : > { %v2797_v25 = vmax.f32 %v2795_v34, %v2796_v22  ;;  %v2804_v4 = vmax.f32 %v2802_v58, %v2803_v51  ;;  %v2824_v19 = vrot.slane %v2823_v16, 4  ;;  %v2830_v35 = vsel %vm2787_vm4, %v2320_v9, -inf }
 0x3c9   : > { %v2791_v5 = vrot.slane %v2790_v36, 2  ;;  %v2811_v29 = vmax.f32 %v2809_v17, %v2810_v55  ;;  %v2818_v39 = vmax.f32 %v2816_v47, %v2817_v15  ;;  %v2831_v62 = vrot.slane %v2830_v35, 4 }
 0x3ca   : > { %v2798_v28 = vrot.slane %v2797_v25, 2  ;;  %v2805_v61 = vrot.slane %v2804_v4, 2  ;;  %v2825_v40 = vmax.f32 %v2823_v16, %v2824_v19  ;;  %v2837_v18 = vsel %vm2787_vm4, %v2324_v53, -inf }
 0x3cb   : > { %v2792_v37 = vmax.f32 %v2790_v36, %v2791_v5  ;;  %v2812_v41 = vrot.slane %v2811_v29, 2  ;;  %v2819_v59 = vrot.slane %v2818_v39, 2  ;;  %v2832_v6 = vmax.f32 %v2830_v35, %v2831_v62 }
 0x3cc   : > { %v2799_v42 = vmax.f32 %v2797_v25, %v2798_v28  ;;  %v2806_v60 = vmax.f32 %v2804_v4, %v2805_v61  ;;  %v2826_v63 = vrot.slane %v2825_v40, 2  ;;  %v2838_v12 = vrot.slane %v2837_v18, 4 }
 0x3cd   : > { %v2793_v1 = vrot.slane %v2792_v37, 1  ;;  %v2813_v33 = vmax.f32 %v2811_v29, %v2812_v41  ;;  %v2820_v54 = vmax.f32 %v2818_v39, %v2819_v59  ;;  %v2833_v57 = vrot.slane %v2832_v6, 2 }
 0x3ce   : > { %v2800_v38 = vrot.slane %v2799_v42, 1  ;;  %v2807_v10 = vrot.slane %v2806_v60, 1  ;;  %v2827_v14 = vmax.f32 %v2825_v40, %v2826_v63  ;;  %v2839_v3 = vmax.f32 %v2837_v18, %v2838_v12 }
 0x3cf   : > { %v2794_v9 = vmax.f32 %v2792_v37, %v2793_v1  ;;  %v2814_v30 = vrot.slane %v2813_v33, 1  ;;  %v2821_v21 = vrot.slane %v2820_v54, 1  ;;  %v2834_v13 = vmax.f32 %v2832_v6, %v2833_v57 }
 0x3d0   : > { %v2801_v58 = vmax.f32 %v2799_v42, %v2800_v38  ;;  %v2808_v50 = vmax.f32 %v2806_v60, %v2807_v10  ;;  %v2828_v53 = vrot.slane %v2827_v14, 1  ;;  %v2840_v44 = vrot.slane %v2839_v3, 2 }
 0x3d1   : > { %v2815_v34 = vmax.f32 %v2813_v33, %v2814_v30  ;;  %v2822_v22 = vmax.f32 %v2820_v54, %v2821_v21  ;;  %v2835_v51 = vrot.slane %v2834_v13, 1  ;;  %v5606_v17 = vsel %vm3236_vm5, %v2794_v9, -inf }
 0x3d2   : > { %v2829_v47 = vmax.f32 %v2827_v14, %v2828_v53  ;;  %v2841_v36 = vmax.f32 %v2839_v3, %v2840_v44  ;;  %v5609_v55 = vsel %vm3236_vm5, %v2801_v58, -inf  ;;  %v5612_v15 = vsel %vm3236_vm5, %v2808_v50, -inf }
 0x3d3   : > { %v2836_v16 = vmax.f32 %v2834_v13, %v2835_v51  ;;  %v5615_v25 = vsel %vm3236_vm5, %v2815_v34, -inf  ;;  %v5618_v4 = vsel %vm3236_vm5, %v2822_v22, -inf  ;;  %v2371_v19 = vcombine.low %v5516_v24, %v5581_v23 }
 0x3d4   : > { %v2842_v35 = vrot.slane %v2841_v36, 1  ;;  %v5623_v5 = vsel %vm3236_vm5, %v2829_v47, -inf  ;;  %v2372_v29 = vcombine.high %v5516_v24, %v5581_v23  ;;  %v2387_v39 = vcombine.high %v5592_v56, %v6234_v0 }
 0x3d5   : > { %v5630_v62 = vsel %vm3236_vm5, %v2836_v16, -inf  ;;  %v2379_v28 = vrot.slane %v2371_v19, %v5567_v27  ;;  %v2388_v61 = vcombine.high %v5595_v2, %v6234_v0  ;;  %v2844_v40 = vsel %vm2787_vm4, %v5592_v56, -inf }
 0x3d6   : > { %v2843_v18 = vmax.f32 %v2841_v36, %v2842_v35  ;;  %v2386_v37 = vrot.slane %v2372_v29, %v5567_v27  ;;  %v2845_v41 = vrot.slane %v2844_v40, 4  ;;  %v2851_v24 = vsel %vm2787_vm4, %v2387_v39, -inf }
 0x3d7   : > { %v2389_v23 = vcombine.high %v2379_v28, %v6234_v0  ;;  %v2852_v59 = vrot.slane %v2851_v24, 4  ;;  %v2858_v6 = vsel %vm2787_vm4, %v5595_v2, -inf  ;;  %v2865_v42 = vsel %vm2787_vm4, %v2388_v61, -inf }
 0x3d8   : > { %v5644_v60 = vsel %vm3236_vm5, %v2843_v18, -inf  ;;  %v2390_v63 = vcombine.high %v2386_v37, %v6234_v0  ;;  %v2846_v56 = vmax.f32 %v2844_v40, %v2845_v41  ;;  %v2859_v12 = vrot.slane %v2858_v6, 4 }
 0x3d9   : > { %v2853_v1 = vmax.f32 %v2851_v24, %v2852_v59  ;;  %v2866_v33 = vrot.slane %v2865_v42, 4  ;;  %v2872_v54 = vsel %vm2787_vm4, %v2379_v28, -inf  ;;  %v2879_v57 = vsel %vm2787_vm4, %v2389_v23, -inf }
 0x3da   : > { %v2847_v38 = vrot.slane %v2846_v56, 2  ;;  %v2860_v10 = vmax.f32 %v2858_v6, %v2859_v12  ;;  %v2873_v14 = vrot.slane %v2872_v54, 4  ;;  %v2880_v3 = vrot.slane %v2879_v57, 4 }
 0x3db   : > { %v2854_v2 = vrot.slane %v2853_v1, 2  ;;  %v2867_v9 = vmax.f32 %v2865_v42, %v2866_v33  ;;  %v2886_v30 = vsel %vm2787_vm4, %v2386_v37, -inf  ;;  %v2893_v21 = vsel %vm2787_vm4, %v2390_v63, -inf }
 0x3dc   : > { %v2848_v13 = vmax.f32 %v2846_v56, %v2847_v38  ;;  %v2861_v58 = vrot.slane %v2860_v10, 2  ;;  %v2874_v50 = vmax.f32 %v2872_v54, %v2873_v14  ;;  %v2881_v53 = vmax.f32 %v2879_v57, %v2880_v3 }
 0x3dd   : > { %v2855_v44 = vmax.f32 %v2853_v1, %v2854_v2  ;;  %v2868_v34 = vrot.slane %v2867_v9, 2  ;;  %v2887_v22 = vrot.slane %v2886_v30, 4  ;;  %v2894_v51 = vrot.slane %v2893_v21, 4 }
 0x3de   : > { %v2849_v47 = vrot.slane %v2848_v13, 1  ;;  %v2862_v36 = vmax.f32 %v2860_v10, %v2861_v58  ;;  %v2875_v16 = vrot.slane %v2874_v50, 2  ;;  %v2882_v19 = vrot.slane %v2881_v53, 2 }
 0x3df   : > { %v2856_v35 = vrot.slane %v2855_v44, 1  ;;  %v2869_v29 = vmax.f32 %v2867_v9, %v2868_v34  ;;  %v2888_v39 = vmax.f32 %v2886_v30, %v2887_v22  ;;  %v2895_v28 = vmax.f32 %v2893_v21, %v2894_v51  ;;  %v2240_v21 = vpop.permute.xlu1 %2239 }
 0x3e0   : > { %v2850_v61 = vmax.f32 %v2848_v13, %v2849_v47  ;;  %v2863_v40 = vrot.slane %v2862_v36, 1  ;;  %v2876_v18 = vmax.f32 %v2874_v50, %v2875_v16  ;;  %v2883_v37 = vmax.f32 %v2881_v53, %v2882_v19  ;;  %v2242_v13 = vpop.permute.xlu0 %2241  ;;  %v5677_v16 = vld [vmem:[%s6232_s4] ss:$0 sm:$0xff] }
 0x3e1   : > { %v2857_v41 = vmax.f32 %v2855_v44, %v2856_v35  ;;  %v2870_v24 = vrot.slane %v2869_v29, 1  ;;  %v2889_v23 = vrot.slane %v2888_v39, 2  ;;  %v2896_v59 = vrot.slane %v2895_v28, 2 }
 0x3e2   : > { %v2864_v6 = vmax.f32 %v2862_v36, %v2863_v40  ;;  %v2877_v42 = vrot.slane %v2876_v18, 1  ;;  %v2884_v63 = vrot.slane %v2883_v37, 1  ;;  %v3238_v56 = vsel %vm3236_vm5, %v2850_v61, -inf }
 0x3e3   : > { %v2871_v12 = vmax.f32 %v2869_v29, %v2870_v24  ;;  %v2890_v1 = vmax.f32 %v2888_v39, %v2889_v23  ;;  %v2897_v33 = vmax.f32 %v2895_v28, %v2896_v59  ;;  %v3239_v54 = vmax.f32 %v5606_v17, %v3238_v56  ;;  %v2244_v29 = vpop.permute.xlu1 %2243 }
 0x3e4   : > { %v2878_v57 = vmax.f32 %v2876_v18, %v2877_v42  ;;  %v2885_v38 = vmax.f32 %v2883_v37, %v2884_v63  ;;  %v3241_v10 = vsel %vm3236_vm5, %v2857_v41, -inf  ;;  %v3244_v14 = vsel %vm3236_vm5, %v2864_v6, -inf  ;;  %v5688_v39 = vpop.permute.xlu0 %2245 }
 0x3e5   : > { %v2891_v3 = vrot.slane %v2890_v1, 1  ;;  %v2898_v2 = vrot.slane %v2897_v33, 1  ;;  %v3242_v9 = vmax.f32 %v5609_v55, %v3241_v10  ;;  %v3245_v30 = vmax.f32 %v5612_v15, %v3244_v14 }
 0x3e6   : > { %v3247_v58 = vsel %vm3236_vm5, %v2871_v12, -inf  ;;  %v3250_v50 = vsel %vm3236_vm5, %v2878_v57, -inf  ;;  %v5660_v17 = vsel %vm3236_vm5, %v2885_v38, -inf  ;;  %v5663_v53 = vsel %vm3236_vm5, %v3239_v54, -inf }
 0x3e7   : > { %6252 = vst [vmem:[#allocation5_spill] sm:$0xff] %v5663_v53  ;;  %v2892_v44 = vmax.f32 %v2890_v1, %v2891_v3  ;;  %v2899_v34 = vmax.f32 %v2897_v33, %v2898_v2  ;;  %v3248_v22 = vmax.f32 %v5615_v25, %v3247_v58  ;;  %v3251_v55 = vmax.f32 %v5618_v4, %v3250_v50 }
 0x3e8   : > { %v5670_v51 = vsel %vm3236_vm5, %v3242_v9, -inf  ;;  %v3336_v47 = vsel %vm3236_vm5, %v3245_v30, -inf  ;;  %v2406_v36 = vcombine.high %v2240_v21, %v6234_v0  ;;  %v2413_v37 = vrot.slane %v2240_v21, %v5500_v20 }
 0x3e9   : > { %6253 = vst [vmem:[#allocation6_spill] sm:$0xff] %v5670_v51  ;;  %v5680_v19 = vsel %vm3236_vm5, %v2892_v44, -inf  ;;  %v5683_v25 = vsel %vm3236_vm5, %v2899_v34, -inf  ;;  %v3337_v35 = vsel %vm3236_vm5, %v3248_v22, -inf  ;;  %v5695_v18 = vsel %vm3236_vm5, %v3251_v55, -inf }
 0x3ea   : > { %v3338_v40 = vmax.f32 %v3336_v47, %v3337_v35  ;;  %v2420_v41 = vrot.slane %v2406_v36, %v5500_v20  ;;  %v2472_v24 = vcombine.high %v2242_v13, %v6234_v0  ;;  %v2479_v23 = vrot.slane %v2242_v13, %v5500_v20 }
 0x3eb   : > { %v2538_v6 = vcombine.high %v2244_v29, %v6234_v0  ;;  %v5706_v42 = vrot.slane %v2244_v29, %v5500_v20  ;;  %v5710_v63 = vcombine.high %v5688_v39, %v6234_v0  ;;  %v2421_v56 = vcombine.low %v5520_v31, %v2413_v37 }
 0x3ec   : > { %v5702_v59 = vadd.f32 %v5677_v16, %v3338_v40  ;;  %v2422_v12 = vcombine.high %v5520_v31, %v2413_v37  ;;  %v2437_v1 = vcombine.low %v5524_v52, %v2420_v41  ;;  %v2438_v33 = vcombine.high %v5524_v52, %v2420_v41 }
 0x3ed   : > { %v5717_v54 = vrot.slane %v2472_v24, %v5500_v20  ;;  %v2487_v57 = vcombine.low %v5528_v26, %v2479_v23  ;;  %v2488_v38 = vcombine.high %v5528_v26, %v2479_v23  ;;  %v5722_v10 = vrot.slane %v2538_v6, %v5500_v20 }
 0x3ee   : > { %6254 = vst [vmem:[#allocation7_spill] sm:$0xff] %v5702_v59  ;;  %v2429_v14 = vrot.slane %v2421_v56, %v5567_v27  ;;  %v2436_v3 = vrot.slane %v2422_v12, %v5567_v27  ;;  %v2445_v31 = vrot.slane %v2437_v1, %v5567_v27  ;;  %v2452_v2 = vrot.slane %v2438_v33, %v5567_v27 }
 0x3ef   : > { %v5729_v52 = vrot.slane %v2487_v57, %v5567_v27  ;;  %v5732_v9 = vrot.slane %v2488_v38, %v5567_v27  ;;  %v2503_v26 = vcombine.low %v5532_v11, %v5717_v54 }
 0x3f0   : > { %v2453_v21 = vcombine.high %v2429_v14, %v6234_v0  ;;  %v2454_v13 = vcombine.high %v2436_v3, %v6234_v0  ;;  %v2455_v58 = vcombine.high %v2445_v31, %v6234_v0  ;;  %v2456_v50 = vcombine.high %v2452_v2, %v6234_v0 }
 0x3f1   : > { %v2900_v44 = vsel %vm2787_vm4, %v2429_v14, -inf  ;;  %v2914_v34 = vsel %vm2787_vm4, %v2436_v3, -inf  ;;  %v2928_v22 = vsel %vm2787_vm4, %v2445_v31, -inf  ;;  %v2942_v55 = vsel %vm2787_vm4, %v2452_v2, -inf }
 0x3f2   : > { %v2901_v47 = vrot.slane %v2900_v44, 4  ;;  %v2907_v36 = vsel %vm2787_vm4, %v2453_v21, -inf  ;;  %v2915_v35 = vrot.slane %v2914_v34, 4  ;;  %v2921_v29 = vsel %vm2787_vm4, %v2454_v13, -inf }
 0x3f3   : > { %v2908_v40 = vrot.slane %v2907_v36, 4  ;;  %v2922_v37 = vrot.slane %v2921_v29, 4  ;;  %v2929_v41 = vrot.slane %v2928_v22, 4  ;;  %v2935_v24 = vsel %vm2787_vm4, %v2455_v58, -inf }
 0x3f4   : > { %v2902_v23 = vmax.f32 %v2900_v44, %v2901_v47  ;;  %v2916_v6 = vmax.f32 %v2914_v34, %v2915_v35  ;;  %v2936_v56 = vrot.slane %v2935_v24, 4  ;;  %v2943_v12 = vrot.slane %v2942_v55, 4 }
 0x3f5   : > { %v2909_v1 = vmax.f32 %v2907_v36, %v2908_v40  ;;  %v2923_v33 = vmax.f32 %v2921_v29, %v2922_v37  ;;  %v2930_v57 = vmax.f32 %v2928_v22, %v2929_v41  ;;  %v2949_v38 = vsel %vm2787_vm4, %v2456_v50, -inf }
 0x3f6   : > { %v2903_v14 = vrot.slane %v2902_v23, 2  ;;  %v2917_v3 = vrot.slane %v2916_v6, 2  ;;  %v2937_v31 = vmax.f32 %v2935_v24, %v2936_v56  ;;  %v2944_v2 = vmax.f32 %v2942_v55, %v2943_v12 }
 0x3f7   : > { %v2910_v21 = vrot.slane %v2909_v1, 2  ;;  %v2924_v13 = vrot.slane %v2923_v33, 2  ;;  %v2931_v4 = vrot.slane %v2930_v57, 2  ;;  %v2950_v61 = vrot.slane %v2949_v38, 4 }
 0x3f8   : > { %v2904_v28 = vmax.f32 %v2902_v23, %v2903_v14  ;;  %v2918_v15 = vmax.f32 %v2916_v6, %v2917_v3  ;;  %v2938_v58 = vrot.slane %v2937_v31, 2  ;;  %v2945_v44 = vrot.slane %v2944_v2, 2 }
 0x3f9   : > { %v2911_v34 = vmax.f32 %v2909_v1, %v2910_v21  ;;  %v2925_v47 = vmax.f32 %v2923_v33, %v2924_v13  ;;  %v2932_v35 = vmax.f32 %v2930_v57, %v2931_v4  ;;  %v2951_v36 = vmax.f32 %v2949_v38, %v2950_v61 }
 0x3fa   : > { %v2905_v29 = vrot.slane %v2904_v28, 1  ;;  %v2919_v22 = vrot.slane %v2918_v15, 1  ;;  %v2939_v40 = vmax.f32 %v2937_v31, %v2938_v58  ;;  %v2946_v50 = vmax.f32 %v2944_v2, %v2945_v44 }
 0x3fb   : > { %v2912_v37 = vrot.slane %v2911_v34, 1  ;;  %v2926_v41 = vrot.slane %v2925_v47, 1  ;;  %v2933_v24 = vrot.slane %v2932_v35, 1  ;;  %v2952_v55 = vrot.slane %v2951_v36, 2 }
 0x3fc   : > { %v2906_v56 = vmax.f32 %v2904_v28, %v2905_v29  ;;  %v2920_v12 = vmax.f32 %v2918_v15, %v2919_v22  ;;  %v2940_v0 = vrot.slane %v2939_v40, 1  ;;  %v2947_v30 = vrot.slane %v2946_v50, 1 }
 0x3fd   : > { %v2913_v23 = vmax.f32 %v2911_v34, %v2912_v37  ;;  %v2927_v6 = vmax.f32 %v2925_v47, %v2926_v41  ;;  %v2934_v14 = vmax.f32 %v2932_v35, %v2933_v24  ;;  %v2953_v3 = vmax.f32 %v2951_v36, %v2952_v55 }
 0x3fe   : > { %v2941_v1 = vmax.f32 %v2939_v40, %v2940_v0  ;;  %v2948_v33 = vmax.f32 %v2946_v50, %v2947_v30  ;;  %v5751_v4 = vsel %vm3236_vm5, %v2906_v56, -inf  ;;  %v5754_v61 = vsel %vm3236_vm5, %v2920_v12, -inf }
 0x3ff   : > { %v2954_v57 = vrot.slane %v2953_v3, 1  ;;  %v5757_v38 = vsel %vm3236_vm5, %v2913_v23, -inf  ;;  %v5760_v15 = vsel %vm3236_vm5, %v2927_v6, -inf  ;;  %v5763_v28 = vsel %vm3236_vm5, %v2934_v14, -inf }
 0x400   : > { %v5766_v31 = vsel %vm3236_vm5, %v2941_v1, -inf  ;;  %v5769_v0 = vsel %vm3236_vm5, %v2948_v33, -inf  ;;  %v2511_v30 = vrot.slane %v2503_v26, %v5567_v27  ;;  %v6255_v2 = vcombine.high %v5532_v11, %v5717_v54 }
 0x401   : > { %v2955_v13 = vmax.f32 %v2953_v3, %v2954_v57  ;;  %v6256_v58 = vmov 0.0   ;;  %v2956_v47 = vsel %vm2787_vm4, %v5729_v52, -inf  ;;  %v2970_v29 = vsel %vm2787_vm4, %v5732_v9, -inf }
 0x402   : > { %v2518_v21 = vrot.slane %v6255_v2, %v5567_v27  ;;  %v2519_v44 = vcombine.high %v5729_v52, %v6256_v58  ;;  %v2520_v34 = vcombine.high %v5732_v9, %v6256_v58  ;;  %v2521_v35 = vcombine.high %v2511_v30, %v6256_v58 }
 0x403   : > { %v2957_v26 = vrot.slane %v2956_v47, 4  ;;  %v5790_v11 = vsel %vm3236_vm5, %v2955_v13, -inf  ;;  %v2971_v22 = vrot.slane %v2970_v29, 4  ;;  %v2984_v52 = vsel %vm2787_vm4, %v2511_v30, -inf }
 0x404   : > { %v2522_v36 = vcombine.high %v2518_v21, %v6256_v58  ;;  %6257 = vst [vmem:[#allocation8_spill] sm:$0xff] %v5790_v11  ;;  %v2963_v54 = vsel %vm2787_vm4, %v2519_v44, -inf  ;;  %v2977_v40 = vsel %vm2787_vm4, %v2520_v34, -inf  ;;  %v2985_v55 = vrot.slane %v2984_v52, 4 }
 0x405   : > { %v2958_v50 = vmax.f32 %v2956_v47, %v2957_v26  ;;  %v2964_v37 = vrot.slane %v2963_v54, 4  ;;  %v2978_v41 = vrot.slane %v2977_v40, 4  ;;  %v2972_v24 = vmax.f32 %v2970_v29, %v2971_v22 }
 0x406   : > { %v2991_v56 = vsel %vm2787_vm4, %v2521_v35, -inf  ;;  %v2998_v12 = vsel %vm2787_vm4, %v2518_v21, -inf  ;;  %v2986_v1 = vmax.f32 %v2984_v52, %v2985_v55  ;;  %v3005_v57 = vsel %vm2787_vm4, %v2522_v36, -inf }
 0x407   : > { %v2959_v9 = vrot.slane %v2958_v50, 2  ;;  %v2965_v23 = vmax.f32 %v2963_v54, %v2964_v37  ;;  %v2979_v6 = vmax.f32 %v2977_v40, %v2978_v41  ;;  %v2992_v14 = vrot.slane %v2991_v56, 4 }
 0x408   : > { %v2973_v3 = vrot.slane %v2972_v24, 2  ;;  %v2999_v33 = vrot.slane %v2998_v12, 4  ;;  %v2987_v47 = vrot.slane %v2986_v1, 2  ;;  %v3006_v29 = vrot.slane %v3005_v57, 4 }
 0x409   : > { %v2960_v2 = vmax.f32 %v2958_v50, %v2959_v9  ;;  %v2966_v13 = vrot.slane %v2965_v23, 2  ;;  %v2980_v44 = vrot.slane %v2979_v6, 2  ;;  %v2993_v34 = vmax.f32 %v2991_v56, %v2992_v14 }
 0x40a   : > { %v2974_v30 = vmax.f32 %v2972_v24, %v2973_v3  ;;  %v3000_v26 = vmax.f32 %v2998_v12, %v2999_v33  ;;  %v2988_v40 = vmax.f32 %v2986_v1, %v2987_v47  ;;  %v3007_v41 = vmax.f32 %v3005_v57, %v3006_v29 }
 0x40b   : > { %v2961_v35 = vrot.slane %v2960_v2, 1  ;;  %v2967_v22 = vmax.f32 %v2965_v23, %v2966_v13  ;;  %v2981_v21 = vmax.f32 %v2979_v6, %v2980_v44  ;;  %v2994_v59 = vrot.slane %v2993_v34, 2 }
 0x40c   : > { %v2975_v54 = vrot.slane %v2974_v30, 1  ;;  %v3001_v37 = vrot.slane %v3000_v26, 2  ;;  %v2989_v9 = vrot.slane %v2988_v40, 1  ;;  %v3008_v56 = vrot.slane %v3007_v41, 2 }
 0x40d   : > { %v2962_v52 = vmax.f32 %v2960_v2, %v2961_v35  ;;  %v2968_v55 = vrot.slane %v2967_v22, 1  ;;  %v2982_v51 = vrot.slane %v2981_v21, 1  ;;  %v2995_v36 = vmax.f32 %v2993_v34, %v2994_v59 }
 0x40e   : > { %v2976_v50 = vmax.f32 %v2974_v30, %v2975_v54  ;;  %v3002_v53 = vmax.f32 %v3000_v26, %v3001_v37  ;;  %v2990_v23 = vmax.f32 %v2988_v40, %v2989_v9  ;;  %v3009_v33 = vmax.f32 %v3007_v41, %v3008_v56 }
 0x40f   : > { %v2969_v24 = vmax.f32 %v2967_v22, %v2968_v55  ;;  %v2983_v14 = vmax.f32 %v2981_v21, %v2982_v51  ;;  %v2996_v12 = vrot.slane %v2995_v36, 1  ;;  %v3262_v3 = vsel %vm3236_vm5, %v2962_v52, -inf  ;;  %v5834_v52 = vpop.permute.xlu1 %2247 }
 0x410   : > { %v3003_v6 = vrot.slane %v3002_v53, 1  ;;  %v3263_v1 = vmax.f32 %v5751_v4, %v3262_v3  ;;  %v3268_v2 = vsel %vm3236_vm5, %v2976_v50, -inf  ;;  %v3010_v34 = vrot.slane %v3009_v33, 1 }
 0x411   : > { %v2997_v13 = vmax.f32 %v2995_v36, %v2996_v12  ;;  %v3265_v57 = vsel %vm3236_vm5, %v2969_v24, -inf  ;;  %v3271_v59 = vsel %vm3236_vm5, %v2983_v14, -inf  ;;  %v3269_v51 = vmax.f32 %v5754_v61, %v3268_v2 }
 0x412   : > { %v3004_v44 = vmax.f32 %v3002_v53, %v3003_v6  ;;  %v3266_v30 = vmax.f32 %v5757_v38, %v3265_v57  ;;  %v3272_v47 = vmax.f32 %v5760_v15, %v3271_v59  ;;  %v3274_v26 = vsel %vm3236_vm5, %v2990_v23, -inf }
 0x413   : > { %v5808_v29 = vsel %vm3236_vm5, %v2997_v13, -inf  ;;  %v5811_v4 = vsel %vm3236_vm5, %v3263_v1, -inf  ;;  %v3011_v35 = vmax.f32 %v3009_v33, %v3010_v34  ;;  %v3275_v22 = vmax.f32 %v5763_v28, %v3274_v26 }
 0x414   : > { %6258 = vst [vmem:[#allocation9_spill] sm:$0xff] %v5811_v4  ;;  %v5817_v38 = vsel %vm3236_vm5, %v3004_v44, -inf  ;;  %v5822_v15 = vsel %vm3236_vm5, %v3266_v30, -inf  ;;  %v3348_v21 = vsel %vm3236_vm5, %v3269_v51, -inf  ;;  %v3349_v54 = vsel %vm3236_vm5, %v3272_v47, -inf }
 0x415   : > { %6259 = vst [vmem:[#allocation10_spill] sm:$0xff] %v5822_v15  ;;  %v5827_v40 = vsel %vm3236_vm5, %v3011_v35, -inf  ;;  %v3350_v37 = vmax.f32 %v3348_v21, %v3349_v54  ;;  %v5832_v41 = vsel %vm3236_vm5, %v3275_v22, -inf  ;;  %v2553_v36 = vcombine.low %v5536_v43, %v5706_v42 }
 0x416   : > { %6260 = vst [vmem:[#allocation11_spill] sm:$0xff] %v5827_v40  ;;  %v2554_v50 = vcombine.high %v5536_v43, %v5706_v42  ;;  %v2569_v9 = vcombine.low %v5540_v48, %v5722_v10  ;;  %v2570_v24 = vcombine.high %v5540_v48, %v5722_v10  ;;  %v5851_v14 = vrot.slane %v5688_v39, %v5500_v20 }
 0x417   : > { %v5845_v56 = vadd.f32 %v5677_v16, %v3350_v37  ;;  %v5855_v12 = vrot.slane %v5710_v63, %v5500_v20  ;;  %v2561_v3 = vrot.slane %v2553_v36, %v5567_v27  ;;  %v5862_v23 = vcombine.high %v5834_v52, %v6256_v58 }
 0x418   : > { %v2568_v43 = vrot.slane %v2554_v50, %v5567_v27  ;;  %v2577_v42 = vrot.slane %v2569_v9, %v5567_v27  ;;  %v2584_v48 = vrot.slane %v2570_v24, %v5567_v27 }
 0x419   : > { %6261 = vst [vmem:[#allocation12_spill] sm:$0xff] %v5845_v56  ;;  %v2585_v6 = vcombine.high %v2561_v3, %v6256_v58  ;;  %v3012_v13 = vsel %vm2787_vm4, %v2561_v3, -inf }
 0x41a   : > { %v2586_v33 = vcombine.high %v2568_v43, %v6256_v58  ;;  %v2587_v1 = vcombine.high %v2577_v42, %v6256_v58  ;;  %v2588_v57 = vcombine.high %v2584_v48, %v6256_v58  ;;  %v3013_v2 = vrot.slane %v3012_v13, 4 }
 0x41b   : > { %v3026_v59 = vsel %vm2787_vm4, %v2568_v43, -inf  ;;  %v3040_v44 = vsel %vm2787_vm4, %v2577_v42, -inf  ;;  %v3019_v34 = vsel %vm2787_vm4, %v2585_v6, -inf  ;;  %v3054_v50 = vsel %vm2787_vm4, %v2584_v48, -inf }
 0x41c   : > { %v3027_v30 = vrot.slane %v3026_v59, 4  ;;  %v3033_v51 = vsel %vm2787_vm4, %v2586_v33, -inf  ;;  %v3041_v47 = vrot.slane %v3040_v44, 4  ;;  %v3014_v26 = vmax.f32 %v3012_v13, %v3013_v2 }
 0x41d   : > { %v3020_v35 = vrot.slane %v3019_v34, 4  ;;  %v3034_v22 = vrot.slane %v3033_v51, 4  ;;  %v3047_v21 = vsel %vm2787_vm4, %v2587_v1, -inf  ;;  %v3055_v43 = vrot.slane %v3054_v50, 4 }
 0x41e   : > { %v3028_v54 = vmax.f32 %v3026_v59, %v3027_v30  ;;  %v3042_v37 = vmax.f32 %v3040_v44, %v3041_v47  ;;  %v3048_v36 = vrot.slane %v3047_v21, 4  ;;  %v3015_v9 = vrot.slane %v3014_v26, 2 }
 0x41f   : > { %v3021_v24 = vmax.f32 %v3019_v34, %v3020_v35  ;;  %v3035_v3 = vmax.f32 %v3033_v51, %v3034_v22  ;;  %v3061_v33 = vsel %vm2787_vm4, %v2588_v57, -inf  ;;  %v3056_v61 = vmax.f32 %v3054_v50, %v3055_v43 }
 0x420   : > { %v3029_v42 = vrot.slane %v3028_v54, 2  ;;  %v3043_v6 = vrot.slane %v3042_v37, 2  ;;  %v3049_v28 = vmax.f32 %v3047_v21, %v3048_v36  ;;  %v3016_v55 = vmax.f32 %v3014_v26, %v3015_v9 }
 0x421   : > { %v3022_v13 = vrot.slane %v3021_v24, 2  ;;  %v3036_v2 = vrot.slane %v3035_v3, 2  ;;  %v3062_v44 = vrot.slane %v3061_v33, 4  ;;  %v3057_v63 = vrot.slane %v3056_v61, 2 }
 0x422   : > { %v3030_v53 = vmax.f32 %v3028_v54, %v3029_v42  ;;  %v3044_v1 = vmax.f32 %v3042_v37, %v3043_v6  ;;  %v3050_v59 = vrot.slane %v3049_v28, 2  ;;  %v3017_v30 = vrot.slane %v3016_v55, 1 }
 0x423   : > { %v3023_v47 = vmax.f32 %v3021_v24, %v3022_v13  ;;  %v3037_v48 = vmax.f32 %v3035_v3, %v3036_v2  ;;  %v3063_v22 = vmax.f32 %v3061_v33, %v3062_v44  ;;  %v3058_v57 = vmax.f32 %v3056_v61, %v3057_v63 }
 0x424   : > { %v3031_v34 = vrot.slane %v3030_v53, 1  ;;  %v3045_v51 = vrot.slane %v3044_v1, 1  ;;  %v3051_v35 = vmax.f32 %v3049_v28, %v3050_v59  ;;  %v3018_v10 = vmax.f32 %v3016_v55, %v3017_v30 }
 0x425   : > { %v3024_v21 = vrot.slane %v3023_v47, 1  ;;  %v3038_v36 = vrot.slane %v3037_v48, 1  ;;  %v3064_v50 = vrot.slane %v3063_v22, 2  ;;  %v3059_v43 = vrot.slane %v3058_v57, 1 }
 0x426   : > { %v3032_v26 = vmax.f32 %v3030_v53, %v3031_v34  ;;  %v3046_v9 = vmax.f32 %v3044_v1, %v3045_v51  ;;  %v3052_v39 = vrot.slane %v3051_v35, 1  ;;  %v5884_v42 = vsel %vm3236_vm5, %v3018_v10, -inf }
 0x427   : > { %v3025_v54 = vmax.f32 %v3023_v47, %v3024_v21  ;;  %v3039_v37 = vmax.f32 %v3037_v48, %v3038_v36  ;;  %v3065_v3 = vmax.f32 %v3063_v22, %v3064_v50  ;;  %v3060_v55 = vmax.f32 %v3058_v57, %v3059_v43 }
 0x428   : > { %v3053_v24 = vmax.f32 %v3051_v35, %v3052_v39  ;;  %v5887_v6 = vsel %vm3236_vm5, %v3032_v26, -inf  ;;  %v5890_v28 = vsel %vm3236_vm5, %v3046_v9, -inf  ;;  %v6262_v10 = vcombine.low %v5544_v8, %v5851_v14 }
 0x429   : > { %v5893_v53 = vsel %vm3236_vm5, %v3025_v54, -inf  ;;  %v5896_v61 = vsel %vm3236_vm5, %v3039_v37, -inf  ;;  %v3066_v39 = vrot.slane %v3065_v3, 1  ;;  %v6263_v13 = vcombine.high %v5544_v8, %v5851_v14 }
 0x42a   : > { %v2627_v63 = vrot.slane %v6262_v10, %v5567_v27  ;;  %v5903_v33 = vsel %vm3236_vm5, %v3053_v24, -inf  ;;  %v2636_v1 = vcombine.high %v5548_v7, %v5855_v12  ;;  %v5912_v59 = vsel %vm3236_vm5, %v3060_v55, -inf }
 0x42b   : > { %v2634_v2 = vrot.slane %v6263_v13, %v5567_v27  ;;  %v6264_v44 = vcombine.low %v5548_v7, %v5855_v12  ;;  %v3067_v34 = vmax.f32 %v3065_v3, %v3066_v39 }
 0x42c   : > { %v2651_v47 = vcombine.high %v2627_v63, %v6256_v58  ;;  %v3068_v48 = vsel %vm2787_vm4, %v2627_v63, -inf  ;;  %v2650_v51 = vrot.slane %v2636_v1, %v5567_v27 }
 0x42d   : > { %v2643_v30 = vrot.slane %v6264_v44, %v5567_v27  ;;  %v2652_v8 = vcombine.high %v2634_v2, %v6256_v58  ;;  %v3069_v14 = vrot.slane %v3068_v48, 4  ;;  %v3082_v21 = vsel %vm2787_vm4, %v2634_v2, -inf }
 0x42e   : > { %v3075_v22 = vsel %vm2787_vm4, %v2651_v47, -inf  ;;  %v5927_v7 = vsel %vm3236_vm5, %v3067_v34, -inf  ;;  %v2654_v12 = vcombine.high %v2650_v51, %v6256_v58  ;;  %v3083_v9 = vrot.slane %v3082_v21, 4 }
 0x42f   : > { %v2653_v35 = vcombine.high %v2643_v30, %v6256_v58  ;;  %v3096_v36 = vsel %vm2787_vm4, %v2643_v30, -inf  ;;  %v3070_v57 = vmax.f32 %v3068_v48, %v3069_v14  ;;  %v3076_v26 = vrot.slane %v3075_v22, 4 }
 0x430   : > { %v3089_v50 = vsel %vm2787_vm4, %v2652_v8, -inf  ;;  %v3097_v54 = vrot.slane %v3096_v36, 4  ;;  %v3084_v10 = vmax.f32 %v3082_v21, %v3083_v9  ;;  %v3110_v39 = vsel %vm2787_vm4, %v2650_v51, -inf }
 0x431   : > { %v3103_v37 = vsel %vm2787_vm4, %v2653_v35, -inf  ;;  %v3071_v43 = vrot.slane %v3070_v57, 2  ;;  %v3077_v24 = vmax.f32 %v3075_v22, %v3076_v26  ;;  %v3090_v3 = vrot.slane %v3089_v50, 4 }
 0x432   : > { %v3104_v55 = vrot.slane %v3103_v37, 4  ;;  %v3098_v63 = vmax.f32 %v3096_v36, %v3097_v54  ;;  %v3117_v13 = vsel %vm2787_vm4, %v2654_v12, -inf  ;;  %v3085_v47 = vrot.slane %v3084_v10, 2 }
 0x433   : > { %v3072_v2 = vmax.f32 %v3070_v57, %v3071_v43  ;;  %v3078_v1 = vrot.slane %v3077_v24, 2  ;;  %v3091_v44 = vmax.f32 %v3089_v50, %v3090_v3  ;;  %v3111_v34 = vrot.slane %v3110_v39, 4 }
 0x434   : > { %v3105_v30 = vmax.f32 %v3103_v37, %v3104_v55  ;;  %v3099_v48 = vrot.slane %v3098_v63, 2  ;;  %v3118_v8 = vrot.slane %v3117_v13, 4  ;;  %v3086_v26 = vmax.f32 %v3084_v10, %v3085_v47 }
 0x435   : > { %v3073_v14 = vrot.slane %v3072_v2, 1  ;;  %v3079_v35 = vmax.f32 %v3077_v24, %v3078_v1  ;;  %v3092_v56 = vrot.slane %v3091_v44, 2  ;;  %v3112_v21 = vmax.f32 %v3110_v39, %v3111_v34 }
 0x436   : > { %v3106_v22 = vrot.slane %v3105_v30, 2  ;;  %v3100_v15 = vmax.f32 %v3098_v63, %v3099_v48  ;;  %v3119_v36 = vmax.f32 %v3117_v13, %v3118_v8  ;;  %v3087_v57 = vrot.slane %v3086_v26, 1 }
 0x437   : > { %v3074_v9 = vmax.f32 %v3072_v2, %v3073_v14  ;;  %v3080_v51 = vrot.slane %v3079_v35, 1  ;;  %v3093_v54 = vmax.f32 %v3091_v44, %v3092_v56  ;;  %v3113_v50 = vrot.slane %v3112_v21, 2 }
 0x438   : > { %v3107_v12 = vmax.f32 %v3105_v30, %v3106_v22  ;;  %v3101_v43 = vrot.slane %v3100_v15, 1  ;;  %v3120_v37 = vrot.slane %v3119_v36, 2  ;;  %v3088_v24 = vmax.f32 %v3086_v26, %v3087_v57  ;;  %v2250_v26 = vpop.permute.xlu0 %2249 }
 0x439   : > { %v3081_v3 = vmax.f32 %v3079_v35, %v3080_v51  ;;  %v3094_v55 = vrot.slane %v3093_v54, 1  ;;  %v3286_v40 = vsel %vm3236_vm5, %v3074_v9, -inf  ;;  %v3114_v11 = vmax.f32 %v3112_v21, %v3113_v50 }
 0x43a   : > { %v3108_v4 = vrot.slane %v3107_v12, 1  ;;  %v3102_v1 = vmax.f32 %v3100_v15, %v3101_v43  ;;  %v3121_v10 = vmax.f32 %v3119_v36, %v3120_v37  ;;  %v3287_v13 = vmax.f32 %v5884_v42, %v3286_v40 }
 0x43b   : > { %v3095_v63 = vmax.f32 %v3093_v54, %v3094_v55  ;;  %v3289_v56 = vsel %vm3236_vm5, %v3081_v3, -inf  ;;  %v3115_v2 = vrot.slane %v3114_v11, 1  ;;  %v3292_v47 = vsel %vm3236_vm5, %v3088_v24, -inf }
 0x43c   : > { %v3109_v39 = vmax.f32 %v3107_v12, %v3108_v4  ;;  %v3122_v44 = vrot.slane %v3121_v10, 1  ;;  %v3290_v30 = vmax.f32 %v5893_v53, %v3289_v56  ;;  %v3293_v48 = vmax.f32 %v5887_v6, %v3292_v47 }
 0x43d   : > { %v3295_v34 = vsel %vm3236_vm5, %v3095_v63, -inf  ;;  %v3298_v15 = vsel %vm3236_vm5, %v3102_v1, -inf  ;;  %v3116_v4 = vmax.f32 %v3114_v11, %v3115_v2  ;;  %v5950_v35 = vsel %vm3236_vm5, %v3287_v13, -inf }
 0x43e   : > { %v5943_v8 = vsel %vm3236_vm5, %v3109_v39, -inf  ;;  %v3123_v14 = vmax.f32 %v3121_v10, %v3122_v44  ;;  %v3296_v40 = vmax.f32 %v5896_v61, %v3295_v34  ;;  %v3299_v42 = vmax.f32 %v5890_v28, %v3298_v15 }
 0x43f   : > { %v3302_v53 = vmax.f32 %v5903_v33, %v5943_v8  ;;  %v5953_v6 = vsel %vm3236_vm5, %v3290_v30, -inf  ;;  %v3360_v22 = vsel %vm3236_vm5, %v3293_v48, -inf  ;;  %v5957_v21 = vsel %vm3236_vm5, %v3116_v4, -inf }
 0x440   : > { %v5960_v11 = vsel %vm3236_vm5, %v3123_v14, -inf  ;;  %v3361_v61 = vsel %vm3236_vm5, %v3296_v40, -inf  ;;  %v5970_v54 = vsel %vm3236_vm5, %v3299_v42, -inf  ;;  %v2677_v12 = vrot.slane %v5834_v52, %v5500_v20 }
 0x441   : > { %v3362_v51 = vmax.f32 %v3360_v22, %v3361_v61  ;;  %v2684_v57 = vrot.slane %v5862_v23, %v5500_v20  ;;  %v2736_v43 = vcombine.high %v2250_v26, %v6256_v58  ;;  %v2743_v50 = vrot.slane %v2250_v26, %v5500_v20 }
 0x442   : > { %v6265_v3 = vmax.f32 %v5623_v5, %v5660_v17  ;;  %v6266_v24 = vmax.f32 %v5630_v62, %v5680_v19  ;;  %v6267_v23 = vmax.f32 %v5644_v60, %v5683_v25  ;;  %v2686_v10 = vcombine.high %v5552_v49, %v2677_v12 }
 0x443   : > { %v5979_v37 = vadd.f32 %v5677_v16, %v3362_v51  ;;  %v2685_v16 = vcombine.low %v5552_v49, %v2677_v12  ;;  %v2701_v5 = vcombine.low %v5556_v45, %v2684_v57  ;;  %v2702_v17 = vcombine.high %v5556_v45, %v2684_v57 }
 0x444   : > { %v5985_v55 = vsel %vm3236_vm5, %v6265_v3, -inf  ;;  %v5991_v52 = vsel %vm3236_vm5, %v6266_v24, -inf  ;;  %v5997_v1 = vsel %vm3236_vm5, %v6267_v23, -inf  ;;  %v6004_v63 = vrot.slane %v2736_v43, %v5500_v20 }
 0x445   : > { %v2751_v62 = vcombine.low %v5560_v32, %v2743_v50  ;;  %v2752_v19 = vcombine.high %v5560_v32, %v2743_v50  ;;  %v2693_v25 = vrot.slane %v2685_v16, %v5567_v27  ;;  %v2700_v39 = vrot.slane %v2686_v10, %v5567_v27 }
 0x446   : > { %v2709_v49 = vrot.slane %v2701_v5, %v5567_v27  ;;  %v2716_v13 = vrot.slane %v2702_v17, %v5567_v27  ;;  %v2767_v32 = vcombine.low %v5564_v46, %v6004_v63  ;;  %v2768_v2 = vcombine.high %v5564_v46, %v6004_v63 }
 0x447   : > { %v6015_v45 = vrot.slane %v2751_v62, %v5567_v27  ;;  %v6018_v56 = vrot.slane %v2752_v19, %v5567_v27  ;;  %v2717_v44 = vcombine.high %v2693_v25, %v6256_v58  ;;  %v2718_v30 = vcombine.high %v2700_v39, %v6256_v58 }
 0x448   : > { %v2719_v47 = vcombine.high %v2709_v49, %v6256_v58  ;;  %v2720_v48 = vcombine.high %v2716_v13, %v6256_v58  ;;  %v3124_v34 = vsel %vm2787_vm4, %v2693_v25, -inf  ;;  %v3138_v15 = vsel %vm2787_vm4, %v2700_v39, -inf }
 0x449   : > { %v3152_v4 = vsel %vm2787_vm4, %v2709_v49, -inf  ;;  %v3166_v14 = vsel %vm2787_vm4, %v2716_v13, -inf  ;;  %v3125_v40 = vrot.slane %v3124_v34, 4  ;;  %v3131_v42 = vsel %vm2787_vm4, %v2717_v44, -inf }
 0x44a   : > { %v3139_v22 = vrot.slane %v3138_v15, 4  ;;  %v3145_v26 = vsel %vm2787_vm4, %v2718_v30, -inf  ;;  %v3132_v61 = vrot.slane %v3131_v42, 4  ;;  %v3153_v12 = vrot.slane %v3152_v4, 4 }
 0x44b   : > { %v3146_v51 = vrot.slane %v3145_v26, 4  ;;  %v3159_v57 = vsel %vm2787_vm4, %v2719_v47, -inf  ;;  %v3126_v43 = vmax.f32 %v3124_v34, %v3125_v40  ;;  %v3167_v24 = vrot.slane %v3166_v14, 4 }
 0x44c   : > { %v3140_v50 = vmax.f32 %v3138_v15, %v3139_v22  ;;  %v3160_v3 = vrot.slane %v3159_v57, 4  ;;  %v3133_v23 = vmax.f32 %v3131_v42, %v3132_v61  ;;  %v3154_v10 = vmax.f32 %v3152_v4, %v3153_v12 }
 0x44d   : > { %v3147_v16 = vmax.f32 %v3145_v26, %v3146_v51  ;;  %v3173_v5 = vsel %vm2787_vm4, %v2720_v48, -inf  ;;  %v3127_v17 = vrot.slane %v3126_v43, 2  ;;  %v3168_v25 = vmax.f32 %v3166_v14, %v3167_v24 }
 0x44e   : > { %v3141_v62 = vrot.slane %v3140_v50, 2  ;;  %v3161_v19 = vmax.f32 %v3159_v57, %v3160_v3  ;;  %v3134_v39 = vrot.slane %v3133_v23, 2  ;;  %v3155_v13 = vrot.slane %v3154_v10, 2 }
 0x44f   : > { %v3148_v49 = vrot.slane %v3147_v16, 2  ;;  %v3174_v44 = vrot.slane %v3173_v5, 4  ;;  %v3128_v30 = vmax.f32 %v3126_v43, %v3127_v17  ;;  %v3169_v34 = vrot.slane %v3168_v25, 2 }
 0x450   : > { %v3142_v28 = vmax.f32 %v3140_v50, %v3141_v62  ;;  %v3162_v47 = vrot.slane %v3161_v19, 2  ;;  %v3135_v15 = vmax.f32 %v3133_v23, %v3134_v39  ;;  %v3156_v22 = vmax.f32 %v3154_v10, %v3155_v13 }
 0x451   : > { %v3149_v40 = vmax.f32 %v3147_v16, %v3148_v49  ;;  %v3175_v42 = vmax.f32 %v3173_v5, %v3174_v44  ;;  %v3129_v26 = vrot.slane %v3128_v30, 1  ;;  %v3170_v48 = vmax.f32 %v3168_v25, %v3169_v34 }
 0x452   : > { %v3143_v4 = vrot.slane %v3142_v28, 1  ;;  %v3163_v61 = vmax.f32 %v3161_v19, %v3162_v47  ;;  %v3136_v51 = vrot.slane %v3135_v15, 1  ;;  %v3157_v57 = vrot.slane %v3156_v22, 1 }
 0x453   : > { %v3150_v12 = vrot.slane %v3149_v40, 1  ;;  %v3176_v14 = vrot.slane %v3175_v42, 2  ;;  %v3130_v3 = vmax.f32 %v3128_v30, %v3129_v26  ;;  %v3171_v9 = vrot.slane %v3170_v48, 1 }
 0x454   : > { %v3144_v24 = vmax.f32 %v3142_v28, %v3143_v4  ;;  %v3164_v60 = vrot.slane %v3163_v61, 1  ;;  %v3137_v43 = vmax.f32 %v3135_v15, %v3136_v51  ;;  %v3158_v17 = vmax.f32 %v3156_v22, %v3157_v57 }
 0x455   : > { %v3151_v50 = vmax.f32 %v3149_v40, %v3150_v12  ;;  %v3177_v62 = vmax.f32 %v3175_v42, %v3176_v14  ;;  %v3172_v16 = vmax.f32 %v3170_v48, %v3171_v9  ;;  %v6037_v10 = vsel %vm3236_vm5, %v3130_v3, -inf }
 0x456   : > { %v3165_v23 = vmax.f32 %v3163_v61, %v3164_v60  ;;  %v6040_v5 = vsel %vm3236_vm5, %v3144_v24, -inf  ;;  %v6043_v25 = vsel %vm3236_vm5, %v3137_v43, -inf  ;;  %v6049_v39 = vsel %vm3236_vm5, %v3158_v17, -inf }
 0x457   : > { %v3178_v19 = vrot.slane %v3177_v62, 1  ;;  %v6046_v28 = vsel %vm3236_vm5, %v3151_v50, -inf  ;;  %v6055_v9 = vsel %vm3236_vm5, %v3172_v16, -inf  ;;  %v2775_v60 = vrot.slane %v2767_v32, %v5567_v27 }
 0x458   : > { %v6052_v49 = vsel %vm3236_vm5, %v3165_v23, -inf  ;;  %v2782_v13 = vrot.slane %v2768_v2, %v5567_v27  ;;  %v2783_v30 = vcombine.high %v6015_v45, %v6256_v58  ;;  %v2784_v47 = vcombine.high %v6018_v56, %v6256_v58 }
 0x459   : > { %v3179_v44 = vmax.f32 %v3177_v62, %v3178_v19  ;;  %v3180_v34 = vsel %vm2787_vm4, %v6015_v45, -inf  ;;  %v2785_v15 = vcombine.high %v2775_v60, %v6256_v58  ;;  %v3194_v22 = vsel %vm2787_vm4, %v6018_v56, -inf }
 0x45a   : > { %v2786_v40 = vcombine.high %v2782_v13, %v6256_v58  ;;  %v3181_v32 = vrot.slane %v3180_v34, 4  ;;  %v3187_v63 = vsel %vm2787_vm4, %v2783_v30, -inf  ;;  %v3195_v2 = vrot.slane %v3194_v22, 4 }
 0x45b   : > { %v6076_v46 = vsel %vm3236_vm5, %v3179_v44, -inf  ;;  %v3201_v42 = vsel %vm2787_vm4, %v2784_v47, -inf  ;;  %v3188_v4 = vrot.slane %v3187_v63, 4  ;;  %v3208_v45 = vsel %vm2787_vm4, %v2775_v60, -inf }
 0x45c   : > { %v3182_v26 = vmax.f32 %v3180_v34, %v3181_v32  ;;  %v3202_v61 = vrot.slane %v3201_v42, 4  ;;  %v3196_v48 = vmax.f32 %v3194_v22, %v3195_v2  ;;  %v3209_v51 = vrot.slane %v3208_v45, 4 }
 0x45d   : > { %v3215_v12 = vsel %vm2787_vm4, %v2785_v15, -inf  ;;  %v3222_v57 = vsel %vm2787_vm4, %v2782_v13, -inf  ;;  %v3189_v14 = vmax.f32 %v3187_v63, %v3188_v4  ;;  %v3229_v62 = vsel %vm2787_vm4, %v2786_v40, -inf }
 0x45e   : > { %v3183_v56 = vrot.slane %v3182_v26, 2  ;;  %v3203_v3 = vmax.f32 %v3201_v42, %v3202_v61  ;;  %v3216_v24 = vrot.slane %v3215_v12, 4  ;;  %v3197_v43 = vrot.slane %v3196_v48, 2 }
 0x45f   : > { %v3210_v50 = vmax.f32 %v3208_v45, %v3209_v51  ;;  %v3223_v17 = vrot.slane %v3222_v57, 4  ;;  %v3190_v16 = vrot.slane %v3189_v14, 2  ;;  %v3230_v34 = vrot.slane %v3229_v62, 4 }
 0x460   : > { %v3184_v23 = vmax.f32 %v3182_v26, %v3183_v56  ;;  %v3204_v19 = vrot.slane %v3203_v3, 2  ;;  %v3217_v44 = vmax.f32 %v3215_v12, %v3216_v24  ;;  %v3198_v60 = vmax.f32 %v3196_v48, %v3197_v43 }
 0x461   : > { %v3211_v30 = vrot.slane %v3210_v50, 2  ;;  %v3224_v47 = vmax.f32 %v3222_v57, %v3223_v17  ;;  %v3191_v32 = vmax.f32 %v3189_v14, %v3190_v16  ;;  %v3231_v4 = vmax.f32 %v3229_v62, %v3230_v34 }
 0x462   : > { %v3185_v15 = vrot.slane %v3184_v23, 1  ;;  %v3205_v13 = vmax.f32 %v3203_v3, %v3204_v19  ;;  %v3218_v22 = vrot.slane %v3217_v44, 2  ;;  %v3199_v63 = vrot.slane %v3198_v60, 1 }
 0x463   : > { %v3212_v2 = vmax.f32 %v3210_v50, %v3211_v30  ;;  %v3225_v42 = vrot.slane %v3224_v47, 2  ;;  %v3192_v45 = vrot.slane %v3191_v32, 1  ;;  %v3232_v12 = vrot.slane %v3231_v4, 2 }
 0x464   : > { %v3186_v61 = vmax.f32 %v3184_v23, %v3185_v15  ;;  %v3206_v51 = vrot.slane %v3205_v13, 1  ;;  %v3219_v40 = vmax.f32 %v3217_v44, %v3218_v22  ;;  %v3200_v26 = vmax.f32 %v3198_v60, %v3199_v63 }
 0x465   : > { %v3213_v56 = vrot.slane %v3212_v2, 1  ;;  %v3226_v36 = vmax.f32 %v3224_v47, %v3225_v42  ;;  %v3193_v48 = vmax.f32 %v3191_v32, %v3192_v45  ;;  %v3233_v17 = vmax.f32 %v3231_v4, %v3232_v12 }
 0x466   : > { %v3207_v24 = vmax.f32 %v3205_v13, %v3206_v51  ;;  %v3220_v57 = vrot.slane %v3219_v40, 1  ;;  %v3310_v43 = vsel %vm3236_vm5, %v3186_v61, -inf  ;;  %v3316_v23 = vsel %vm3236_vm5, %v3200_v26, -inf }
 0x467   : > { %v3214_v14 = vmax.f32 %v3212_v2, %v3213_v56  ;;  %v3227_v3 = vrot.slane %v3226_v36, 1  ;;  %v3311_v50 = vmax.f32 %v6037_v10, %v3310_v43  ;;  %v3313_v62 = vsel %vm3236_vm5, %v3193_v48, -inf  ;;  %v4198_v56 = vld [vmem:[%s6232_s4] ss:$0 sm:$0xff] }
 0x468   : > { %v3221_v16 = vmax.f32 %v3219_v40, %v3220_v57  ;;  %v3319_v19 = vsel %vm3236_vm5, %v3207_v24, -inf  ;;  %v3234_v60 = vrot.slane %v3233_v17, 1  ;;  %v3314_v30 = vmax.f32 %v6043_v25, %v3313_v62  ;;  %v6270_v48 = vld [vmem:[#allocation8_spill] sm:$0xff]  ;;  %v6271_v24 = vld [vmem:[#allocation11_spill] sm:$0xff] }
 0x469   : > { %v3228_v44 = vmax.f32 %v3226_v36, %v3227_v3  ;;  %v3317_v47 = vmax.f32 %v6040_v5, %v3316_v23  ;;  %v3320_v34 = vmax.f32 %v6046_v28, %v3319_v19  ;;  %v3322_v15 = vsel %vm3236_vm5, %v3214_v14, -inf  ;;  %v6280_v23 = vld [vmem:[#allocation10_spill] sm:$0xff] }
 0x46a   : > { %v3325_v32 = vsel %vm3236_vm5, %v3221_v16, -inf  ;;  %v3369_v10 = vsel %vm3236_vm5, %v3311_v50, -inf  ;;  %v3235_v13 = vmax.f32 %v3233_v17, %v3234_v60  ;;  %v3323_v22 = vmax.f32 %v6049_v39, %v3322_v15  ;;  %v6276_v50 = vld [vmem:[#allocation6_spill] sm:$0xff] }
 0x46b   : > { %v3326_v63 = vmax.f32 %v6052_v49, %v3325_v32  ;;  %v3328_v36 = vsel %vm3236_vm5, %v3228_v44, -inf  ;;  %v3370_v25 = vsel %vm3236_vm5, %v3314_v30, -inf  ;;  %v3372_v5 = vsel %vm3236_vm5, %v3317_v47, -inf }
 0x46c   : > { %v3329_v2 = vmax.f32 %v6055_v9, %v3328_v36  ;;  %v3373_v28 = vsel %vm3236_vm5, %v3320_v34, -inf  ;;  %v3331_v42 = vsel %vm3236_vm5, %v3235_v13, -inf  ;;  %v3371_v4 = vmax.f32 %v3369_v10, %v3370_v25  ;;  %v6283_v36 = vld [vmem:[#allocation7_spill] sm:$0xff] }
 0x46d   : > { %v3374_v61 = vmax.f32 %v3372_v5, %v3373_v28  ;;  %v3375_v45 = vsel %vm3236_vm5, %v3323_v22, -inf  ;;  %v3332_v39 = vmax.f32 %v6076_v46, %v3331_v42  ;;  %v3344_v49 = vmax.f32 %v5991_v52, %v5997_v1  ;;  %v6284_v5 = vld [vmem:[#allocation12_spill] sm:$0xff] }
 0x46e   : > { %v6268_v9 = vmax.f32 %v5766_v31, %v5808_v29  ;;  %v6269_v40 = vmax.f32 %v5769_v0, %v5817_v38  ;;  %v6272_v52 = vmax.f32 %v6270_v48, %v6271_v24  ;;  %v3364_v31 = vsel %vm3236_vm5, %v3302_v53, -inf }
 0x46f   : > { %v3401_v12 = vadd.f32 %v4198_v56, %v3374_v61  ;;  %v3365_v29 = vmax.f32 %v5970_v54, %v3364_v31  ;;  %v6273_v38 = vmax.f32 %v5912_v59, %v5957_v21  ;;  %v3376_v3 = vsel %vm3236_vm5, %v3326_v63, -inf  ;;  %v6275_v54 = vld [vmem:[#allocation5_spill] sm:$0xff] }
 0x470   : > { %v3352_v51 = vsel %vm3236_vm5, %v6268_v9, -inf  ;;  %v3354_v26 = vsel %vm3236_vm5, %v6269_v40, -inf  ;;  %v3355_v1 = vsel %vm3236_vm5, %v6272_v52, -inf  ;;  %v3378_v33 = vsel %vm3236_vm5, %v3329_v2, -inf }
 0x471   : > { %v3353_v46 = vmax.f32 %v5832_v41, %v3352_v51  ;;  %v3356_v0 = vmax.f32 %v3354_v26, %v3355_v1  ;;  %v3366_v57 = vsel %vm3236_vm5, %v6273_v38, -inf  ;;  %v6274_v41 = vmax.f32 %v5927_v7, %v5960_v11  ;;  %v6279_v11 = vld [vmem:[#allocation9_spill] sm:$0xff] }
 0x472   : > { %v3379_v8 = vsel %vm3236_vm5, %v3332_v39, -inf  ;;  %v3377_v53 = vmax.f32 %v3375_v45, %v3376_v3  ;;  %v6277_v16 = vmax.f32 %v6275_v54, %v6276_v50  ;;  %v6278_v21 = vmax.f32 %v5695_v18, %v5985_v55 }
 0x473   : > { %v3367_v43 = vsel %vm3236_vm5, %v6274_v41, -inf  ;;  %v3380_v17 = vmax.f32 %v3378_v33, %v3379_v8  ;;  %v3391_v7 = vadd.f32 %v4198_v56, %v3344_v49  ;;  %v6281_v19 = vmax.f32 %v6279_v11, %v6280_v23 }
 0x474   : > { %v3368_v14 = vmax.f32 %v3366_v57, %v3367_v43  ;;  %v3388_v59 = vadd.f32 %v4198_v56, %v6277_v16  ;;  %v3390_v62 = vadd.f32 %v4198_v56, %v6278_v21  ;;  %v3394_v60 = vadd.f32 %v4198_v56, %v3353_v46 }
 0x475   : > { %v3392_v44 = vadd.f32 %v4198_v56, %v6281_v19  ;;  %v3395_v30 = vadd.f32 %v4198_v56, %v3356_v0  ;;  %v6282_v47 = vmax.f32 %v5950_v35, %v5953_v6  ;;  %v3398_v15 = vadd.f32 %v4198_v56, %v3365_v29 }
 0x476   : > { %v3399_v32 = vadd.f32 %v4198_v56, %v3368_v14  ;;  %v3400_v10 = vadd.f32 %v4198_v56, %v3371_v4  ;;  %v3402_v13 = vadd.f32 %v4198_v56, %v3377_v53  ;;  %v3403_v22 = vadd.f32 %v4198_v56, %v3380_v17 }
 0x477   : > { %v3396_v34 = vadd.f32 %v4198_v56, %v6282_v47  ;;  %v3404_v63 = vmax.f32 %v3388_v59, 0.0  ;;  %v3405_v18 = vmax.f32 %v6283_v36, 0.0  ;;  %v3406_v55 = vmax.f32 %v3390_v62, 0.0 }
 0x478   : > { %v3407_v2 = vmax.f32 %v3391_v7, 0.0  ;;  %v3408_v25 = vmax.f32 %v3392_v44, 0.0  ;;  %v3409_v28 = vmax.f32 %v6284_v5, 0.0  ;;  %v3410_v42 = vmax.f32 %v3394_v60, 0.0 }
 0x479   : > { %v3411_v61 = vmax.f32 %v3395_v30, 0.0  ;;  %v3412_v45 = vmax.f32 %v3396_v34, 0.0  ;;  %v3413_v39 = vmax.f32 %v5979_v37, 0.0  ;;  %v3414_v35 = vmax.f32 %v3398_v15, 0.0 }
 0x47a   : > { %v3415_v6 = vmax.f32 %v3399_v32, 0.0  ;;  %v3416_v49 = vmax.f32 %v3400_v10, 0.0  ;;  %v3417_v9 = vmax.f32 %v3401_v12, 0.0  ;;  %v3418_v4 = vmax.f32 %v3402_v13, 0.0 }
 0x47b   : > { %v3419_v51 = vmax.f32 %v3403_v22, 0.0  ;;  %v3436_v40 = vrot.slane %v3405_v18, 7  ;;  %v3439_v26 = vrot.slane %v3406_v55, 6  ;;  %v3442_v56 = vrot.slane %v3407_v2, 5 }
 0x47c   : > { %v3445_v48 = vrot.slane %v3409_v28, 7  ;;  %v3447_v24 = vrot.slane %v3410_v42, 6  ;;  %v3449_v52 = vrot.slane %v3411_v61, 5  ;;  %v3451_v37 = vrot.slane %v3413_v39, 7 }
 0x47d   : > { %v3438_v46 = vsel %vm3437_vm0, %v3436_v40, %v3404_v63  ;;  %v3453_v31 = vrot.slane %v3414_v35, 6  ;;  %v3455_v0 = vrot.slane %v3415_v6, 5  ;;  %v3457_v38 = vrot.slane %v3417_v9, 7 }
 0x47e   : > { %v3441_v1 = vsel %vm3440_vm1, %v3439_v26, %v3438_v46  ;;  %v3446_v29 = vsel %vm3437_vm0, %v3445_v48, %v3408_v25  ;;  %v3459_v57 = vrot.slane %v3418_v4, 6  ;;  %v3452_v43 = vsel %vm3437_vm0, %v3451_v37, %v3412_v45 }
 0x47f   : > { %v3444_v12 = vsel %vm3443_vm2, %v3442_v56, %v3441_v1  ;;  %v3448_v41 = vsel %vm3440_vm1, %v3447_v24, %v3446_v29  ;;  %v3461_v14 = vrot.slane %v3419_v51, 5  ;;  %v3454_v33 = vsel %vm3440_vm1, %v3453_v31, %v3452_v43 }
 0x480   : > { %v3450_v3 = vsel %vm3443_vm2, %v3449_v52, %v3448_v41  ;;  %v3458_v8 = vsel %vm3437_vm0, %v3457_v38, %v3416_v49  ;;  %v3456_v53 = vsel %vm3443_vm2, %v3455_v0, %v3454_v33 }
 0x481   : > { %v3460_v17 = vsel %vm3440_vm1, %v3459_v57, %v3458_v8  ;;  %v3467_v50 = vcombine.low %v3444_v12, %v3456_v53 }
 0x482   : > { %v3462_v54 = vsel %vm3443_vm2, %v3461_v14, %v3460_v17 }
 0x483   : > { %v3475_v16 = vcombine.low %v3450_v3, %v3462_v54  ;;  %v3474_v59 = vrot.slane %v3467_v50, %v5500_v20 }
 0x485   : > { %v3482_v21 = vrot.slane %v3475_v16, %v5500_v20 }
 0x487   : > { %v3484_v62 = vcombine.high %v3474_v59, %v3482_v21  ;;  %v3483_v7 = vcombine.low %v3474_v59, %v3482_v21 }
 0x489   : > { %v3498_v11 = vrot.slane %v3484_v62, %v5567_v27  ;;  %v3491_v23 = vrot.slane %v3483_v7, %v5567_v27 }
 0x48b   : > { %3506 = vrot.lane.b32.xlu0 %v3498_v11, %s4284_s11  ;;  %v3499_v19 = vcombine.high %v3491_v23, %v6256_v58  ;;  %v3500_v44 = vcombine.high %v3498_v11, %v6256_v58 }
 0x48d   : > { %3502 = vrot.lane.b32.xlu1 %v3499_v19, %s4288_s10 }
 0x491   : > { %3510 = vrot.lane.b32.xlu1 %v3500_v44, %s4286_s27  ;;  %s4289_s27 = smov [#allocation2]  }
 0x492   : > { %s4203_s29 = sshll.u32 %s4289_s27, 4  ;;  %s4204_s29 = int_to_ptr.vmem [resolvable:$false] %s4203_s29 }
 0x493   : > { %s4205_s7 = scalar_lea.vmem %s4204_s29, 128  ;;  %p4206_p1 = scmp.lt.s32.totalorder %s6183_s17, %s4204_s29 }
 0x494   : > { %p4207_p2 = scmp.lt.s32.totalorder %s4205_s7, %s4199_s25 }
 0x496   : > { %p4208_p3 = por %p4207_p2, %p4206_p1 }
 0x498   : > { %p4209_p5 = pnand %p4208_p3, %p4202_p0 }
 0x4fd   : > { %v3507_v27 = vpop.permute.xlu0 %3506 }
 0x4ff   : > { %v3503_v60 = vpop.permute.xlu1 %3502 }
 0x500   : > { %v3513_v20 = vsel %vm3236_vm5, %v3491_v23, %v3503_v60 }
 0x501   : > { %v3514_v30 = vsel %vm1595_vm12, %v3513_v20, %v3507_v27 }
 0x503   : > { %v3511_v47 = vpop.permute.xlu1 %3510 }
 0x504   : > { %v3516_v58 = vsel %vm3515_vm3, %v3514_v30, %v3511_v47 }
 0x505   : > { %3517 = vst [vmem:[%s241_s16] sm:$0xf] %v3516_v58 }
 0x506   : > { %4212 = shalt.err (!%p4209_p5)
}
 0x507   : > { %s4213_s8 = scalar_lea.hbm %s6181_s15, 64  ;;  %s4217_s12 = scalar_lea.hbm %s6233_s5, 128 }
 0x508   : > { %p4214_p6 = scmp.ne.s32.totalorder %s6181_s15, %s4213_s8  ;;  %p4218_p10 = scmp.lt.u32.totalorder %s6181_s15, %s6233_s5 }
 0x509   : > { %p4219_p11 = scmp.lt.u32.totalorder %s4217_s12, %s4213_s8  ;;  %p4221_p13 = scmp.lt.u32.totalorder %s4213_s8, %s6181_s15 }
 0x50a   : > { %p4215_p7 = pnand %p4214_p6, %p4360_p4 }
 0x50b   : > { %p4220_p12 = por %p4219_p11, %p4218_p10 }
 0x50c   : > { %p4216_p9 = pneg %p4215_p7 }
 0x50d   : > { %p4222_p0 = por %p4221_p13, %p4220_p12 }
 0x50f   : > { %p4223_p1 = pnand %p4222_p0, %p4216_p9 }
 0x511   : > { %4226 = shalt.err (!%p4223_p1)
}
 0x512   : > { %4062 = dma.vmem_to_hbm [thread:$0]  (%p4360_p4), %s6183_s17, 64, %s6181_s15, %s3519_s21  }
 0x513 PF: > { %p4068_p2 = scmp.ge.s32.totalorder %s4277_s23, 2  ;;  %s3545_s16 = sand.u32 1, %s4257_s18  }
 0x514   : > { %s3546_s11 = scalar_lea.sflag [#allocation3], %s3545_s16 }
 0x515   : > { %p4065_p3 = pnand %p4068_p2, %p4367_p8 }
 0x517   : > { %4252 = dma.done.wait (!%p4065_p3), %s3546_s11, 64  }
 0x518   : > { %4254 = vsyncadd (!%p4065_p3), %s3546_s11, 4294967232  ;;  %s18_s23 = sadd.s32 1, %s4277_s23   ;;  %s6285_s18 = smov %s4261_s19 }
 0x519   : > { %p15_p5 = scmp.ge.s32.totalorder %s18_s23, 4   ;;  %s6286_s19 = smov %s4265_s20 }
 0x51a   : > { %s6287_s20 = smov %s4373_s6  ;;  %s6288_s21 = smov %s4273_s22 }
 0x51b   : > { %s6289_s22 = smov %s6291_s26  ;;  %17 = sbr.rel (!%p15_p5) target bundleno = 4 (0x4), region = 79 }
 0x522   :  { %3551 = vsyncpa [#allocation3], 1 }
 0x523   :  { %3553 = vsyncpa [#allocation3 + $0x1], 1 }

</bundles_post_ra>
